<compile_context>
chip_gen: v7x
topology: tpu7x:2x2x1
jax: 0.10.0
libtpu: 0.0.40
codegen_flags: <defaults>
</compile_context>

<pallas_src>
import jax
import jax.numpy as jnp
from jax.experimental import pallas as pl
from jax.experimental.pallas import tpu as pltpu


# ----------------------------- helpers --------------------------------------


def _conv_out_dim(d):
    # 3x3 conv, stride 2, VALID padding.
    return (d - 3) // 2 + 1


# --------------------------- fused Pallas kernel ----------------------------


def _build_fused_kernel(conv_dims, feature_dim, compute_dtype):
    """conv_dims[l] = (H, W, C) input of conv layer l; conv_dims[-1] = last conv output."""
    num_layers = len(conv_dims) - 1

    def kernel(*refs):
        idx = 0
        x_ref = refs[idx]; idx += 1
        w_refs, b_refs = [], []
        for _ in range(num_layers):
            w_refs.append(refs[idx]); idx += 1
            b_refs.append(refs[idx]); idx += 1
        fcw_ref = refs[idx]; idx += 1
        fcb_ref = refs[idx]; idx += 1
        g_ref = refs[idx]; idx += 1
        beta_ref = refs[idx]; idx += 1
        o_ref = refs[idx]; idx += 1
        im_refs = [refs[idx + l] for l in range(num_layers)]; idx += num_layers
        fc_ref = refs[idx]

        # ---- conv0: space-to-depth input -> im2col scratch -> ONE matmul ----
        cin = conv_dims[0][2]
        h1, w1, _ = conv_dims[1]
        for r in range(h1):                                    # output rows
            for i in range(3):
                for j in range(3):
                    t = i * 3 + j
                    ch = (i % 2) * 2 * cin + (j % 2) * cin
                    # unit-stride static slice thanks to space-to-depth input
                    piece = x_ref[0, r + i // 2, j // 2:j // 2 + w1, ch:ch + cin]
                    im_refs[0][r * w1:(r + 1) * w1, t * cin:(t + 1) * cin] = piece
        act = jnp.dot(im_refs[0][...].astype(compute_dtype), w_refs[0][...],
                      preferred_element_type=jnp.float32)
        act = jnp.maximum(act + b_refs[0][...], 0.0)           # (H1*W1, NF) f32

        # ---- conv layers 1..L-1: row gather -> im2col scratch -> ONE matmul ----
        for l in range(1, num_layers):
            _, wi, ci = conv_dims[l]
            ho, wo, _ = conv_dims[l + 1]
            for oh in range(ho):
                for ow in range(wo):
                    p = oh * wo + ow
                    for i in range(3):
                        for j in range(3):
                            t = i * 3 + j
                            src = (2 * oh + i) * wi + (2 * ow + j)
                            im_refs[l][p:p + 1, t * ci:(t + 1) * ci] = act[src:src + 1, :]
            act = jnp.dot(im_refs[l][...].astype(compute_dtype), w_refs[l][...],
                          preferred_element_type=jnp.float32)
            act = jnp.maximum(act + b_refs[l][...], 0.0)       # (Ho*Wo, Co) f32

        # ---- flatten (position-major, matches pre-permuted FC weight) + FC ----
        ho, wo, co = conv_dims[-1]
        for p in range(ho * wo):
            fc_ref[0:1, p * co:(p + 1) * co] = act[p:p + 1, :]
        y = jnp.dot(fc_ref[...].astype(compute_dtype), fcw_ref[...],
                    preferred_element_type=jnp.float32) + fcb_ref[...]

        # ---- FC bias + LayerNorm(eps=1e-5) + tanh, all in f32 (VPU/EUP). ----
        mean = jnp.mean(y, axis=-1, keepdims=True)
        var = jnp.mean(jnp.square(y - mean), axis=-1, keepdims=True)
        y = (y - mean) * jax.lax.rsqrt(var + 1e-5)
        y = y * g_ref[...] + beta_ref[...]
        o_ref[...] = jnp.tanh(y).reshape(1, 1, feature_dim).astype(o_ref.dtype)

    return kernel


# ------------------------ parameters & packing ------------------------------


def init_params(key, obs_shape, feature_dim, num_layers=2, num_filters=32):
    """Deterministic synthetic parameters with PyTorch-equivalent shapes."""
    c_in, h, w = obs_shape
    params = {}
    keys = jax.random.split(key, 2 * num_layers + 2)
    in_ch = c_in
    out_h, out_w = h, w
    for i in range(num_layers):
        params[f"conv{i}_w"] = 0.1 * jax.random.normal(
            keys[2 * i], (num_filters, in_ch, 3, 3), jnp.float32
        )  # (Cout, Cin, KH, KW) like nn.Conv2d
        params[f"conv{i}_b"] = 0.01 * jax.random.normal(
            keys[2 * i + 1], (num_filters,), jnp.float32
        )
        in_ch = num_filters
        out_h, out_w = _conv_out_dim(out_h), _conv_out_dim(out_w)
    flat = num_filters * out_h * out_w
    params["fc_w"] = 0.05 * jax.random.normal(
        keys[-2], (feature_dim, flat), jnp.float32
    )  # (out_features, in_features) like nn.Linear
    params["fc_b"] = 0.01 * jax.random.normal(keys[-1], (feature_dim,), jnp.float32)
    params["ln_g"] = jnp.ones((feature_dim,), jnp.float32)
    params["ln_b"] = jnp.zeros((feature_dim,), jnp.float32)
    return params


def pack_params(params, obs_shape, feature_dim, num_layers=2,
                compute_dtype=jnp.bfloat16):
    """One-time weight packing into matmul-ready, kernel-friendly 2D layouts."""
    c_in, h, w = obs_shape
    for _ in range(num_layers):
        h, w = _conv_out_dim(h), _conv_out_dim(w)
    ho, wo = h, w
    nf = params[f"conv{num_layers - 1}_w"].shape[0]

    packed = {}
    for i in range(num_layers):
        wt = params[f"conv{i}_w"]                              # (Cout, Cin, 3, 3)
        cout, cin = wt.shape[0], wt.shape[1]
        packed[f"w{i}"] = (jnp.transpose(wt, (2, 3, 1, 0))     # (KH, KW, Cin, Cout)
                           .reshape(9 * cin, cout).astype(compute_dtype))
        packed[f"b{i}"] = params[f"conv{i}_b"].reshape(1, cout).astype(jnp.float32)
    # FC weight permuted so flat index (c*Ho*Wo + oh*Wo + ow) becomes the
    # position-major ((oh*Wo + ow)*C + c) order produced by the in-kernel flatten.
    packed["fcw"] = (params["fc_w"].reshape(feature_dim, nf, ho, wo)
                     .transpose(2, 3, 1, 0)
                     .reshape(ho * wo * nf, feature_dim)
                     .astype(compute_dtype))
    packed["fcb"] = params["fc_b"].reshape(1, feature_dim).astype(jnp.float32)
    packed["ln_g"] = params["ln_g"].reshape(1, feature_dim).astype(jnp.float32)
    packed["ln_b"] = params["ln_b"].reshape(1, feature_dim).astype(jnp.float32)
    return packed


# ------------------------------- forward ------------------------------------


@jax.jit
def pixel_encoder_forward(obs_nchw, packed):
    num_layers = len([k for k in packed if k.startswith("w")])
    feature_dim = packed["fcb"].shape[1]
    compute_dtype = packed["w0"].dtype

    obs = obs_nchw.astype(jnp.float32)
    b, c, h, w = obs.shape
    assert h % 2 == 0 and w % 2 == 0  # TODO(synk): odd spatial dims not supported (s2d trick)

    # torch: if obs.max() > 1.0: obs = obs / 255.0
    # Only the scalar max stays in XLA; the divide is folded into conv0's weights.
    scale = jnp.where(jnp.max(obs) > 1.0, jnp.float32(1.0 / 255.0), jnp.float32(1.0))
    w0_eff = (packed["w0"].astype(jnp.float32) * scale).astype(compute_dtype)

    # NCHW -> NHWC -> space-to-depth (B, H/2, W/2, 4*C): every stride-2 conv0
    # tap becomes a unit-stride static slice inside the kernel (no 9x im2col in HBM).
    x = jnp.transpose(obs, (0, 2, 3, 1))
    x = x.reshape(b, h // 2, 2, w // 2, 2, c)
    x = jnp.transpose(x, (0, 1, 3, 2, 4, 5)).reshape(b, h // 2, w // 2, 4 * c)

    conv_dims = [(h, w, c)]
    for i in range(num_layers):
        nf = packed[f"b{i}"].shape[1]
        conv_dims.append((_conv_out_dim(conv_dims[-1][0]),
                          _conv_out_dim(conv_dims[-1][1]), nf))

    kernel = _build_fused_kernel(conv_dims, feature_dim, compute_dtype)

    weight_args = []
    weight_specs = []
    for i in range(num_layers):
        for name in (f"w{i}", f"b{i}"):
            arr = w0_eff if name == "w0" else packed[name]
            weight_args.append(arr)
            weight_specs.append(pl.BlockSpec(arr.shape, lambda bi: (0, 0)))
    for name in ("fcw", "fcb", "ln_g", "ln_b"):
        arr = packed[name]
        weight_args.append(arr)
        weight_specs.append(pl.BlockSpec(arr.shape, lambda bi: (0, 0)))

    x_spec = pl.BlockSpec((1, h // 2, w // 2, 4 * c), lambda bi: (bi, 0, 0, 0))
    out_spec = pl.BlockSpec((1, 1, feature_dim), lambda bi: (bi, 0, 0))

    # Per-layer im2col scratch (P_l, 9*C_l) + one FC flatten scratch (1, P*C).
    scratch_shapes = [
        pltpu.VMEM((conv_dims[l + 1][0] * conv_dims[l + 1][1], 9 * conv_dims[l][2]),
                   jnp.float32)
        for l in range(num_layers)
    ] + [
        pltpu.VMEM((1, conv_dims[-1][0] * conv_dims[-1][1] * conv_dims[-1][2]),
                   jnp.float32)
    ]

    out = pl.pallas_call(
        kernel,
        grid=(b,),
        in_specs=[x_spec] + weight_specs,
        out_specs=out_spec,
        out_shape=jax.ShapeDtypeStruct((b, 1, feature_dim), jnp.float32),
        scratch_shapes=scratch_shapes,
        compiler_params=pltpu.CompilerParams(
            dimension_semantics=("parallel",),      # v7x: batch across both TCs
            vmem_limit_bytes=32 * 1024 * 1024,
        ),
    )(x, *weight_args)
    return out.reshape(b, feature_dim)


# ------------------------------ reference -----------------------------------


def _reference_forward(obs, params, num_layers=2):
    obs = obs.astype(jnp.float32)
    x = jnp.where(jnp.max(obs) > 1.0, obs / 255.0, obs)
    for i in range(num_layers):
        wt = params[f"conv{i}_w"]
        bt = params[f"conv{i}_b"]
        x = jax.lax.conv_general_dilated(
            x, wt, window_strides=(2, 2), padding="VALID",
            dimension_numbers=("NCHW", "OIHW", "NCHW"))
        x = jax.nn.relu(x + bt.reshape(1, -1, 1, 1))
    hflat = x.reshape(x.shape[0], -1)
    y = hflat @ params["fc_w"].T + params["fc_b"]
    mean = y.mean(-1, keepdims=True)
    var = ((y - mean) ** 2).mean(-1, keepdims=True)
    y = (y - mean) * jax.lax.rsqrt(var + 1e-5)
    y = y * params["ln_g"] + params["ln_b"]
    return jnp.tanh(y)


# -------------------------------- main --------------------------------------


if __name__ == "__main__":
    obs_shape = (4, 16, 16)     # (C, H, W)
    feature_dim = 32
    num_layers = 2
    batch = 2

    key = jax.random.PRNGKey(0)
    k_obs, k_par = jax.random.split(key)
    # pixel-like values > 1 so the /255 branch is exercised
    obs = 255.0 * jax.random.uniform(k_obs, (batch,) + obs_shape, jnp.float32)
    params = init_params(k_par, obs_shape, feature_dim, num_layers)
    packed = pack_params(params, obs_shape, feature_dim, num_layers)  # packed once

    out = pixel_encoder_forward(obs, packed)
    out = jax.block_until_ready(out)

    assert out.shape == (batch, feature_dim)
    assert bool(jnp.all(jnp.isfinite(out)))

    # loose tolerance: kernel uses bf16 MXU operands with f32 accumulation
    ref = _reference_forward(obs, params, num_layers)
    assert float(jnp.max(jnp.abs(out - ref))) < 0.1

    print("KERNEL_OK")
</pallas_src>

<mosaic_0001>
module attributes {stable_mosaic.version = 11 : i64} {
  func.func @kernel(%arg0: i32, %arg1: memref<1x8x8x16xf32, #tpu.memory_space<vmem>>, %arg2: memref<36x32xbf16, #tpu.memory_space<vmem>>, %arg3: memref<1x32xf32, #tpu.memory_space<vmem>>, %arg4: memref<288x32xbf16, #tpu.memory_space<vmem>>, %arg5: memref<1x32xf32, #tpu.memory_space<vmem>>, %arg6: memref<288x32xbf16, #tpu.memory_space<vmem>>, %arg7: memref<1x32xf32, #tpu.memory_space<vmem>>, %arg8: memref<1x32xf32, #tpu.memory_space<vmem>>, %arg9: memref<1x32xf32, #tpu.memory_space<vmem>>, %arg10: memref<1x1x32xf32, #tpu.memory_space<vmem>>, %arg11: memref<49x36xf32, #tpu.memory_space<vmem>>, %arg12: memref<9x288xf32, #tpu.memory_space<vmem>>, %arg13: memref<1x288xf32, #tpu.memory_space<vmem>>) attributes {dimension_semantics = [#tpu.dimension_semantics<parallel>], iteration_bounds = array<i64: 2>, scalar_prefetch = 0 : i64, scratch_operands = 3 : i64, tpu.core_type = #tpu.core_type<tc>, window_params = [{transform_indices = @transform_0, window_bounds = array<i64: 1, 8, 8, 16>}, {pipeline_mode = #tpu.pipeline_mode<synchronous>, transform_indices = @transform_1, window_bounds = array<i64: 36, 32>}, {pipeline_mode = #tpu.pipeline_mode<synchronous>, transform_indices = @transform_2, window_bounds = array<i64: 1, 32>}, {pipeline_mode = #tpu.pipeline_mode<synchronous>, transform_indices = @transform_3, window_bounds = array<i64: 288, 32>}, {pipeline_mode = #tpu.pipeline_mode<synchronous>, transform_indices = @transform_4, window_bounds = array<i64: 1, 32>}, {pipeline_mode = #tpu.pipeline_mode<synchronous>, transform_indices = @transform_5, window_bounds = array<i64: 288, 32>}, {pipeline_mode = #tpu.pipeline_mode<synchronous>, transform_indices = @transform_6, window_bounds = array<i64: 1, 32>}, {pipeline_mode = #tpu.pipeline_mode<synchronous>, transform_indices = @transform_7, window_bounds = array<i64: 1, 32>}, {pipeline_mode = #tpu.pipeline_mode<synchronous>, transform_indices = @transform_8, window_bounds = array<i64: 1, 32>}, {transform_indices = @transform_9, window_bounds = array<i64: 1, 1, 32>}]} {
    %c0 = arith.constant 0 : index
    %c0_0 = arith.constant 0 : index
    %c0_1 = arith.constant 0 : index
    %c0_2 = arith.constant 0 : index
    %0 = vector.load %arg1[%c0, %c0_0, %c0_1, %c0_2] : memref<1x8x8x16xf32, #tpu.memory_space<vmem>>, vector<1x1x7x4xf32>
    %1 = vector.shape_cast %0 : vector<1x1x7x4xf32> to vector<7x4xf32>
    %c0_3 = arith.constant 0 : index
    %c0_4 = arith.constant 0 : index
    %2 = vector.load %arg11[%c0_3, %c0_4] : memref<49x36xf32, #tpu.memory_space<vmem>>, vector<7x4xf32>
    tpu.vector_store %arg11[%c0_3, %c0_4], %1 {strides = array<i32>} : memref<49x36xf32, #tpu.memory_space<vmem>>, vector<7x4xf32>,
    %c0_5 = arith.constant 0 : index
    %c0_6 = arith.constant 0 : index
    %c0_7 = arith.constant 0 : index
    %c4 = arith.constant 4 : index
    %3 = vector.load %arg1[%c0_5, %c0_6, %c0_7, %c4] : memref<1x8x8x16xf32, #tpu.memory_space<vmem>>, vector<1x1x7x4xf32>
    %4 = vector.shape_cast %3 : vector<1x1x7x4xf32> to vector<7x4xf32>
    %c0_8 = arith.constant 0 : index
    %c4_9 = arith.constant 4 : index
    %5 = vector.load %arg11[%c0_8, %c4_9] : memref<49x36xf32, #tpu.memory_space<vmem>>, vector<7x4xf32>
    tpu.vector_store %arg11[%c0_8, %c4_9], %4 {strides = array<i32>} : memref<49x36xf32, #tpu.memory_space<vmem>>, vector<7x4xf32>,
    %c0_10 = arith.constant 0 : index
    %c0_11 = arith.constant 0 : index
    %c1 = arith.constant 1 : index
    %c0_12 = arith.constant 0 : index
    %6 = vector.load %arg1[%c0_10, %c0_11, %c1, %c0_12] : memref<1x8x8x16xf32, #tpu.memory_space<vmem>>, vector<1x1x7x4xf32>
    %7 = vector.shape_cast %6 : vector<1x1x7x4xf32> to vector<7x4xf32>
    %c0_13 = arith.constant 0 : index
    %c8 = arith.constant 8 : index
    %8 = vector.load %arg11[%c0_13, %c8] : memref<49x36xf32, #tpu.memory_space<vmem>>, vector<7x4xf32>
    tpu.vector_store %arg11[%c0_13, %c8], %7 {strides = array<i32>} : memref<49x36xf32, #tpu.memory_space<vmem>>, vector<7x4xf32>,
    %c0_14 = arith.constant 0 : index
    %c0_15 = arith.constant 0 : index
    %c0_16 = arith.constant 0 : index
    %c8_17 = arith.constant 8 : index
    %9 = vector.load %arg1[%c0_14, %c0_15, %c0_16, %c8_17] : memref<1x8x8x16xf32, #tpu.memory_space<vmem>>, vector<1x1x7x4xf32>
    %10 = vector.shape_cast %9 : vector<1x1x7x4xf32> to vector<7x4xf32>
    %c0_18 = arith.constant 0 : index
    %c12 = arith.constant 12 : index
    %11 = vector.load %arg11[%c0_18, %c12] : memref<49x36xf32, #tpu.memory_space<vmem>>, vector<7x4xf32>
    tpu.vector_store %arg11[%c0_18, %c12], %10 {strides = array<i32>} : memref<49x36xf32, #tpu.memory_space<vmem>>, vector<7x4xf32>,
    %c0_19 = arith.constant 0 : index
    %c0_20 = arith.constant 0 : index
    %c0_21 = arith.constant 0 : index
    %c12_22 = arith.constant 12 : index
    %12 = vector.load %arg1[%c0_19, %c0_20, %c0_21, %c12_22] : memref<1x8x8x16xf32, #tpu.memory_space<vmem>>, vector<1x1x7x4xf32>
    %13 = vector.shape_cast %12 : vector<1x1x7x4xf32> to vector<7x4xf32>
    %c0_23 = arith.constant 0 : index
    %c16 = arith.constant 16 : index
    %14 = vector.load %arg11[%c0_23, %c16] : memref<49x36xf32, #tpu.memory_space<vmem>>, vector<7x4xf32>
    tpu.vector_store %arg11[%c0_23, %c16], %13 {strides = array<i32>} : memref<49x36xf32, #tpu.memory_space<vmem>>, vector<7x4xf32>,
    %c0_24 = arith.constant 0 : index
    %c0_25 = arith.constant 0 : index
    %c1_26 = arith.constant 1 : index
    %c8_27 = arith.constant 8 : index
    %15 = vector.load %arg1[%c0_24, %c0_25, %c1_26, %c8_27] : memref<1x8x8x16xf32, #tpu.memory_space<vmem>>, vector<1x1x7x4xf32>
    %16 = vector.shape_cast %15 : vector<1x1x7x4xf32> to vector<7x4xf32>
    %c0_28 = arith.constant 0 : index
    %c20 = arith.constant 20 : index
    %17 = vector.load %arg11[%c0_28, %c20] : memref<49x36xf32, #tpu.memory_space<vmem>>, vector<7x4xf32>
    tpu.vector_store %arg11[%c0_28, %c20], %16 {strides = array<i32>} : memref<49x36xf32, #tpu.memory_space<vmem>>, vector<7x4xf32>,
    %c0_29 = arith.constant 0 : index
    %c1_30 = arith.constant 1 : index
    %c0_31 = arith.constant 0 : index
    %c0_32 = arith.constant 0 : index
    %18 = vector.load %arg1[%c0_29, %c1_30, %c0_31, %c0_32] : memref<1x8x8x16xf32, #tpu.memory_space<vmem>>, vector<1x1x7x4xf32>
    %19 = vector.shape_cast %18 : vector<1x1x7x4xf32> to vector<7x4xf32>
    %c0_33 = arith.constant 0 : index
    %c24 = arith.constant 24 : index
    %20 = vector.load %arg11[%c0_33, %c24] : memref<49x36xf32, #tpu.memory_space<vmem>>, vector<7x4xf32>
    tpu.vector_store %arg11[%c0_33, %c24], %19 {strides = array<i32>} : memref<49x36xf32, #tpu.memory_space<vmem>>, vector<7x4xf32>,
    %c0_34 = arith.constant 0 : index
    %c1_35 = arith.constant 1 : index
    %c0_36 = arith.constant 0 : index
    %c4_37 = arith.constant 4 : index
    %21 = vector.load %arg1[%c0_34, %c1_35, %c0_36, %c4_37] : memref<1x8x8x16xf32, #tpu.memory_space<vmem>>, vector<1x1x7x4xf32>
    %22 = vector.shape_cast %21 : vector<1x1x7x4xf32> to vector<7x4xf32>
    %c0_38 = arith.constant 0 : index
    %c28 = arith.constant 28 : index
    %23 = vector.load %arg11[%c0_38, %c28] : memref<49x36xf32, #tpu.memory_space<vmem>>, vector<7x4xf32>
    tpu.vector_store %arg11[%c0_38, %c28], %22 {strides = array<i32>} : memref<49x36xf32, #tpu.memory_space<vmem>>, vector<7x4xf32>,
    %c0_39 = arith.constant 0 : index
    %c1_40 = arith.constant 1 : index
    %c1_41 = arith.constant 1 : index
    %c0_42 = arith.constant 0 : index
    %24 = vector.load %arg1[%c0_39, %c1_40, %c1_41, %c0_42] : memref<1x8x8x16xf32, #tpu.memory_space<vmem>>, vector<1x1x7x4xf32>
    %25 = vector.shape_cast %24 : vector<1x1x7x4xf32> to vector<7x4xf32>
    %c0_43 = arith.constant 0 : index
    %c32 = arith.constant 32 : index
    %26 = vector.load %arg11[%c0_43, %c32] : memref<49x36xf32, #tpu.memory_space<vmem>>, vector<7x4xf32>
    tpu.vector_store %arg11[%c0_43, %c32], %25 {strides = array<i32>} : memref<49x36xf32, #tpu.memory_space<vmem>>, vector<7x4xf32>,
    %c0_44 = arith.constant 0 : index
    %c1_45 = arith.constant 1 : index
    %c0_46 = arith.constant 0 : index
    %c0_47 = arith.constant 0 : index
    %27 = vector.load %arg1[%c0_44, %c1_45, %c0_46, %c0_47] : memref<1x8x8x16xf32, #tpu.memory_space<vmem>>, vector<1x1x7x4xf32>
    %28 = vector.shape_cast %27 : vector<1x1x7x4xf32> to vector<7x4xf32>
    %c7 = arith.constant 7 : index
    %c0_48 = arith.constant 0 : index
    %29 = vector.load %arg11[%c7, %c0_48] : memref<49x36xf32, #tpu.memory_space<vmem>>, vector<7x4xf32>
    tpu.vector_store %arg11[%c7, %c0_48], %28 {strides = array<i32>} : memref<49x36xf32, #tpu.memory_space<vmem>>, vector<7x4xf32>,
    %c0_49 = arith.constant 0 : index
    %c1_50 = arith.constant 1 : index
    %c0_51 = arith.constant 0 : index
    %c4_52 = arith.constant 4 : index
    %30 = vector.load %arg1[%c0_49, %c1_50, %c0_51, %c4_52] : memref<1x8x8x16xf32, #tpu.memory_space<vmem>>, vector<1x1x7x4xf32>
    %31 = vector.shape_cast %30 : vector<1x1x7x4xf32> to vector<7x4xf32>
    %c7_53 = arith.constant 7 : index
    %c4_54 = arith.constant 4 : index
    %32 = vector.load %arg11[%c7_53, %c4_54] : memref<49x36xf32, #tpu.memory_space<vmem>>, vector<7x4xf32>
    tpu.vector_store %arg11[%c7_53, %c4_54], %31 {strides = array<i32>} : memref<49x36xf32, #tpu.memory_space<vmem>>, vector<7x4xf32>,
    %c0_55 = arith.constant 0 : index
    %c1_56 = arith.constant 1 : index
    %c1_57 = arith.constant 1 : index
    %c0_58 = arith.constant 0 : index
    %33 = vector.load %arg1[%c0_55, %c1_56, %c1_57, %c0_58] : memref<1x8x8x16xf32, #tpu.memory_space<vmem>>, vector<1x1x7x4xf32>
    %34 = vector.shape_cast %33 : vector<1x1x7x4xf32> to vector<7x4xf32>
    %c7_59 = arith.constant 7 : index
    %c8_60 = arith.constant 8 : index
    %35 = vector.load %arg11[%c7_59, %c8_60] : memref<49x36xf32, #tpu.memory_space<vmem>>, vector<7x4xf32>
    tpu.vector_store %arg11[%c7_59, %c8_60], %34 {strides = array<i32>} : memref<49x36xf32, #tpu.memory_space<vmem>>, vector<7x4xf32>,
    %c0_61 = arith.constant 0 : index
    %c1_62 = arith.constant 1 : index
    %c0_63 = arith.constant 0 : index
    %c8_64 = arith.constant 8 : index
    %36 = vector.load %arg1[%c0_61, %c1_62, %c0_63, %c8_64] : memref<1x8x8x16xf32, #tpu.memory_space<vmem>>, vector<1x1x7x4xf32>
    %37 = vector.shape_cast %36 : vector<1x1x7x4xf32> to vector<7x4xf32>
    %c7_65 = arith.constant 7 : index
    %c12_66 = arith.constant 12 : index
    %38 = vector.load %arg11[%c7_65, %c12_66] : memref<49x36xf32, #tpu.memory_space<vmem>>, vector<7x4xf32>
    tpu.vector_store %arg11[%c7_65, %c12_66], %37 {strides = array<i32>} : memref<49x36xf32, #tpu.memory_space<vmem>>, vector<7x4xf32>,
    %c0_67 = arith.constant 0 : index
    %c1_68 = arith.constant 1 : index
    %c0_69 = arith.constant 0 : index
    %c12_70 = arith.constant 12 : index
    %39 = vector.load %arg1[%c0_67, %c1_68, %c0_69, %c12_70] : memref<1x8x8x16xf32, #tpu.memory_space<vmem>>, vector<1x1x7x4xf32>
    %40 = vector.shape_cast %39 : vector<1x1x7x4xf32> to vector<7x4xf32>
    %c7_71 = arith.constant 7 : index
    %c16_72 = arith.constant 16 : index
    %41 = vector.load %arg11[%c7_71, %c16_72] : memref<49x36xf32, #tpu.memory_space<vmem>>, vector<7x4xf32>
    tpu.vector_store %arg11[%c7_71, %c16_72], %40 {strides = array<i32>} : memref<49x36xf32, #tpu.memory_space<vmem>>, vector<7x4xf32>,
    %c0_73 = arith.constant 0 : index
    %c1_74 = arith.constant 1 : index
    %c1_75 = arith.constant 1 : index
    %c8_76 = arith.constant 8 : index
    %42 = vector.load %arg1[%c0_73, %c1_74, %c1_75, %c8_76] : memref<1x8x8x16xf32, #tpu.memory_space<vmem>>, vector<1x1x7x4xf32>
    %43 = vector.shape_cast %42 : vector<1x1x7x4xf32> to vector<7x4xf32>
    %c7_77 = arith.constant 7 : index
    %c20_78 = arith.constant 20 : index
    %44 = vector.load %arg11[%c7_77, %c20_78] : memref<49x36xf32, #tpu.memory_space<vmem>>, vector<7x4xf32>
    tpu.vector_store %arg11[%c7_77, %c20_78], %43 {strides = array<i32>} : memref<49x36xf32, #tpu.memory_space<vmem>>, vector<7x4xf32>,
    %c0_79 = arith.constant 0 : index
    %c2 = arith.constant 2 : index
    %c0_80 = arith.constant 0 : index
    %c0_81 = arith.constant 0 : index
    %45 = vector.load %arg1[%c0_79, %c2, %c0_80, %c0_81] : memref<1x8x8x16xf32, #tpu.memory_space<vmem>>, vector<1x1x7x4xf32>
    %46 = vector.shape_cast %45 : vector<1x1x7x4xf32> to vector<7x4xf32>
    %c7_82 = arith.constant 7 : index
    %c24_83 = arith.constant 24 : index
    %47 = vector.load %arg11[%c7_82, %c24_83] : memref<49x36xf32, #tpu.memory_space<vmem>>, vector<7x4xf32>
    tpu.vector_store %arg11[%c7_82, %c24_83], %46 {strides = array<i32>} : memref<49x36xf32, #tpu.memory_space<vmem>>, vector<7x4xf32>,
    %c0_84 = arith.constant 0 : index
    %c2_85 = arith.constant 2 : index
    %c0_86 = arith.constant 0 : index
    %c4_87 = arith.constant 4 : index
    %48 = vector.load %arg1[%c0_84, %c2_85, %c0_86, %c4_87] : memref<1x8x8x16xf32, #tpu.memory_space<vmem>>, vector<1x1x7x4xf32>
    %49 = vector.shape_cast %48 : vector<1x1x7x4xf32> to vector<7x4xf32>
    %c7_88 = arith.constant 7 : index
    %c28_89 = arith.constant 28 : index
    %50 = vector.load %arg11[%c7_88, %c28_89] : memref<49x36xf32, #tpu.memory_space<vmem>>, vector<7x4xf32>
    tpu.vector_store %arg11[%c7_88, %c28_89], %49 {strides = array<i32>} : memref<49x36xf32, #tpu.memory_space<vmem>>, vector<7x4xf32>,
    %c0_90 = arith.constant 0 : index
    %c2_91 = arith.constant 2 : index
    %c1_92 = arith.constant 1 : index
    %c0_93 = arith.constant 0 : index
    %51 = vector.load %arg1[%c0_90, %c2_91, %c1_92, %c0_93] : memref<1x8x8x16xf32, #tpu.memory_space<vmem>>, vector<1x1x7x4xf32>
    %52 = vector.shape_cast %51 : vector<1x1x7x4xf32> to vector<7x4xf32>
    %c7_94 = arith.constant 7 : index
    %c32_95 = arith.constant 32 : index
    %53 = vector.load %arg11[%c7_94, %c32_95] : memref<49x36xf32, #tpu.memory_space<vmem>>, vector<7x4xf32>
    tpu.vector_store %arg11[%c7_94, %c32_95], %52 {strides = array<i32>} : memref<49x36xf32, #tpu.memory_space<vmem>>, vector<7x4xf32>,
    %c0_96 = arith.constant 0 : index
    %c2_97 = arith.constant 2 : index
    %c0_98 = arith.constant 0 : index
    %c0_99 = arith.constant 0 : index
    %54 = vector.load %arg1[%c0_96, %c2_97, %c0_98, %c0_99] : memref<1x8x8x16xf32, #tpu.memory_space<vmem>>, vector<1x1x7x4xf32>
    %55 = vector.shape_cast %54 : vector<1x1x7x4xf32> to vector<7x4xf32>
    %c14 = arith.constant 14 : index
    %c0_100 = arith.constant 0 : index
    %56 = vector.load %arg11[%c14, %c0_100] : memref<49x36xf32, #tpu.memory_space<vmem>>, vector<7x4xf32>
    tpu.vector_store %arg11[%c14, %c0_100], %55 {strides = array<i32>} : memref<49x36xf32, #tpu.memory_space<vmem>>, vector<7x4xf32>,
    %c0_101 = arith.constant 0 : index
    %c2_102 = arith.constant 2 : index
    %c0_103 = arith.constant 0 : index
    %c4_104 = arith.constant 4 : index
    %57 = vector.load %arg1[%c0_101, %c2_102, %c0_103, %c4_104] : memref<1x8x8x16xf32, #tpu.memory_space<vmem>>, vector<1x1x7x4xf32>
    %58 = vector.shape_cast %57 : vector<1x1x7x4xf32> to vector<7x4xf32>
    %c14_105 = arith.constant 14 : index
    %c4_106 = arith.constant 4 : index
    %59 = vector.load %arg11[%c14_105, %c4_106] : memref<49x36xf32, #tpu.memory_space<vmem>>, vector<7x4xf32>
    tpu.vector_store %arg11[%c14_105, %c4_106], %58 {strides = array<i32>} : memref<49x36xf32, #tpu.memory_space<vmem>>, vector<7x4xf32>,
    %c0_107 = arith.constant 0 : index
    %c2_108 = arith.constant 2 : index
    %c1_109 = arith.constant 1 : index
    %c0_110 = arith.constant 0 : index
    %60 = vector.load %arg1[%c0_107, %c2_108, %c1_109, %c0_110] : memref<1x8x8x16xf32, #tpu.memory_space<vmem>>, vector<1x1x7x4xf32>
    %61 = vector.shape_cast %60 : vector<1x1x7x4xf32> to vector<7x4xf32>
    %c14_111 = arith.constant 14 : index
    %c8_112 = arith.constant 8 : index
    %62 = vector.load %arg11[%c14_111, %c8_112] : memref<49x36xf32, #tpu.memory_space<vmem>>, vector<7x4xf32>
    tpu.vector_store %arg11[%c14_111, %c8_112], %61 {strides = array<i32>} : memref<49x36xf32, #tpu.memory_space<vmem>>, vector<7x4xf32>,
    %c0_113 = arith.constant 0 : index
    %c2_114 = arith.constant 2 : index
    %c0_115 = arith.constant 0 : index
    %c8_116 = arith.constant 8 : index
    %63 = vector.load %arg1[%c0_113, %c2_114, %c0_115, %c8_116] : memref<1x8x8x16xf32, #tpu.memory_space<vmem>>, vector<1x1x7x4xf32>
    %64 = vector.shape_cast %63 : vector<1x1x7x4xf32> to vector<7x4xf32>
    %c14_117 = arith.constant 14 : index
    %c12_118 = arith.constant 12 : index
    %65 = vector.load %arg11[%c14_117, %c12_118] : memref<49x36xf32, #tpu.memory_space<vmem>>, vector<7x4xf32>
    tpu.vector_store %arg11[%c14_117, %c12_118], %64 {strides = array<i32>} : memref<49x36xf32, #tpu.memory_space<vmem>>, vector<7x4xf32>,
    %c0_119 = arith.constant 0 : index
    %c2_120 = arith.constant 2 : index
    %c0_121 = arith.constant 0 : index
    %c12_122 = arith.constant 12 : index
    %66 = vector.load %arg1[%c0_119, %c2_120, %c0_121, %c12_122] : memref<1x8x8x16xf32, #tpu.memory_space<vmem>>, vector<1x1x7x4xf32>
    %67 = vector.shape_cast %66 : vector<1x1x7x4xf32> to vector<7x4xf32>
    %c14_123 = arith.constant 14 : index
    %c16_124 = arith.constant 16 : index
    %68 = vector.load %arg11[%c14_123, %c16_124] : memref<49x36xf32, #tpu.memory_space<vmem>>, vector<7x4xf32>
    tpu.vector_store %arg11[%c14_123, %c16_124], %67 {strides = array<i32>} : memref<49x36xf32, #tpu.memory_space<vmem>>, vector<7x4xf32>,
    %c0_125 = arith.constant 0 : index
    %c2_126 = arith.constant 2 : index
    %c1_127 = arith.constant 1 : index
    %c8_128 = arith.constant 8 : index
    %69 = vector.load %arg1[%c0_125, %c2_126, %c1_127, %c8_128] : memref<1x8x8x16xf32, #tpu.memory_space<vmem>>, vector<1x1x7x4xf32>
    %70 = vector.shape_cast %69 : vector<1x1x7x4xf32> to vector<7x4xf32>
    %c14_129 = arith.constant 14 : index
    %c20_130 = arith.constant 20 : index
    %71 = vector.load %arg11[%c14_129, %c20_130] : memref<49x36xf32, #tpu.memory_space<vmem>>, vector<7x4xf32>
    tpu.vector_store %arg11[%c14_129, %c20_130], %70 {strides = array<i32>} : memref<49x36xf32, #tpu.memory_space<vmem>>, vector<7x4xf32>,
    %c0_131 = arith.constant 0 : index
    %c3 = arith.constant 3 : index
    %c0_132 = arith.constant 0 : index
    %c0_133 = arith.constant 0 : index
    %72 = vector.load %arg1[%c0_131, %c3, %c0_132, %c0_133] : memref<1x8x8x16xf32, #tpu.memory_space<vmem>>, vector<1x1x7x4xf32>
    %73 = vector.shape_cast %72 : vector<1x1x7x4xf32> to vector<7x4xf32>
    %c14_134 = arith.constant 14 : index
    %c24_135 = arith.constant 24 : index
    %74 = vector.load %arg11[%c14_134, %c24_135] : memref<49x36xf32, #tpu.memory_space<vmem>>, vector<7x4xf32>
    tpu.vector_store %arg11[%c14_134, %c24_135], %73 {strides = array<i32>} : memref<49x36xf32, #tpu.memory_space<vmem>>, vector<7x4xf32>,
    %c0_136 = arith.constant 0 : index
    %c3_137 = arith.constant 3 : index
    %c0_138 = arith.constant 0 : index
    %c4_139 = arith.constant 4 : index
    %75 = vector.load %arg1[%c0_136, %c3_137, %c0_138, %c4_139] : memref<1x8x8x16xf32, #tpu.memory_space<vmem>>, vector<1x1x7x4xf32>
    %76 = vector.shape_cast %75 : vector<1x1x7x4xf32> to vector<7x4xf32>
    %c14_140 = arith.constant 14 : index
    %c28_141 = arith.constant 28 : index
    %77 = vector.load %arg11[%c14_140, %c28_141] : memref<49x36xf32, #tpu.memory_space<vmem>>, vector<7x4xf32>
    tpu.vector_store %arg11[%c14_140, %c28_141], %76 {strides = array<i32>} : memref<49x36xf32, #tpu.memory_space<vmem>>, vector<7x4xf32>,
    %c0_142 = arith.constant 0 : index
    %c3_143 = arith.constant 3 : index
    %c1_144 = arith.constant 1 : index
    %c0_145 = arith.constant 0 : index
    %78 = vector.load %arg1[%c0_142, %c3_143, %c1_144, %c0_145] : memref<1x8x8x16xf32, #tpu.memory_space<vmem>>, vector<1x1x7x4xf32>
    %79 = vector.shape_cast %78 : vector<1x1x7x4xf32> to vector<7x4xf32>
    %c14_146 = arith.constant 14 : index
    %c32_147 = arith.constant 32 : index
    %80 = vector.load %arg11[%c14_146, %c32_147] : memref<49x36xf32, #tpu.memory_space<vmem>>, vector<7x4xf32>
    tpu.vector_store %arg11[%c14_146, %c32_147], %79 {strides = array<i32>} : memref<49x36xf32, #tpu.memory_space<vmem>>, vector<7x4xf32>,
    %c0_148 = arith.constant 0 : index
    %c3_149 = arith.constant 3 : index
    %c0_150 = arith.constant 0 : index
    %c0_151 = arith.constant 0 : index
    %81 = vector.load %arg1[%c0_148, %c3_149, %c0_150, %c0_151] : memref<1x8x8x16xf32, #tpu.memory_space<vmem>>, vector<1x1x7x4xf32>
    %82 = vector.shape_cast %81 : vector<1x1x7x4xf32> to vector<7x4xf32>
    %c21 = arith.constant 21 : index
    %c0_152 = arith.constant 0 : index
    %83 = vector.load %arg11[%c21, %c0_152] : memref<49x36xf32, #tpu.memory_space<vmem>>, vector<7x4xf32>
    tpu.vector_store %arg11[%c21, %c0_152], %82 {strides = array<i32>} : memref<49x36xf32, #tpu.memory_space<vmem>>, vector<7x4xf32>,
    %c0_153 = arith.constant 0 : index
    %c3_154 = arith.constant 3 : index
    %c0_155 = arith.constant 0 : index
    %c4_156 = arith.constant 4 : index
    %84 = vector.load %arg1[%c0_153, %c3_154, %c0_155, %c4_156] : memref<1x8x8x16xf32, #tpu.memory_space<vmem>>, vector<1x1x7x4xf32>
    %85 = vector.shape_cast %84 : vector<1x1x7x4xf32> to vector<7x4xf32>
    %c21_157 = arith.constant 21 : index
    %c4_158 = arith.constant 4 : index
    %86 = vector.load %arg11[%c21_157, %c4_158] : memref<49x36xf32, #tpu.memory_space<vmem>>, vector<7x4xf32>
    tpu.vector_store %arg11[%c21_157, %c4_158], %85 {strides = array<i32>} : memref<49x36xf32, #tpu.memory_space<vmem>>, vector<7x4xf32>,
    %c0_159 = arith.constant 0 : index
    %c3_160 = arith.constant 3 : index
    %c1_161 = arith.constant 1 : index
    %c0_162 = arith.constant 0 : index
    %87 = vector.load %arg1[%c0_159, %c3_160, %c1_161, %c0_162] : memref<1x8x8x16xf32, #tpu.memory_space<vmem>>, vector<1x1x7x4xf32>
    %88 = vector.shape_cast %87 : vector<1x1x7x4xf32> to vector<7x4xf32>
    %c21_163 = arith.constant 21 : index
    %c8_164 = arith.constant 8 : index
    %89 = vector.load %arg11[%c21_163, %c8_164] : memref<49x36xf32, #tpu.memory_space<vmem>>, vector<7x4xf32>
    tpu.vector_store %arg11[%c21_163, %c8_164], %88 {strides = array<i32>} : memref<49x36xf32, #tpu.memory_space<vmem>>, vector<7x4xf32>,
    %c0_165 = arith.constant 0 : index
    %c3_166 = arith.constant 3 : index
    %c0_167 = arith.constant 0 : index
    %c8_168 = arith.constant 8 : index
    %90 = vector.load %arg1[%c0_165, %c3_166, %c0_167, %c8_168] : memref<1x8x8x16xf32, #tpu.memory_space<vmem>>, vector<1x1x7x4xf32>
    %91 = vector.shape_cast %90 : vector<1x1x7x4xf32> to vector<7x4xf32>
    %c21_169 = arith.constant 21 : index
    %c12_170 = arith.constant 12 : index
    %92 = vector.load %arg11[%c21_169, %c12_170] : memref<49x36xf32, #tpu.memory_space<vmem>>, vector<7x4xf32>
    tpu.vector_store %arg11[%c21_169, %c12_170], %91 {strides = array<i32>} : memref<49x36xf32, #tpu.memory_space<vmem>>, vector<7x4xf32>,
    %c0_171 = arith.constant 0 : index
    %c3_172 = arith.constant 3 : index
    %c0_173 = arith.constant 0 : index
    %c12_174 = arith.constant 12 : index
    %93 = vector.load %arg1[%c0_171, %c3_172, %c0_173, %c12_174] : memref<1x8x8x16xf32, #tpu.memory_space<vmem>>, vector<1x1x7x4xf32>
    %94 = vector.shape_cast %93 : vector<1x1x7x4xf32> to vector<7x4xf32>
    %c21_175 = arith.constant 21 : index
    %c16_176 = arith.constant 16 : index
    %95 = vector.load %arg11[%c21_175, %c16_176] : memref<49x36xf32, #tpu.memory_space<vmem>>, vector<7x4xf32>
    tpu.vector_store %arg11[%c21_175, %c16_176], %94 {strides = array<i32>} : memref<49x36xf32, #tpu.memory_space<vmem>>, vector<7x4xf32>,
    %c0_177 = arith.constant 0 : index
    %c3_178 = arith.constant 3 : index
    %c1_179 = arith.constant 1 : index
    %c8_180 = arith.constant 8 : index
    %96 = vector.load %arg1[%c0_177, %c3_178, %c1_179, %c8_180] : memref<1x8x8x16xf32, #tpu.memory_space<vmem>>, vector<1x1x7x4xf32>
    %97 = vector.shape_cast %96 : vector<1x1x7x4xf32> to vector<7x4xf32>
    %c21_181 = arith.constant 21 : index
    %c20_182 = arith.constant 20 : index
    %98 = vector.load %arg11[%c21_181, %c20_182] : memref<49x36xf32, #tpu.memory_space<vmem>>, vector<7x4xf32>
    tpu.vector_store %arg11[%c21_181, %c20_182], %97 {strides = array<i32>} : memref<49x36xf32, #tpu.memory_space<vmem>>, vector<7x4xf32>,
    %c0_183 = arith.constant 0 : index
    %c4_184 = arith.constant 4 : index
    %c0_185 = arith.constant 0 : index
    %c0_186 = arith.constant 0 : index
    %99 = vector.load %arg1[%c0_183, %c4_184, %c0_185, %c0_186] : memref<1x8x8x16xf32, #tpu.memory_space<vmem>>, vector<1x1x7x4xf32>
    %100 = vector.shape_cast %99 : vector<1x1x7x4xf32> to vector<7x4xf32>
    %c21_187 = arith.constant 21 : index
    %c24_188 = arith.constant 24 : index
    %101 = vector.load %arg11[%c21_187, %c24_188] : memref<49x36xf32, #tpu.memory_space<vmem>>, vector<7x4xf32>
    tpu.vector_store %arg11[%c21_187, %c24_188], %100 {strides = array<i32>} : memref<49x36xf32, #tpu.memory_space<vmem>>, vector<7x4xf32>,
    %c0_189 = arith.constant 0 : index
    %c4_190 = arith.constant 4 : index
    %c0_191 = arith.constant 0 : index
    %c4_192 = arith.constant 4 : index
    %102 = vector.load %arg1[%c0_189, %c4_190, %c0_191, %c4_192] : memref<1x8x8x16xf32, #tpu.memory_space<vmem>>, vector<1x1x7x4xf32>
    %103 = vector.shape_cast %102 : vector<1x1x7x4xf32> to vector<7x4xf32>
    %c21_193 = arith.constant 21 : index
    %c28_194 = arith.constant 28 : index
    %104 = vector.load %arg11[%c21_193, %c28_194] : memref<49x36xf32, #tpu.memory_space<vmem>>, vector<7x4xf32>
    tpu.vector_store %arg11[%c21_193, %c28_194], %103 {strides = array<i32>} : memref<49x36xf32, #tpu.memory_space<vmem>>, vector<7x4xf32>,
    %c0_195 = arith.constant 0 : index
    %c4_196 = arith.constant 4 : index
    %c1_197 = arith.constant 1 : index
    %c0_198 = arith.constant 0 : index
    %105 = vector.load %arg1[%c0_195, %c4_196, %c1_197, %c0_198] : memref<1x8x8x16xf32, #tpu.memory_space<vmem>>, vector<1x1x7x4xf32>
    %106 = vector.shape_cast %105 : vector<1x1x7x4xf32> to vector<7x4xf32>
    %c21_199 = arith.constant 21 : index
    %c32_200 = arith.constant 32 : index
    %107 = vector.load %arg11[%c21_199, %c32_200] : memref<49x36xf32, #tpu.memory_space<vmem>>, vector<7x4xf32>
    tpu.vector_store %arg11[%c21_199, %c32_200], %106 {strides = array<i32>} : memref<49x36xf32, #tpu.memory_space<vmem>>, vector<7x4xf32>,
    %c0_201 = arith.constant 0 : index
    %c4_202 = arith.constant 4 : index
    %c0_203 = arith.constant 0 : index
    %c0_204 = arith.constant 0 : index
    %108 = vector.load %arg1[%c0_201, %c4_202, %c0_203, %c0_204] : memref<1x8x8x16xf32, #tpu.memory_space<vmem>>, vector<1x1x7x4xf32>
    %109 = vector.shape_cast %108 : vector<1x1x7x4xf32> to vector<7x4xf32>
    %c28_205 = arith.constant 28 : index
    %c0_206 = arith.constant 0 : index
    %110 = vector.load %arg11[%c28_205, %c0_206] : memref<49x36xf32, #tpu.memory_space<vmem>>, vector<7x4xf32>
    tpu.vector_store %arg11[%c28_205, %c0_206], %109 {strides = array<i32>} : memref<49x36xf32, #tpu.memory_space<vmem>>, vector<7x4xf32>,
    %c0_207 = arith.constant 0 : index
    %c4_208 = arith.constant 4 : index
    %c0_209 = arith.constant 0 : index
    %c4_210 = arith.constant 4 : index
    %111 = vector.load %arg1[%c0_207, %c4_208, %c0_209, %c4_210] : memref<1x8x8x16xf32, #tpu.memory_space<vmem>>, vector<1x1x7x4xf32>
    %112 = vector.shape_cast %111 : vector<1x1x7x4xf32> to vector<7x4xf32>
    %c28_211 = arith.constant 28 : index
    %c4_212 = arith.constant 4 : index
    %113 = vector.load %arg11[%c28_211, %c4_212] : memref<49x36xf32, #tpu.memory_space<vmem>>, vector<7x4xf32>
    tpu.vector_store %arg11[%c28_211, %c4_212], %112 {strides = array<i32>} : memref<49x36xf32, #tpu.memory_space<vmem>>, vector<7x4xf32>,
    %c0_213 = arith.constant 0 : index
    %c4_214 = arith.constant 4 : index
    %c1_215 = arith.constant 1 : index
    %c0_216 = arith.constant 0 : index
    %114 = vector.load %arg1[%c0_213, %c4_214, %c1_215, %c0_216] : memref<1x8x8x16xf32, #tpu.memory_space<vmem>>, vector<1x1x7x4xf32>
    %115 = vector.shape_cast %114 : vector<1x1x7x4xf32> to vector<7x4xf32>
    %c28_217 = arith.constant 28 : index
    %c8_218 = arith.constant 8 : index
    %116 = vector.load %arg11[%c28_217, %c8_218] : memref<49x36xf32, #tpu.memory_space<vmem>>, vector<7x4xf32>
    tpu.vector_store %arg11[%c28_217, %c8_218], %115 {strides = array<i32>} : memref<49x36xf32, #tpu.memory_space<vmem>>, vector<7x4xf32>,
    %c0_219 = arith.constant 0 : index
    %c4_220 = arith.constant 4 : index
    %c0_221 = arith.constant 0 : index
    %c8_222 = arith.constant 8 : index
    %117 = vector.load %arg1[%c0_219, %c4_220, %c0_221, %c8_222] : memref<1x8x8x16xf32, #tpu.memory_space<vmem>>, vector<1x1x7x4xf32>
    %118 = vector.shape_cast %117 : vector<1x1x7x4xf32> to vector<7x4xf32>
    %c28_223 = arith.constant 28 : index
    %c12_224 = arith.constant 12 : index
    %119 = vector.load %arg11[%c28_223, %c12_224] : memref<49x36xf32, #tpu.memory_space<vmem>>, vector<7x4xf32>
    tpu.vector_store %arg11[%c28_223, %c12_224], %118 {strides = array<i32>} : memref<49x36xf32, #tpu.memory_space<vmem>>, vector<7x4xf32>,
    %c0_225 = arith.constant 0 : index
    %c4_226 = arith.constant 4 : index
    %c0_227 = arith.constant 0 : index
    %c12_228 = arith.constant 12 : index
    %120 = vector.load %arg1[%c0_225, %c4_226, %c0_227, %c12_228] : memref<1x8x8x16xf32, #tpu.memory_space<vmem>>, vector<1x1x7x4xf32>
    %121 = vector.shape_cast %120 : vector<1x1x7x4xf32> to vector<7x4xf32>
    %c28_229 = arith.constant 28 : index
    %c16_230 = arith.constant 16 : index
    %122 = vector.load %arg11[%c28_229, %c16_230] : memref<49x36xf32, #tpu.memory_space<vmem>>, vector<7x4xf32>
    tpu.vector_store %arg11[%c28_229, %c16_230], %121 {strides = array<i32>} : memref<49x36xf32, #tpu.memory_space<vmem>>, vector<7x4xf32>,
    %c0_231 = arith.constant 0 : index
    %c4_232 = arith.constant 4 : index
    %c1_233 = arith.constant 1 : index
    %c8_234 = arith.constant 8 : index
    %123 = vector.load %arg1[%c0_231, %c4_232, %c1_233, %c8_234] : memref<1x8x8x16xf32, #tpu.memory_space<vmem>>, vector<1x1x7x4xf32>
    %124 = vector.shape_cast %123 : vector<1x1x7x4xf32> to vector<7x4xf32>
    %c28_235 = arith.constant 28 : index
    %c20_236 = arith.constant 20 : index
    %125 = vector.load %arg11[%c28_235, %c20_236] : memref<49x36xf32, #tpu.memory_space<vmem>>, vector<7x4xf32>
    tpu.vector_store %arg11[%c28_235, %c20_236], %124 {strides = array<i32>} : memref<49x36xf32, #tpu.memory_space<vmem>>, vector<7x4xf32>,
    %c0_237 = arith.constant 0 : index
    %c5 = arith.constant 5 : index
    %c0_238 = arith.constant 0 : index
    %c0_239 = arith.constant 0 : index
    %126 = vector.load %arg1[%c0_237, %c5, %c0_238, %c0_239] : memref<1x8x8x16xf32, #tpu.memory_space<vmem>>, vector<1x1x7x4xf32>
    %127 = vector.shape_cast %126 : vector<1x1x7x4xf32> to vector<7x4xf32>
    %c28_240 = arith.constant 28 : index
    %c24_241 = arith.constant 24 : index
    %128 = vector.load %arg11[%c28_240, %c24_241] : memref<49x36xf32, #tpu.memory_space<vmem>>, vector<7x4xf32>
    tpu.vector_store %arg11[%c28_240, %c24_241], %127 {strides = array<i32>} : memref<49x36xf32, #tpu.memory_space<vmem>>, vector<7x4xf32>,
    %c0_242 = arith.constant 0 : index
    %c5_243 = arith.constant 5 : index
    %c0_244 = arith.constant 0 : index
    %c4_245 = arith.constant 4 : index
    %129 = vector.load %arg1[%c0_242, %c5_243, %c0_244, %c4_245] : memref<1x8x8x16xf32, #tpu.memory_space<vmem>>, vector<1x1x7x4xf32>
    %130 = vector.shape_cast %129 : vector<1x1x7x4xf32> to vector<7x4xf32>
    %c28_246 = arith.constant 28 : index
    %c28_247 = arith.constant 28 : index
    %131 = vector.load %arg11[%c28_246, %c28_247] : memref<49x36xf32, #tpu.memory_space<vmem>>, vector<7x4xf32>
    tpu.vector_store %arg11[%c28_246, %c28_247], %130 {strides = array<i32>} : memref<49x36xf32, #tpu.memory_space<vmem>>, vector<7x4xf32>,
    %c0_248 = arith.constant 0 : index
    %c5_249 = arith.constant 5 : index
    %c1_250 = arith.constant 1 : index
    %c0_251 = arith.constant 0 : index
    %132 = vector.load %arg1[%c0_248, %c5_249, %c1_250, %c0_251] : memref<1x8x8x16xf32, #tpu.memory_space<vmem>>, vector<1x1x7x4xf32>
    %133 = vector.shape_cast %132 : vector<1x1x7x4xf32> to vector<7x4xf32>
    %c28_252 = arith.constant 28 : index
    %c32_253 = arith.constant 32 : index
    %134 = vector.load %arg11[%c28_252, %c32_253] : memref<49x36xf32, #tpu.memory_space<vmem>>, vector<7x4xf32>
    tpu.vector_store %arg11[%c28_252, %c32_253], %133 {strides = array<i32>} : memref<49x36xf32, #tpu.memory_space<vmem>>, vector<7x4xf32>,
    %c0_254 = arith.constant 0 : index
    %c5_255 = arith.constant 5 : index
    %c0_256 = arith.constant 0 : index
    %c0_257 = arith.constant 0 : index
    %135 = vector.load %arg1[%c0_254, %c5_255, %c0_256, %c0_257] : memref<1x8x8x16xf32, #tpu.memory_space<vmem>>, vector<1x1x7x4xf32>
    %136 = vector.shape_cast %135 : vector<1x1x7x4xf32> to vector<7x4xf32>
    %c35 = arith.constant 35 : index
    %c0_258 = arith.constant 0 : index
    %137 = vector.load %arg11[%c35, %c0_258] : memref<49x36xf32, #tpu.memory_space<vmem>>, vector<7x4xf32>
    tpu.vector_store %arg11[%c35, %c0_258], %136 {strides = array<i32>} : memref<49x36xf32, #tpu.memory_space<vmem>>, vector<7x4xf32>,
    %c0_259 = arith.constant 0 : index
    %c5_260 = arith.constant 5 : index
    %c0_261 = arith.constant 0 : index
    %c4_262 = arith.constant 4 : index
    %138 = vector.load %arg1[%c0_259, %c5_260, %c0_261, %c4_262] : memref<1x8x8x16xf32, #tpu.memory_space<vmem>>, vector<1x1x7x4xf32>
    %139 = vector.shape_cast %138 : vector<1x1x7x4xf32> to vector<7x4xf32>
    %c35_263 = arith.constant 35 : index
    %c4_264 = arith.constant 4 : index
    %140 = vector.load %arg11[%c35_263, %c4_264] : memref<49x36xf32, #tpu.memory_space<vmem>>, vector<7x4xf32>
    tpu.vector_store %arg11[%c35_263, %c4_264], %139 {strides = array<i32>} : memref<49x36xf32, #tpu.memory_space<vmem>>, vector<7x4xf32>,
    %c0_265 = arith.constant 0 : index
    %c5_266 = arith.constant 5 : index
    %c1_267 = arith.constant 1 : index
    %c0_268 = arith.constant 0 : index
    %141 = vector.load %arg1[%c0_265, %c5_266, %c1_267, %c0_268] : memref<1x8x8x16xf32, #tpu.memory_space<vmem>>, vector<1x1x7x4xf32>
    %142 = vector.shape_cast %141 : vector<1x1x7x4xf32> to vector<7x4xf32>
    %c35_269 = arith.constant 35 : index
    %c8_270 = arith.constant 8 : index
    %143 = vector.load %arg11[%c35_269, %c8_270] : memref<49x36xf32, #tpu.memory_space<vmem>>, vector<7x4xf32>
    tpu.vector_store %arg11[%c35_269, %c8_270], %142 {strides = array<i32>} : memref<49x36xf32, #tpu.memory_space<vmem>>, vector<7x4xf32>,
    %c0_271 = arith.constant 0 : index
    %c5_272 = arith.constant 5 : index
    %c0_273 = arith.constant 0 : index
    %c8_274 = arith.constant 8 : index
    %144 = vector.load %arg1[%c0_271, %c5_272, %c0_273, %c8_274] : memref<1x8x8x16xf32, #tpu.memory_space<vmem>>, vector<1x1x7x4xf32>
    %145 = vector.shape_cast %144 : vector<1x1x7x4xf32> to vector<7x4xf32>
    %c35_275 = arith.constant 35 : index
    %c12_276 = arith.constant 12 : index
    %146 = vector.load %arg11[%c35_275, %c12_276] : memref<49x36xf32, #tpu.memory_space<vmem>>, vector<7x4xf32>
    tpu.vector_store %arg11[%c35_275, %c12_276], %145 {strides = array<i32>} : memref<49x36xf32, #tpu.memory_space<vmem>>, vector<7x4xf32>,
    %c0_277 = arith.constant 0 : index
    %c5_278 = arith.constant 5 : index
    %c0_279 = arith.constant 0 : index
    %c12_280 = arith.constant 12 : index
    %147 = vector.load %arg1[%c0_277, %c5_278, %c0_279, %c12_280] : memref<1x8x8x16xf32, #tpu.memory_space<vmem>>, vector<1x1x7x4xf32>
    %148 = vector.shape_cast %147 : vector<1x1x7x4xf32> to vector<7x4xf32>
    %c35_281 = arith.constant 35 : index
    %c16_282 = arith.constant 16 : index
    %149 = vector.load %arg11[%c35_281, %c16_282] : memref<49x36xf32, #tpu.memory_space<vmem>>, vector<7x4xf32>
    tpu.vector_store %arg11[%c35_281, %c16_282], %148 {strides = array<i32>} : memref<49x36xf32, #tpu.memory_space<vmem>>, vector<7x4xf32>,
    %c0_283 = arith.constant 0 : index
    %c5_284 = arith.constant 5 : index
    %c1_285 = arith.constant 1 : index
    %c8_286 = arith.constant 8 : index
    %150 = vector.load %arg1[%c0_283, %c5_284, %c1_285, %c8_286] : memref<1x8x8x16xf32, #tpu.memory_space<vmem>>, vector<1x1x7x4xf32>
    %151 = vector.shape_cast %150 : vector<1x1x7x4xf32> to vector<7x4xf32>
    %c35_287 = arith.constant 35 : index
    %c20_288 = arith.constant 20 : index
    %152 = vector.load %arg11[%c35_287, %c20_288] : memref<49x36xf32, #tpu.memory_space<vmem>>, vector<7x4xf32>
    tpu.vector_store %arg11[%c35_287, %c20_288], %151 {strides = array<i32>} : memref<49x36xf32, #tpu.memory_space<vmem>>, vector<7x4xf32>,
    %c0_289 = arith.constant 0 : index
    %c6 = arith.constant 6 : index
    %c0_290 = arith.constant 0 : index
    %c0_291 = arith.constant 0 : index
    %153 = vector.load %arg1[%c0_289, %c6, %c0_290, %c0_291] : memref<1x8x8x16xf32, #tpu.memory_space<vmem>>, vector<1x1x7x4xf32>
    %154 = vector.shape_cast %153 : vector<1x1x7x4xf32> to vector<7x4xf32>
    %c35_292 = arith.constant 35 : index
    %c24_293 = arith.constant 24 : index
    %155 = vector.load %arg11[%c35_292, %c24_293] : memref<49x36xf32, #tpu.memory_space<vmem>>, vector<7x4xf32>
    tpu.vector_store %arg11[%c35_292, %c24_293], %154 {strides = array<i32>} : memref<49x36xf32, #tpu.memory_space<vmem>>, vector<7x4xf32>,
    %c0_294 = arith.constant 0 : index
    %c6_295 = arith.constant 6 : index
    %c0_296 = arith.constant 0 : index
    %c4_297 = arith.constant 4 : index
    %156 = vector.load %arg1[%c0_294, %c6_295, %c0_296, %c4_297] : memref<1x8x8x16xf32, #tpu.memory_space<vmem>>, vector<1x1x7x4xf32>
    %157 = vector.shape_cast %156 : vector<1x1x7x4xf32> to vector<7x4xf32>
    %c35_298 = arith.constant 35 : index
    %c28_299 = arith.constant 28 : index
    %158 = vector.load %arg11[%c35_298, %c28_299] : memref<49x36xf32, #tpu.memory_space<vmem>>, vector<7x4xf32>
    tpu.vector_store %arg11[%c35_298, %c28_299], %157 {strides = array<i32>} : memref<49x36xf32, #tpu.memory_space<vmem>>, vector<7x4xf32>,
    %c0_300 = arith.constant 0 : index
    %c6_301 = arith.constant 6 : index
    %c1_302 = arith.constant 1 : index
    %c0_303 = arith.constant 0 : index
    %159 = vector.load %arg1[%c0_300, %c6_301, %c1_302, %c0_303] : memref<1x8x8x16xf32, #tpu.memory_space<vmem>>, vector<1x1x7x4xf32>
    %160 = vector.shape_cast %159 : vector<1x1x7x4xf32> to vector<7x4xf32>
    %c35_304 = arith.constant 35 : index
    %c32_305 = arith.constant 32 : index
    %161 = vector.load %arg11[%c35_304, %c32_305] : memref<49x36xf32, #tpu.memory_space<vmem>>, vector<7x4xf32>
    tpu.vector_store %arg11[%c35_304, %c32_305], %160 {strides = array<i32>} : memref<49x36xf32, #tpu.memory_space<vmem>>, vector<7x4xf32>,
    %c0_306 = arith.constant 0 : index
    %c6_307 = arith.constant 6 : index
    %c0_308 = arith.constant 0 : index
    %c0_309 = arith.constant 0 : index
    %162 = vector.load %arg1[%c0_306, %c6_307, %c0_308, %c0_309] : memref<1x8x8x16xf32, #tpu.memory_space<vmem>>, vector<1x1x7x4xf32>
    %163 = vector.shape_cast %162 : vector<1x1x7x4xf32> to vector<7x4xf32>
    %c42 = arith.constant 42 : index
    %c0_310 = arith.constant 0 : index
    %164 = vector.load %arg11[%c42, %c0_310] : memref<49x36xf32, #tpu.memory_space<vmem>>, vector<7x4xf32>
    tpu.vector_store %arg11[%c42, %c0_310], %163 {strides = array<i32>} : memref<49x36xf32, #tpu.memory_space<vmem>>, vector<7x4xf32>,
    %c0_311 = arith.constant 0 : index
    %c6_312 = arith.constant 6 : index
    %c0_313 = arith.constant 0 : index
    %c4_314 = arith.constant 4 : index
    %165 = vector.load %arg1[%c0_311, %c6_312, %c0_313, %c4_314] : memref<1x8x8x16xf32, #tpu.memory_space<vmem>>, vector<1x1x7x4xf32>
    %166 = vector.shape_cast %165 : vector<1x1x7x4xf32> to vector<7x4xf32>
    %c42_315 = arith.constant 42 : index
    %c4_316 = arith.constant 4 : index
    %167 = vector.load %arg11[%c42_315, %c4_316] : memref<49x36xf32, #tpu.memory_space<vmem>>, vector<7x4xf32>
    tpu.vector_store %arg11[%c42_315, %c4_316], %166 {strides = array<i32>} : memref<49x36xf32, #tpu.memory_space<vmem>>, vector<7x4xf32>,
    %c0_317 = arith.constant 0 : index
    %c6_318 = arith.constant 6 : index
    %c1_319 = arith.constant 1 : index
    %c0_320 = arith.constant 0 : index
    %168 = vector.load %arg1[%c0_317, %c6_318, %c1_319, %c0_320] : memref<1x8x8x16xf32, #tpu.memory_space<vmem>>, vector<1x1x7x4xf32>
    %169 = vector.shape_cast %168 : vector<1x1x7x4xf32> to vector<7x4xf32>
    %c42_321 = arith.constant 42 : index
    %c8_322 = arith.constant 8 : index
    %170 = vector.load %arg11[%c42_321, %c8_322] : memref<49x36xf32, #tpu.memory_space<vmem>>, vector<7x4xf32>
    tpu.vector_store %arg11[%c42_321, %c8_322], %169 {strides = array<i32>} : memref<49x36xf32, #tpu.memory_space<vmem>>, vector<7x4xf32>,
    %c0_323 = arith.constant 0 : index
    %c6_324 = arith.constant 6 : index
    %c0_325 = arith.constant 0 : index
    %c8_326 = arith.constant 8 : index
    %171 = vector.load %arg1[%c0_323, %c6_324, %c0_325, %c8_326] : memref<1x8x8x16xf32, #tpu.memory_space<vmem>>, vector<1x1x7x4xf32>
    %172 = vector.shape_cast %171 : vector<1x1x7x4xf32> to vector<7x4xf32>
    %c42_327 = arith.constant 42 : index
    %c12_328 = arith.constant 12 : index
    %173 = vector.load %arg11[%c42_327, %c12_328] : memref<49x36xf32, #tpu.memory_space<vmem>>, vector<7x4xf32>
    tpu.vector_store %arg11[%c42_327, %c12_328], %172 {strides = array<i32>} : memref<49x36xf32, #tpu.memory_space<vmem>>, vector<7x4xf32>,
    %c0_329 = arith.constant 0 : index
    %c6_330 = arith.constant 6 : index
    %c0_331 = arith.constant 0 : index
    %c12_332 = arith.constant 12 : index
    %174 = vector.load %arg1[%c0_329, %c6_330, %c0_331, %c12_332] : memref<1x8x8x16xf32, #tpu.memory_space<vmem>>, vector<1x1x7x4xf32>
    %175 = vector.shape_cast %174 : vector<1x1x7x4xf32> to vector<7x4xf32>
    %c42_333 = arith.constant 42 : index
    %c16_334 = arith.constant 16 : index
    %176 = vector.load %arg11[%c42_333, %c16_334] : memref<49x36xf32, #tpu.memory_space<vmem>>, vector<7x4xf32>
    tpu.vector_store %arg11[%c42_333, %c16_334], %175 {strides = array<i32>} : memref<49x36xf32, #tpu.memory_space<vmem>>, vector<7x4xf32>,
    %c0_335 = arith.constant 0 : index
    %c6_336 = arith.constant 6 : index
    %c1_337 = arith.constant 1 : index
    %c8_338 = arith.constant 8 : index
    %177 = vector.load %arg1[%c0_335, %c6_336, %c1_337, %c8_338] : memref<1x8x8x16xf32, #tpu.memory_space<vmem>>, vector<1x1x7x4xf32>
    %178 = vector.shape_cast %177 : vector<1x1x7x4xf32> to vector<7x4xf32>
    %c42_339 = arith.constant 42 : index
    %c20_340 = arith.constant 20 : index
    %179 = vector.load %arg11[%c42_339, %c20_340] : memref<49x36xf32, #tpu.memory_space<vmem>>, vector<7x4xf32>
    tpu.vector_store %arg11[%c42_339, %c20_340], %178 {strides = array<i32>} : memref<49x36xf32, #tpu.memory_space<vmem>>, vector<7x4xf32>,
    %c0_341 = arith.constant 0 : index
    %c7_342 = arith.constant 7 : index
    %c0_343 = arith.constant 0 : index
    %c0_344 = arith.constant 0 : index
    %180 = vector.load %arg1[%c0_341, %c7_342, %c0_343, %c0_344] : memref<1x8x8x16xf32, #tpu.memory_space<vmem>>, vector<1x1x7x4xf32>
    %181 = vector.shape_cast %180 : vector<1x1x7x4xf32> to vector<7x4xf32>
    %c42_345 = arith.constant 42 : index
    %c24_346 = arith.constant 24 : index
    %182 = vector.load %arg11[%c42_345, %c24_346] : memref<49x36xf32, #tpu.memory_space<vmem>>, vector<7x4xf32>
    tpu.vector_store %arg11[%c42_345, %c24_346], %181 {strides = array<i32>} : memref<49x36xf32, #tpu.memory_space<vmem>>, vector<7x4xf32>,
    %c0_347 = arith.constant 0 : index
    %c7_348 = arith.constant 7 : index
    %c0_349 = arith.constant 0 : index
    %c4_350 = arith.constant 4 : index
    %183 = vector.load %arg1[%c0_347, %c7_348, %c0_349, %c4_350] : memref<1x8x8x16xf32, #tpu.memory_space<vmem>>, vector<1x1x7x4xf32>
    %184 = vector.shape_cast %183 : vector<1x1x7x4xf32> to vector<7x4xf32>
    %c42_351 = arith.constant 42 : index
    %c28_352 = arith.constant 28 : index
    %185 = vector.load %arg11[%c42_351, %c28_352] : memref<49x36xf32, #tpu.memory_space<vmem>>, vector<7x4xf32>
    tpu.vector_store %arg11[%c42_351, %c28_352], %184 {strides = array<i32>} : memref<49x36xf32, #tpu.memory_space<vmem>>, vector<7x4xf32>,
    %c0_353 = arith.constant 0 : index
    %c7_354 = arith.constant 7 : index
    %c1_355 = arith.constant 1 : index
    %c0_356 = arith.constant 0 : index
    %186 = vector.load %arg1[%c0_353, %c7_354, %c1_355, %c0_356] : memref<1x8x8x16xf32, #tpu.memory_space<vmem>>, vector<1x1x7x4xf32>
    %187 = vector.shape_cast %186 : vector<1x1x7x4xf32> to vector<7x4xf32>
    %c42_357 = arith.constant 42 : index
    %c32_358 = arith.constant 32 : index
    %188 = vector.load %arg11[%c42_357, %c32_358] : memref<49x36xf32, #tpu.memory_space<vmem>>, vector<7x4xf32>
    tpu.vector_store %arg11[%c42_357, %c32_358], %187 {strides = array<i32>} : memref<49x36xf32, #tpu.memory_space<vmem>>, vector<7x4xf32>,
    %c0_359 = arith.constant 0 : index
    %c0_360 = arith.constant 0 : index
    %189 = vector.load %arg11[%c0_359, %c0_360] : memref<49x36xf32, #tpu.memory_space<vmem>>, vector<49x36xf32>
    %190 = arith.truncf %189 : vector<49x36xf32> to vector<49x36xbf16>
    %c0_361 = arith.constant 0 : index
    %c0_362 = arith.constant 0 : index
    %191 = vector.load %arg2[%c0_361, %c0_362] : memref<36x32xbf16, #tpu.memory_space<vmem>>, vector<36x32xbf16>
    %cst = arith.constant dense<0.000000e+00> : vector<49x32xf32>
    %192 = tpu.matmul %190, %191, %cst {dimension_numbers = #tpu.dot_dimension_numbers<[1], [0], [0], [1], [0, 0, 1, 1], [], []>} : vector<49x36xbf16>, vector<36x32xbf16>, vector<49x32xf32> -> vector<49x32xf32>
    %c0_363 = arith.constant 0 : index
    %c0_364 = arith.constant 0 : index
    %193 = vector.load %arg3[%c0_363, %c0_364] : memref<1x32xf32, #tpu.memory_space<vmem>>, vector<1x32xf32>
    %194 = vector.broadcast %193 : vector<1x32xf32> to vector<49x32xf32>
    %195 = arith.addf %192, %194 : vector<49x32xf32>
    %cst_365 = arith.constant 0.000000e+00 : f32
    %196 = vector.broadcast %cst_365 : f32 to vector<49x32xf32>
    %197 = arith.maximumf %195, %196 : vector<49x32xf32>
    %198 = vector.extract_strided_slice %197 {offsets = [0, 0], sizes = [1, 32], strides = [1, 1]} : vector<49x32xf32> to vector<1x32xf32>
    %c0_366 = arith.constant 0 : index
    %c0_367 = arith.constant 0 : index
    %199 = vector.load %arg12[%c0_366, %c0_367] : memref<9x288xf32, #tpu.memory_space<vmem>>, vector<1x32xf32>
    tpu.vector_store %arg12[%c0_366, %c0_367], %198 {strides = array<i32>} : memref<9x288xf32, #tpu.memory_space<vmem>>, vector<1x32xf32>,
    %200 = vector.extract_strided_slice %197 {offsets = [1, 0], sizes = [1, 32], strides = [1, 1]} : vector<49x32xf32> to vector<1x32xf32>
    %c0_368 = arith.constant 0 : index
    %c32_369 = arith.constant 32 : index
    %201 = vector.load %arg12[%c0_368, %c32_369] : memref<9x288xf32, #tpu.memory_space<vmem>>, vector<1x32xf32>
    tpu.vector_store %arg12[%c0_368, %c32_369], %200 {strides = array<i32>} : memref<9x288xf32, #tpu.memory_space<vmem>>, vector<1x32xf32>,
    %202 = vector.extract_strided_slice %197 {offsets = [2, 0], sizes = [1, 32], strides = [1, 1]} : vector<49x32xf32> to vector<1x32xf32>
    %c0_370 = arith.constant 0 : index
    %c64 = arith.constant 64 : index
    %203 = vector.load %arg12[%c0_370, %c64] : memref<9x288xf32, #tpu.memory_space<vmem>>, vector<1x32xf32>
    tpu.vector_store %arg12[%c0_370, %c64], %202 {strides = array<i32>} : memref<9x288xf32, #tpu.memory_space<vmem>>, vector<1x32xf32>,
    %204 = vector.extract_strided_slice %197 {offsets = [7, 0], sizes = [1, 32], strides = [1, 1]} : vector<49x32xf32> to vector<1x32xf32>
    %c0_371 = arith.constant 0 : index
    %c96 = arith.constant 96 : index
    %205 = vector.load %arg12[%c0_371, %c96] : memref<9x288xf32, #tpu.memory_space<vmem>>, vector<1x32xf32>
    tpu.vector_store %arg12[%c0_371, %c96], %204 {strides = array<i32>} : memref<9x288xf32, #tpu.memory_space<vmem>>, vector<1x32xf32>,
    %206 = vector.extract_strided_slice %197 {offsets = [8, 0], sizes = [1, 32], strides = [1, 1]} : vector<49x32xf32> to vector<1x32xf32>
    %c0_372 = arith.constant 0 : index
    %c128 = arith.constant 128 : index
    %207 = vector.load %arg12[%c0_372, %c128] : memref<9x288xf32, #tpu.memory_space<vmem>>, vector<1x32xf32>
    tpu.vector_store %arg12[%c0_372, %c128], %206 {strides = array<i32>} : memref<9x288xf32, #tpu.memory_space<vmem>>, vector<1x32xf32>,
    %208 = vector.extract_strided_slice %197 {offsets = [9, 0], sizes = [1, 32], strides = [1, 1]} : vector<49x32xf32> to vector<1x32xf32>
    %c0_373 = arith.constant 0 : index
    %c160 = arith.constant 160 : index
    %209 = vector.load %arg12[%c0_373, %c160] : memref<9x288xf32, #tpu.memory_space<vmem>>, vector<1x32xf32>
    tpu.vector_store %arg12[%c0_373, %c160], %208 {strides = array<i32>} : memref<9x288xf32, #tpu.memory_space<vmem>>, vector<1x32xf32>,
    %210 = vector.extract_strided_slice %197 {offsets = [14, 0], sizes = [1, 32], strides = [1, 1]} : vector<49x32xf32> to vector<1x32xf32>
    %c0_374 = arith.constant 0 : index
    %c192 = arith.constant 192 : index
    %211 = vector.load %arg12[%c0_374, %c192] : memref<9x288xf32, #tpu.memory_space<vmem>>, vector<1x32xf32>
    tpu.vector_store %arg12[%c0_374, %c192], %210 {strides = array<i32>} : memref<9x288xf32, #tpu.memory_space<vmem>>, vector<1x32xf32>,
    %212 = vector.extract_strided_slice %197 {offsets = [15, 0], sizes = [1, 32], strides = [1, 1]} : vector<49x32xf32> to vector<1x32xf32>
    %c0_375 = arith.constant 0 : index
    %c224 = arith.constant 224 : index
    %213 = vector.load %arg12[%c0_375, %c224] : memref<9x288xf32, #tpu.memory_space<vmem>>, vector<1x32xf32>
    tpu.vector_store %arg12[%c0_375, %c224], %212 {strides = array<i32>} : memref<9x288xf32, #tpu.memory_space<vmem>>, vector<1x32xf32>,
    %214 = vector.extract_strided_slice %197 {offsets = [16, 0], sizes = [1, 32], strides = [1, 1]} : vector<49x32xf32> to vector<1x32xf32>
    %c0_376 = arith.constant 0 : index
    %c256 = arith.constant 256 : index
    %215 = vector.load %arg12[%c0_376, %c256] : memref<9x288xf32, #tpu.memory_space<vmem>>, vector<1x32xf32>
    tpu.vector_store %arg12[%c0_376, %c256], %214 {strides = array<i32>} : memref<9x288xf32, #tpu.memory_space<vmem>>, vector<1x32xf32>,
    %216 = vector.extract_strided_slice %197 {offsets = [2, 0], sizes = [1, 32], strides = [1, 1]} : vector<49x32xf32> to vector<1x32xf32>
    %c1_377 = arith.constant 1 : index
    %c0_378 = arith.constant 0 : index
    %217 = vector.load %arg12[%c1_377, %c0_378] : memref<9x288xf32, #tpu.memory_space<vmem>>, vector<1x32xf32>
    tpu.vector_store %arg12[%c1_377, %c0_378], %216 {strides = array<i32>} : memref<9x288xf32, #tpu.memory_space<vmem>>, vector<1x32xf32>,
    %218 = vector.extract_strided_slice %197 {offsets = [3, 0], sizes = [1, 32], strides = [1, 1]} : vector<49x32xf32> to vector<1x32xf32>
    %c1_379 = arith.constant 1 : index
    %c32_380 = arith.constant 32 : index
    %219 = vector.load %arg12[%c1_379, %c32_380] : memref<9x288xf32, #tpu.memory_space<vmem>>, vector<1x32xf32>
    tpu.vector_store %arg12[%c1_379, %c32_380], %218 {strides = array<i32>} : memref<9x288xf32, #tpu.memory_space<vmem>>, vector<1x32xf32>,
    %220 = vector.extract_strided_slice %197 {offsets = [4, 0], sizes = [1, 32], strides = [1, 1]} : vector<49x32xf32> to vector<1x32xf32>
    %c1_381 = arith.constant 1 : index
    %c64_382 = arith.constant 64 : index
    %221 = vector.load %arg12[%c1_381, %c64_382] : memref<9x288xf32, #tpu.memory_space<vmem>>, vector<1x32xf32>
    tpu.vector_store %arg12[%c1_381, %c64_382], %220 {strides = array<i32>} : memref<9x288xf32, #tpu.memory_space<vmem>>, vector<1x32xf32>,
    %222 = vector.extract_strided_slice %197 {offsets = [9, 0], sizes = [1, 32], strides = [1, 1]} : vector<49x32xf32> to vector<1x32xf32>
    %c1_383 = arith.constant 1 : index
    %c96_384 = arith.constant 96 : index
    %223 = vector.load %arg12[%c1_383, %c96_384] : memref<9x288xf32, #tpu.memory_space<vmem>>, vector<1x32xf32>
    tpu.vector_store %arg12[%c1_383, %c96_384], %222 {strides = array<i32>} : memref<9x288xf32, #tpu.memory_space<vmem>>, vector<1x32xf32>,
    %224 = vector.extract_strided_slice %197 {offsets = [10, 0], sizes = [1, 32], strides = [1, 1]} : vector<49x32xf32> to vector<1x32xf32>
    %c1_385 = arith.constant 1 : index
    %c128_386 = arith.constant 128 : index
    %225 = vector.load %arg12[%c1_385, %c128_386] : memref<9x288xf32, #tpu.memory_space<vmem>>, vector<1x32xf32>
    tpu.vector_store %arg12[%c1_385, %c128_386], %224 {strides = array<i32>} : memref<9x288xf32, #tpu.memory_space<vmem>>, vector<1x32xf32>,
    %226 = vector.extract_strided_slice %197 {offsets = [11, 0], sizes = [1, 32], strides = [1, 1]} : vector<49x32xf32> to vector<1x32xf32>
    %c1_387 = arith.constant 1 : index
    %c160_388 = arith.constant 160 : index
    %227 = vector.load %arg12[%c1_387, %c160_388] : memref<9x288xf32, #tpu.memory_space<vmem>>, vector<1x32xf32>
    tpu.vector_store %arg12[%c1_387, %c160_388], %226 {strides = array<i32>} : memref<9x288xf32, #tpu.memory_space<vmem>>, vector<1x32xf32>,
    %228 = vector.extract_strided_slice %197 {offsets = [16, 0], sizes = [1, 32], strides = [1, 1]} : vector<49x32xf32> to vector<1x32xf32>
    %c1_389 = arith.constant 1 : index
    %c192_390 = arith.constant 192 : index
    %229 = vector.load %arg12[%c1_389, %c192_390] : memref<9x288xf32, #tpu.memory_space<vmem>>, vector<1x32xf32>
    tpu.vector_store %arg12[%c1_389, %c192_390], %228 {strides = array<i32>} : memref<9x288xf32, #tpu.memory_space<vmem>>, vector<1x32xf32>,
    %230 = vector.extract_strided_slice %197 {offsets = [17, 0], sizes = [1, 32], strides = [1, 1]} : vector<49x32xf32> to vector<1x32xf32>
    %c1_391 = arith.constant 1 : index
    %c224_392 = arith.constant 224 : index
    %231 = vector.load %arg12[%c1_391, %c224_392] : memref<9x288xf32, #tpu.memory_space<vmem>>, vector<1x32xf32>
    tpu.vector_store %arg12[%c1_391, %c224_392], %230 {strides = array<i32>} : memref<9x288xf32, #tpu.memory_space<vmem>>, vector<1x32xf32>,
    %232 = vector.extract_strided_slice %197 {offsets = [18, 0], sizes = [1, 32], strides = [1, 1]} : vector<49x32xf32> to vector<1x32xf32>
    %c1_393 = arith.constant 1 : index
    %c256_394 = arith.constant 256 : index
    %233 = vector.load %arg12[%c1_393, %c256_394] : memref<9x288xf32, #tpu.memory_space<vmem>>, vector<1x32xf32>
    tpu.vector_store %arg12[%c1_393, %c256_394], %232 {strides = array<i32>} : memref<9x288xf32, #tpu.memory_space<vmem>>, vector<1x32xf32>,
    %234 = vector.extract_strided_slice %197 {offsets = [4, 0], sizes = [1, 32], strides = [1, 1]} : vector<49x32xf32> to vector<1x32xf32>
    %c2_395 = arith.constant 2 : index
    %c0_396 = arith.constant 0 : index
    %235 = vector.load %arg12[%c2_395, %c0_396] : memref<9x288xf32, #tpu.memory_space<vmem>>, vector<1x32xf32>
    tpu.vector_store %arg12[%c2_395, %c0_396], %234 {strides = array<i32>} : memref<9x288xf32, #tpu.memory_space<vmem>>, vector<1x32xf32>,
    %236 = vector.extract_strided_slice %197 {offsets = [5, 0], sizes = [1, 32], strides = [1, 1]} : vector<49x32xf32> to vector<1x32xf32>
    %c2_397 = arith.constant 2 : index
    %c32_398 = arith.constant 32 : index
    %237 = vector.load %arg12[%c2_397, %c32_398] : memref<9x288xf32, #tpu.memory_space<vmem>>, vector<1x32xf32>
    tpu.vector_store %arg12[%c2_397, %c32_398], %236 {strides = array<i32>} : memref<9x288xf32, #tpu.memory_space<vmem>>, vector<1x32xf32>,
    %238 = vector.extract_strided_slice %197 {offsets = [6, 0], sizes = [1, 32], strides = [1, 1]} : vector<49x32xf32> to vector<1x32xf32>
    %c2_399 = arith.constant 2 : index
    %c64_400 = arith.constant 64 : index
    %239 = vector.load %arg12[%c2_399, %c64_400] : memref<9x288xf32, #tpu.memory_space<vmem>>, vector<1x32xf32>
    tpu.vector_store %arg12[%c2_399, %c64_400], %238 {strides = array<i32>} : memref<9x288xf32, #tpu.memory_space<vmem>>, vector<1x32xf32>,
    %240 = vector.extract_strided_slice %197 {offsets = [11, 0], sizes = [1, 32], strides = [1, 1]} : vector<49x32xf32> to vector<1x32xf32>
    %c2_401 = arith.constant 2 : index
    %c96_402 = arith.constant 96 : index
    %241 = vector.load %arg12[%c2_401, %c96_402] : memref<9x288xf32, #tpu.memory_space<vmem>>, vector<1x32xf32>
    tpu.vector_store %arg12[%c2_401, %c96_402], %240 {strides = array<i32>} : memref<9x288xf32, #tpu.memory_space<vmem>>, vector<1x32xf32>,
    %242 = vector.extract_strided_slice %197 {offsets = [12, 0], sizes = [1, 32], strides = [1, 1]} : vector<49x32xf32> to vector<1x32xf32>
    %c2_403 = arith.constant 2 : index
    %c128_404 = arith.constant 128 : index
    %243 = vector.load %arg12[%c2_403, %c128_404] : memref<9x288xf32, #tpu.memory_space<vmem>>, vector<1x32xf32>
    tpu.vector_store %arg12[%c2_403, %c128_404], %242 {strides = array<i32>} : memref<9x288xf32, #tpu.memory_space<vmem>>, vector<1x32xf32>,
    %244 = vector.extract_strided_slice %197 {offsets = [13, 0], sizes = [1, 32], strides = [1, 1]} : vector<49x32xf32> to vector<1x32xf32>
    %c2_405 = arith.constant 2 : index
    %c160_406 = arith.constant 160 : index
    %245 = vector.load %arg12[%c2_405, %c160_406] : memref<9x288xf32, #tpu.memory_space<vmem>>, vector<1x32xf32>
    tpu.vector_store %arg12[%c2_405, %c160_406], %244 {strides = array<i32>} : memref<9x288xf32, #tpu.memory_space<vmem>>, vector<1x32xf32>,
    %246 = vector.extract_strided_slice %197 {offsets = [18, 0], sizes = [1, 32], strides = [1, 1]} : vector<49x32xf32> to vector<1x32xf32>
    %c2_407 = arith.constant 2 : index
    %c192_408 = arith.constant 192 : index
    %247 = vector.load %arg12[%c2_407, %c192_408] : memref<9x288xf32, #tpu.memory_space<vmem>>, vector<1x32xf32>
    tpu.vector_store %arg12[%c2_407, %c192_408], %246 {strides = array<i32>} : memref<9x288xf32, #tpu.memory_space<vmem>>, vector<1x32xf32>,
    %248 = vector.extract_strided_slice %197 {offsets = [19, 0], sizes = [1, 32], strides = [1, 1]} : vector<49x32xf32> to vector<1x32xf32>
    %c2_409 = arith.constant 2 : index
    %c224_410 = arith.constant 224 : index
    %249 = vector.load %arg12[%c2_409, %c224_410] : memref<9x288xf32, #tpu.memory_space<vmem>>, vector<1x32xf32>
    tpu.vector_store %arg12[%c2_409, %c224_410], %248 {strides = array<i32>} : memref<9x288xf32, #tpu.memory_space<vmem>>, vector<1x32xf32>,
    %250 = vector.extract_strided_slice %197 {offsets = [20, 0], sizes = [1, 32], strides = [1, 1]} : vector<49x32xf32> to vector<1x32xf32>
    %c2_411 = arith.constant 2 : index
    %c256_412 = arith.constant 256 : index
    %251 = vector.load %arg12[%c2_411, %c256_412] : memref<9x288xf32, #tpu.memory_space<vmem>>, vector<1x32xf32>
    tpu.vector_store %arg12[%c2_411, %c256_412], %250 {strides = array<i32>} : memref<9x288xf32, #tpu.memory_space<vmem>>, vector<1x32xf32>,
    %252 = vector.extract_strided_slice %197 {offsets = [14, 0], sizes = [1, 32], strides = [1, 1]} : vector<49x32xf32> to vector<1x32xf32>
    %c3_413 = arith.constant 3 : index
    %c0_414 = arith.constant 0 : index
    %253 = vector.load %arg12[%c3_413, %c0_414] : memref<9x288xf32, #tpu.memory_space<vmem>>, vector<1x32xf32>
    tpu.vector_store %arg12[%c3_413, %c0_414], %252 {strides = array<i32>} : memref<9x288xf32, #tpu.memory_space<vmem>>, vector<1x32xf32>,
    %254 = vector.extract_strided_slice %197 {offsets = [15, 0], sizes = [1, 32], strides = [1, 1]} : vector<49x32xf32> to vector<1x32xf32>
    %c3_415 = arith.constant 3 : index
    %c32_416 = arith.constant 32 : index
    %255 = vector.load %arg12[%c3_415, %c32_416] : memref<9x288xf32, #tpu.memory_space<vmem>>, vector<1x32xf32>
    tpu.vector_store %arg12[%c3_415, %c32_416], %254 {strides = array<i32>} : memref<9x288xf32, #tpu.memory_space<vmem>>, vector<1x32xf32>,
    %256 = vector.extract_strided_slice %197 {offsets = [16, 0], sizes = [1, 32], strides = [1, 1]} : vector<49x32xf32> to vector<1x32xf32>
    %c3_417 = arith.constant 3 : index
    %c64_418 = arith.constant 64 : index
    %257 = vector.load %arg12[%c3_417, %c64_418] : memref<9x288xf32, #tpu.memory_space<vmem>>, vector<1x32xf32>
    tpu.vector_store %arg12[%c3_417, %c64_418], %256 {strides = array<i32>} : memref<9x288xf32, #tpu.memory_space<vmem>>, vector<1x32xf32>,
    %258 = vector.extract_strided_slice %197 {offsets = [21, 0], sizes = [1, 32], strides = [1, 1]} : vector<49x32xf32> to vector<1x32xf32>
    %c3_419 = arith.constant 3 : index
    %c96_420 = arith.constant 96 : index
    %259 = vector.load %arg12[%c3_419, %c96_420] : memref<9x288xf32, #tpu.memory_space<vmem>>, vector<1x32xf32>
    tpu.vector_store %arg12[%c3_419, %c96_420], %258 {strides = array<i32>} : memref<9x288xf32, #tpu.memory_space<vmem>>, vector<1x32xf32>,
    %260 = vector.extract_strided_slice %197 {offsets = [22, 0], sizes = [1, 32], strides = [1, 1]} : vector<49x32xf32> to vector<1x32xf32>
    %c3_421 = arith.constant 3 : index
    %c128_422 = arith.constant 128 : index
    %261 = vector.load %arg12[%c3_421, %c128_422] : memref<9x288xf32, #tpu.memory_space<vmem>>, vector<1x32xf32>
    tpu.vector_store %arg12[%c3_421, %c128_422], %260 {strides = array<i32>} : memref<9x288xf32, #tpu.memory_space<vmem>>, vector<1x32xf32>,
    %262 = vector.extract_strided_slice %197 {offsets = [23, 0], sizes = [1, 32], strides = [1, 1]} : vector<49x32xf32> to vector<1x32xf32>
    %c3_423 = arith.constant 3 : index
    %c160_424 = arith.constant 160 : index
    %263 = vector.load %arg12[%c3_423, %c160_424] : memref<9x288xf32, #tpu.memory_space<vmem>>, vector<1x32xf32>
    tpu.vector_store %arg12[%c3_423, %c160_424], %262 {strides = array<i32>} : memref<9x288xf32, #tpu.memory_space<vmem>>, vector<1x32xf32>,
    %264 = vector.extract_strided_slice %197 {offsets = [28, 0], sizes = [1, 32], strides = [1, 1]} : vector<49x32xf32> to vector<1x32xf32>
    %c3_425 = arith.constant 3 : index
    %c192_426 = arith.constant 192 : index
    %265 = vector.load %arg12[%c3_425, %c192_426] : memref<9x288xf32, #tpu.memory_space<vmem>>, vector<1x32xf32>
    tpu.vector_store %arg12[%c3_425, %c192_426], %264 {strides = array<i32>} : memref<9x288xf32, #tpu.memory_space<vmem>>, vector<1x32xf32>,
    %266 = vector.extract_strided_slice %197 {offsets = [29, 0], sizes = [1, 32], strides = [1, 1]} : vector<49x32xf32> to vector<1x32xf32>
    %c3_427 = arith.constant 3 : index
    %c224_428 = arith.constant 224 : index
    %267 = vector.load %arg12[%c3_427, %c224_428] : memref<9x288xf32, #tpu.memory_space<vmem>>, vector<1x32xf32>
    tpu.vector_store %arg12[%c3_427, %c224_428], %266 {strides = array<i32>} : memref<9x288xf32, #tpu.memory_space<vmem>>, vector<1x32xf32>,
    %268 = vector.extract_strided_slice %197 {offsets = [30, 0], sizes = [1, 32], strides = [1, 1]} : vector<49x32xf32> to vector<1x32xf32>
    %c3_429 = arith.constant 3 : index
    %c256_430 = arith.constant 256 : index
    %269 = vector.load %arg12[%c3_429, %c256_430] : memref<9x288xf32, #tpu.memory_space<vmem>>, vector<1x32xf32>
    tpu.vector_store %arg12[%c3_429, %c256_430], %268 {strides = array<i32>} : memref<9x288xf32, #tpu.memory_space<vmem>>, vector<1x32xf32>,
    %270 = vector.extract_strided_slice %197 {offsets = [16, 0], sizes = [1, 32], strides = [1, 1]} : vector<49x32xf32> to vector<1x32xf32>
    %c4_431 = arith.constant 4 : index
    %c0_432 = arith.constant 0 : index
    %271 = vector.load %arg12[%c4_431, %c0_432] : memref<9x288xf32, #tpu.memory_space<vmem>>, vector<1x32xf32>
    tpu.vector_store %arg12[%c4_431, %c0_432], %270 {strides = array<i32>} : memref<9x288xf32, #tpu.memory_space<vmem>>, vector<1x32xf32>,
    %272 = vector.extract_strided_slice %197 {offsets = [17, 0], sizes = [1, 32], strides = [1, 1]} : vector<49x32xf32> to vector<1x32xf32>
    %c4_433 = arith.constant 4 : index
    %c32_434 = arith.constant 32 : index
    %273 = vector.load %arg12[%c4_433, %c32_434] : memref<9x288xf32, #tpu.memory_space<vmem>>, vector<1x32xf32>
    tpu.vector_store %arg12[%c4_433, %c32_434], %272 {strides = array<i32>} : memref<9x288xf32, #tpu.memory_space<vmem>>, vector<1x32xf32>,
    %274 = vector.extract_strided_slice %197 {offsets = [18, 0], sizes = [1, 32], strides = [1, 1]} : vector<49x32xf32> to vector<1x32xf32>
    %c4_435 = arith.constant 4 : index
    %c64_436 = arith.constant 64 : index
    %275 = vector.load %arg12[%c4_435, %c64_436] : memref<9x288xf32, #tpu.memory_space<vmem>>, vector<1x32xf32>
    tpu.vector_store %arg12[%c4_435, %c64_436], %274 {strides = array<i32>} : memref<9x288xf32, #tpu.memory_space<vmem>>, vector<1x32xf32>,
    %276 = vector.extract_strided_slice %197 {offsets = [23, 0], sizes = [1, 32], strides = [1, 1]} : vector<49x32xf32> to vector<1x32xf32>
    %c4_437 = arith.constant 4 : index
    %c96_438 = arith.constant 96 : index
    %277 = vector.load %arg12[%c4_437, %c96_438] : memref<9x288xf32, #tpu.memory_space<vmem>>, vector<1x32xf32>
    tpu.vector_store %arg12[%c4_437, %c96_438], %276 {strides = array<i32>} : memref<9x288xf32, #tpu.memory_space<vmem>>, vector<1x32xf32>,
    %278 = vector.extract_strided_slice %197 {offsets = [24, 0], sizes = [1, 32], strides = [1, 1]} : vector<49x32xf32> to vector<1x32xf32>
    %c4_439 = arith.constant 4 : index
    %c128_440 = arith.constant 128 : index
    %279 = vector.load %arg12[%c4_439, %c128_440] : memref<9x288xf32, #tpu.memory_space<vmem>>, vector<1x32xf32>
    tpu.vector_store %arg12[%c4_439, %c128_440], %278 {strides = array<i32>} : memref<9x288xf32, #tpu.memory_space<vmem>>, vector<1x32xf32>,
    %280 = vector.extract_strided_slice %197 {offsets = [25, 0], sizes = [1, 32], strides = [1, 1]} : vector<49x32xf32> to vector<1x32xf32>
    %c4_441 = arith.constant 4 : index
    %c160_442 = arith.constant 160 : index
    %281 = vector.load %arg12[%c4_441, %c160_442] : memref<9x288xf32, #tpu.memory_space<vmem>>, vector<1x32xf32>
    tpu.vector_store %arg12[%c4_441, %c160_442], %280 {strides = array<i32>} : memref<9x288xf32, #tpu.memory_space<vmem>>, vector<1x32xf32>,
    %282 = vector.extract_strided_slice %197 {offsets = [30, 0], sizes = [1, 32], strides = [1, 1]} : vector<49x32xf32> to vector<1x32xf32>
    %c4_443 = arith.constant 4 : index
    %c192_444 = arith.constant 192 : index
    %283 = vector.load %arg12[%c4_443, %c192_444] : memref<9x288xf32, #tpu.memory_space<vmem>>, vector<1x32xf32>
    tpu.vector_store %arg12[%c4_443, %c192_444], %282 {strides = array<i32>} : memref<9x288xf32, #tpu.memory_space<vmem>>, vector<1x32xf32>,
    %284 = vector.extract_strided_slice %197 {offsets = [31, 0], sizes = [1, 32], strides = [1, 1]} : vector<49x32xf32> to vector<1x32xf32>
    %c4_445 = arith.constant 4 : index
    %c224_446 = arith.constant 224 : index
    %285 = vector.load %arg12[%c4_445, %c224_446] : memref<9x288xf32, #tpu.memory_space<vmem>>, vector<1x32xf32>
    tpu.vector_store %arg12[%c4_445, %c224_446], %284 {strides = array<i32>} : memref<9x288xf32, #tpu.memory_space<vmem>>, vector<1x32xf32>,
    %286 = vector.extract_strided_slice %197 {offsets = [32, 0], sizes = [1, 32], strides = [1, 1]} : vector<49x32xf32> to vector<1x32xf32>
    %c4_447 = arith.constant 4 : index
    %c256_448 = arith.constant 256 : index
    %287 = vector.load %arg12[%c4_447, %c256_448] : memref<9x288xf32, #tpu.memory_space<vmem>>, vector<1x32xf32>
    tpu.vector_store %arg12[%c4_447, %c256_448], %286 {strides = array<i32>} : memref<9x288xf32, #tpu.memory_space<vmem>>, vector<1x32xf32>,
    %288 = vector.extract_strided_slice %197 {offsets = [18, 0], sizes = [1, 32], strides = [1, 1]} : vector<49x32xf32> to vector<1x32xf32>
    %c5_449 = arith.constant 5 : index
    %c0_450 = arith.constant 0 : index
    %289 = vector.load %arg12[%c5_449, %c0_450] : memref<9x288xf32, #tpu.memory_space<vmem>>, vector<1x32xf32>
    tpu.vector_store %arg12[%c5_449, %c0_450], %288 {strides = array<i32>} : memref<9x288xf32, #tpu.memory_space<vmem>>, vector<1x32xf32>,
    %290 = vector.extract_strided_slice %197 {offsets = [19, 0], sizes = [1, 32], strides = [1, 1]} : vector<49x32xf32> to vector<1x32xf32>
    %c5_451 = arith.constant 5 : index
    %c32_452 = arith.constant 32 : index
    %291 = vector.load %arg12[%c5_451, %c32_452] : memref<9x288xf32, #tpu.memory_space<vmem>>, vector<1x32xf32>
    tpu.vector_store %arg12[%c5_451, %c32_452], %290 {strides = array<i32>} : memref<9x288xf32, #tpu.memory_space<vmem>>, vector<1x32xf32>,
    %292 = vector.extract_strided_slice %197 {offsets = [20, 0], sizes = [1, 32], strides = [1, 1]} : vector<49x32xf32> to vector<1x32xf32>
    %c5_453 = arith.constant 5 : index
    %c64_454 = arith.constant 64 : index
    %293 = vector.load %arg12[%c5_453, %c64_454] : memref<9x288xf32, #tpu.memory_space<vmem>>, vector<1x32xf32>
    tpu.vector_store %arg12[%c5_453, %c64_454], %292 {strides = array<i32>} : memref<9x288xf32, #tpu.memory_space<vmem>>, vector<1x32xf32>,
    %294 = vector.extract_strided_slice %197 {offsets = [25, 0], sizes = [1, 32], strides = [1, 1]} : vector<49x32xf32> to vector<1x32xf32>
    %c5_455 = arith.constant 5 : index
    %c96_456 = arith.constant 96 : index
    %295 = vector.load %arg12[%c5_455, %c96_456] : memref<9x288xf32, #tpu.memory_space<vmem>>, vector<1x32xf32>
    tpu.vector_store %arg12[%c5_455, %c96_456], %294 {strides = array<i32>} : memref<9x288xf32, #tpu.memory_space<vmem>>, vector<1x32xf32>,
    %296 = vector.extract_strided_slice %197 {offsets = [26, 0], sizes = [1, 32], strides = [1, 1]} : vector<49x32xf32> to vector<1x32xf32>
    %c5_457 = arith.constant 5 : index
    %c128_458 = arith.constant 128 : index
    %297 = vector.load %arg12[%c5_457, %c128_458] : memref<9x288xf32, #tpu.memory_space<vmem>>, vector<1x32xf32>
    tpu.vector_store %arg12[%c5_457, %c128_458], %296 {strides = array<i32>} : memref<9x288xf32, #tpu.memory_space<vmem>>, vector<1x32xf32>,
    %298 = vector.extract_strided_slice %197 {offsets = [27, 0], sizes = [1, 32], strides = [1, 1]} : vector<49x32xf32> to vector<1x32xf32>
    %c5_459 = arith.constant 5 : index
    %c160_460 = arith.constant 160 : index
    %299 = vector.load %arg12[%c5_459, %c160_460] : memref<9x288xf32, #tpu.memory_space<vmem>>, vector<1x32xf32>
    tpu.vector_store %arg12[%c5_459, %c160_460], %298 {strides = array<i32>} : memref<9x288xf32, #tpu.memory_space<vmem>>, vector<1x32xf32>,
    %300 = vector.extract_strided_slice %197 {offsets = [32, 0], sizes = [1, 32], strides = [1, 1]} : vector<49x32xf32> to vector<1x32xf32>
    %c5_461 = arith.constant 5 : index
    %c192_462 = arith.constant 192 : index
    %301 = vector.load %arg12[%c5_461, %c192_462] : memref<9x288xf32, #tpu.memory_space<vmem>>, vector<1x32xf32>
    tpu.vector_store %arg12[%c5_461, %c192_462], %300 {strides = array<i32>} : memref<9x288xf32, #tpu.memory_space<vmem>>, vector<1x32xf32>,
    %302 = vector.extract_strided_slice %197 {offsets = [33, 0], sizes = [1, 32], strides = [1, 1]} : vector<49x32xf32> to vector<1x32xf32>
    %c5_463 = arith.constant 5 : index
    %c224_464 = arith.constant 224 : index
    %303 = vector.load %arg12[%c5_463, %c224_464] : memref<9x288xf32, #tpu.memory_space<vmem>>, vector<1x32xf32>
    tpu.vector_store %arg12[%c5_463, %c224_464], %302 {strides = array<i32>} : memref<9x288xf32, #tpu.memory_space<vmem>>, vector<1x32xf32>,
    %304 = vector.extract_strided_slice %197 {offsets = [34, 0], sizes = [1, 32], strides = [1, 1]} : vector<49x32xf32> to vector<1x32xf32>
    %c5_465 = arith.constant 5 : index
    %c256_466 = arith.constant 256 : index
    %305 = vector.load %arg12[%c5_465, %c256_466] : memref<9x288xf32, #tpu.memory_space<vmem>>, vector<1x32xf32>
    tpu.vector_store %arg12[%c5_465, %c256_466], %304 {strides = array<i32>} : memref<9x288xf32, #tpu.memory_space<vmem>>, vector<1x32xf32>,
    %306 = vector.extract_strided_slice %197 {offsets = [28, 0], sizes = [1, 32], strides = [1, 1]} : vector<49x32xf32> to vector<1x32xf32>
    %c6_467 = arith.constant 6 : index
    %c0_468 = arith.constant 0 : index
    %307 = vector.load %arg12[%c6_467, %c0_468] : memref<9x288xf32, #tpu.memory_space<vmem>>, vector<1x32xf32>
    tpu.vector_store %arg12[%c6_467, %c0_468], %306 {strides = array<i32>} : memref<9x288xf32, #tpu.memory_space<vmem>>, vector<1x32xf32>,
    %308 = vector.extract_strided_slice %197 {offsets = [29, 0], sizes = [1, 32], strides = [1, 1]} : vector<49x32xf32> to vector<1x32xf32>
    %c6_469 = arith.constant 6 : index
    %c32_470 = arith.constant 32 : index
    %309 = vector.load %arg12[%c6_469, %c32_470] : memref<9x288xf32, #tpu.memory_space<vmem>>, vector<1x32xf32>
    tpu.vector_store %arg12[%c6_469, %c32_470], %308 {strides = array<i32>} : memref<9x288xf32, #tpu.memory_space<vmem>>, vector<1x32xf32>,
    %310 = vector.extract_strided_slice %197 {offsets = [30, 0], sizes = [1, 32], strides = [1, 1]} : vector<49x32xf32> to vector<1x32xf32>
    %c6_471 = arith.constant 6 : index
    %c64_472 = arith.constant 64 : index
    %311 = vector.load %arg12[%c6_471, %c64_472] : memref<9x288xf32, #tpu.memory_space<vmem>>, vector<1x32xf32>
    tpu.vector_store %arg12[%c6_471, %c64_472], %310 {strides = array<i32>} : memref<9x288xf32, #tpu.memory_space<vmem>>, vector<1x32xf32>,
    %312 = vector.extract_strided_slice %197 {offsets = [35, 0], sizes = [1, 32], strides = [1, 1]} : vector<49x32xf32> to vector<1x32xf32>
    %c6_473 = arith.constant 6 : index
    %c96_474 = arith.constant 96 : index
    %313 = vector.load %arg12[%c6_473, %c96_474] : memref<9x288xf32, #tpu.memory_space<vmem>>, vector<1x32xf32>
    tpu.vector_store %arg12[%c6_473, %c96_474], %312 {strides = array<i32>} : memref<9x288xf32, #tpu.memory_space<vmem>>, vector<1x32xf32>,
    %314 = vector.extract_strided_slice %197 {offsets = [36, 0], sizes = [1, 32], strides = [1, 1]} : vector<49x32xf32> to vector<1x32xf32>
    %c6_475 = arith.constant 6 : index
    %c128_476 = arith.constant 128 : index
    %315 = vector.load %arg12[%c6_475, %c128_476] : memref<9x288xf32, #tpu.memory_space<vmem>>, vector<1x32xf32>
    tpu.vector_store %arg12[%c6_475, %c128_476], %314 {strides = array<i32>} : memref<9x288xf32, #tpu.memory_space<vmem>>, vector<1x32xf32>,
    %316 = vector.extract_strided_slice %197 {offsets = [37, 0], sizes = [1, 32], strides = [1, 1]} : vector<49x32xf32> to vector<1x32xf32>
    %c6_477 = arith.constant 6 : index
    %c160_478 = arith.constant 160 : index
    %317 = vector.load %arg12[%c6_477, %c160_478] : memref<9x288xf32, #tpu.memory_space<vmem>>, vector<1x32xf32>
    tpu.vector_store %arg12[%c6_477, %c160_478], %316 {strides = array<i32>} : memref<9x288xf32, #tpu.memory_space<vmem>>, vector<1x32xf32>,
    %318 = vector.extract_strided_slice %197 {offsets = [42, 0], sizes = [1, 32], strides = [1, 1]} : vector<49x32xf32> to vector<1x32xf32>
    %c6_479 = arith.constant 6 : index
    %c192_480 = arith.constant 192 : index
    %319 = vector.load %arg12[%c6_479, %c192_480] : memref<9x288xf32, #tpu.memory_space<vmem>>, vector<1x32xf32>
    tpu.vector_store %arg12[%c6_479, %c192_480], %318 {strides = array<i32>} : memref<9x288xf32, #tpu.memory_space<vmem>>, vector<1x32xf32>,
    %320 = vector.extract_strided_slice %197 {offsets = [43, 0], sizes = [1, 32], strides = [1, 1]} : vector<49x32xf32> to vector<1x32xf32>
    %c6_481 = arith.constant 6 : index
    %c224_482 = arith.constant 224 : index
    %321 = vector.load %arg12[%c6_481, %c224_482] : memref<9x288xf32, #tpu.memory_space<vmem>>, vector<1x32xf32>
    tpu.vector_store %arg12[%c6_481, %c224_482], %320 {strides = array<i32>} : memref<9x288xf32, #tpu.memory_space<vmem>>, vector<1x32xf32>,
    %322 = vector.extract_strided_slice %197 {offsets = [44, 0], sizes = [1, 32], strides = [1, 1]} : vector<49x32xf32> to vector<1x32xf32>
    %c6_483 = arith.constant 6 : index
    %c256_484 = arith.constant 256 : index
    %323 = vector.load %arg12[%c6_483, %c256_484] : memref<9x288xf32, #tpu.memory_space<vmem>>, vector<1x32xf32>
    tpu.vector_store %arg12[%c6_483, %c256_484], %322 {strides = array<i32>} : memref<9x288xf32, #tpu.memory_space<vmem>>, vector<1x32xf32>,
    %324 = vector.extract_strided_slice %197 {offsets = [30, 0], sizes = [1, 32], strides = [1, 1]} : vector<49x32xf32> to vector<1x32xf32>
    %c7_485 = arith.constant 7 : index
    %c0_486 = arith.constant 0 : index
    %325 = vector.load %arg12[%c7_485, %c0_486] : memref<9x288xf32, #tpu.memory_space<vmem>>, vector<1x32xf32>
    tpu.vector_store %arg12[%c7_485, %c0_486], %324 {strides = array<i32>} : memref<9x288xf32, #tpu.memory_space<vmem>>, vector<1x32xf32>,
    %326 = vector.extract_strided_slice %197 {offsets = [31, 0], sizes = [1, 32], strides = [1, 1]} : vector<49x32xf32> to vector<1x32xf32>
    %c7_487 = arith.constant 7 : index
    %c32_488 = arith.constant 32 : index
    %327 = vector.load %arg12[%c7_487, %c32_488] : memref<9x288xf32, #tpu.memory_space<vmem>>, vector<1x32xf32>
    tpu.vector_store %arg12[%c7_487, %c32_488], %326 {strides = array<i32>} : memref<9x288xf32, #tpu.memory_space<vmem>>, vector<1x32xf32>,
    %328 = vector.extract_strided_slice %197 {offsets = [32, 0], sizes = [1, 32], strides = [1, 1]} : vector<49x32xf32> to vector<1x32xf32>
    %c7_489 = arith.constant 7 : index
    %c64_490 = arith.constant 64 : index
    %329 = vector.load %arg12[%c7_489, %c64_490] : memref<9x288xf32, #tpu.memory_space<vmem>>, vector<1x32xf32>
    tpu.vector_store %arg12[%c7_489, %c64_490], %328 {strides = array<i32>} : memref<9x288xf32, #tpu.memory_space<vmem>>, vector<1x32xf32>,
    %330 = vector.extract_strided_slice %197 {offsets = [37, 0], sizes = [1, 32], strides = [1, 1]} : vector<49x32xf32> to vector<1x32xf32>
    %c7_491 = arith.constant 7 : index
    %c96_492 = arith.constant 96 : index
    %331 = vector.load %arg12[%c7_491, %c96_492] : memref<9x288xf32, #tpu.memory_space<vmem>>, vector<1x32xf32>
    tpu.vector_store %arg12[%c7_491, %c96_492], %330 {strides = array<i32>} : memref<9x288xf32, #tpu.memory_space<vmem>>, vector<1x32xf32>,
    %332 = vector.extract_strided_slice %197 {offsets = [38, 0], sizes = [1, 32], strides = [1, 1]} : vector<49x32xf32> to vector<1x32xf32>
    %c7_493 = arith.constant 7 : index
    %c128_494 = arith.constant 128 : index
    %333 = vector.load %arg12[%c7_493, %c128_494] : memref<9x288xf32, #tpu.memory_space<vmem>>, vector<1x32xf32>
    tpu.vector_store %arg12[%c7_493, %c128_494], %332 {strides = array<i32>} : memref<9x288xf32, #tpu.memory_space<vmem>>, vector<1x32xf32>,
    %334 = vector.extract_strided_slice %197 {offsets = [39, 0], sizes = [1, 32], strides = [1, 1]} : vector<49x32xf32> to vector<1x32xf32>
    %c7_495 = arith.constant 7 : index
    %c160_496 = arith.constant 160 : index
    %335 = vector.load %arg12[%c7_495, %c160_496] : memref<9x288xf32, #tpu.memory_space<vmem>>, vector<1x32xf32>
    tpu.vector_store %arg12[%c7_495, %c160_496], %334 {strides = array<i32>} : memref<9x288xf32, #tpu.memory_space<vmem>>, vector<1x32xf32>,
    %336 = vector.extract_strided_slice %197 {offsets = [44, 0], sizes = [1, 32], strides = [1, 1]} : vector<49x32xf32> to vector<1x32xf32>
    %c7_497 = arith.constant 7 : index
    %c192_498 = arith.constant 192 : index
    %337 = vector.load %arg12[%c7_497, %c192_498] : memref<9x288xf32, #tpu.memory_space<vmem>>, vector<1x32xf32>
    tpu.vector_store %arg12[%c7_497, %c192_498], %336 {strides = array<i32>} : memref<9x288xf32, #tpu.memory_space<vmem>>, vector<1x32xf32>,
    %338 = vector.extract_strided_slice %197 {offsets = [45, 0], sizes = [1, 32], strides = [1, 1]} : vector<49x32xf32> to vector<1x32xf32>
    %c7_499 = arith.constant 7 : index
    %c224_500 = arith.constant 224 : index
    %339 = vector.load %arg12[%c7_499, %c224_500] : memref<9x288xf32, #tpu.memory_space<vmem>>, vector<1x32xf32>
    tpu.vector_store %arg12[%c7_499, %c224_500], %338 {strides = array<i32>} : memref<9x288xf32, #tpu.memory_space<vmem>>, vector<1x32xf32>,
    %340 = vector.extract_strided_slice %197 {offsets = [46, 0], sizes = [1, 32], strides = [1, 1]} : vector<49x32xf32> to vector<1x32xf32>
    %c7_501 = arith.constant 7 : index
    %c256_502 = arith.constant 256 : index
    %341 = vector.load %arg12[%c7_501, %c256_502] : memref<9x288xf32, #tpu.memory_space<vmem>>, vector<1x32xf32>
    tpu.vector_store %arg12[%c7_501, %c256_502], %340 {strides = array<i32>} : memref<9x288xf32, #tpu.memory_space<vmem>>, vector<1x32xf32>,
    %342 = vector.extract_strided_slice %197 {offsets = [32, 0], sizes = [1, 32], strides = [1, 1]} : vector<49x32xf32> to vector<1x32xf32>
    %c8_503 = arith.constant 8 : index
    %c0_504 = arith.constant 0 : index
    %343 = vector.load %arg12[%c8_503, %c0_504] : memref<9x288xf32, #tpu.memory_space<vmem>>, vector<1x32xf32>
    tpu.vector_store %arg12[%c8_503, %c0_504], %342 {strides = array<i32>} : memref<9x288xf32, #tpu.memory_space<vmem>>, vector<1x32xf32>,
    %344 = vector.extract_strided_slice %197 {offsets = [33, 0], sizes = [1, 32], strides = [1, 1]} : vector<49x32xf32> to vector<1x32xf32>
    %c8_505 = arith.constant 8 : index
    %c32_506 = arith.constant 32 : index
    %345 = vector.load %arg12[%c8_505, %c32_506] : memref<9x288xf32, #tpu.memory_space<vmem>>, vector<1x32xf32>
    tpu.vector_store %arg12[%c8_505, %c32_506], %344 {strides = array<i32>} : memref<9x288xf32, #tpu.memory_space<vmem>>, vector<1x32xf32>,
    %346 = vector.extract_strided_slice %197 {offsets = [34, 0], sizes = [1, 32], strides = [1, 1]} : vector<49x32xf32> to vector<1x32xf32>
    %c8_507 = arith.constant 8 : index
    %c64_508 = arith.constant 64 : index
    %347 = vector.load %arg12[%c8_507, %c64_508] : memref<9x288xf32, #tpu.memory_space<vmem>>, vector<1x32xf32>
    tpu.vector_store %arg12[%c8_507, %c64_508], %346 {strides = array<i32>} : memref<9x288xf32, #tpu.memory_space<vmem>>, vector<1x32xf32>,
    %348 = vector.extract_strided_slice %197 {offsets = [39, 0], sizes = [1, 32], strides = [1, 1]} : vector<49x32xf32> to vector<1x32xf32>
    %c8_509 = arith.constant 8 : index
    %c96_510 = arith.constant 96 : index
    %349 = vector.load %arg12[%c8_509, %c96_510] : memref<9x288xf32, #tpu.memory_space<vmem>>, vector<1x32xf32>
    tpu.vector_store %arg12[%c8_509, %c96_510], %348 {strides = array<i32>} : memref<9x288xf32, #tpu.memory_space<vmem>>, vector<1x32xf32>,
    %350 = vector.extract_strided_slice %197 {offsets = [40, 0], sizes = [1, 32], strides = [1, 1]} : vector<49x32xf32> to vector<1x32xf32>
    %c8_511 = arith.constant 8 : index
    %c128_512 = arith.constant 128 : index
    %351 = vector.load %arg12[%c8_511, %c128_512] : memref<9x288xf32, #tpu.memory_space<vmem>>, vector<1x32xf32>
    tpu.vector_store %arg12[%c8_511, %c128_512], %350 {strides = array<i32>} : memref<9x288xf32, #tpu.memory_space<vmem>>, vector<1x32xf32>,
    %352 = vector.extract_strided_slice %197 {offsets = [41, 0], sizes = [1, 32], strides = [1, 1]} : vector<49x32xf32> to vector<1x32xf32>
    %c8_513 = arith.constant 8 : index
    %c160_514 = arith.constant 160 : index
    %353 = vector.load %arg12[%c8_513, %c160_514] : memref<9x288xf32, #tpu.memory_space<vmem>>, vector<1x32xf32>
    tpu.vector_store %arg12[%c8_513, %c160_514], %352 {strides = array<i32>} : memref<9x288xf32, #tpu.memory_space<vmem>>, vector<1x32xf32>,
    %354 = vector.extract_strided_slice %197 {offsets = [46, 0], sizes = [1, 32], strides = [1, 1]} : vector<49x32xf32> to vector<1x32xf32>
    %c8_515 = arith.constant 8 : index
    %c192_516 = arith.constant 192 : index
    %355 = vector.load %arg12[%c8_515, %c192_516] : memref<9x288xf32, #tpu.memory_space<vmem>>, vector<1x32xf32>
    tpu.vector_store %arg12[%c8_515, %c192_516], %354 {strides = array<i32>} : memref<9x288xf32, #tpu.memory_space<vmem>>, vector<1x32xf32>,
    %356 = vector.extract_strided_slice %197 {offsets = [47, 0], sizes = [1, 32], strides = [1, 1]} : vector<49x32xf32> to vector<1x32xf32>
    %c8_517 = arith.constant 8 : index
    %c224_518 = arith.constant 224 : index
    %357 = vector.load %arg12[%c8_517, %c224_518] : memref<9x288xf32, #tpu.memory_space<vmem>>, vector<1x32xf32>
    tpu.vector_store %arg12[%c8_517, %c224_518], %356 {strides = array<i32>} : memref<9x288xf32, #tpu.memory_space<vmem>>, vector<1x32xf32>,
    %358 = vector.extract_strided_slice %197 {offsets = [48, 0], sizes = [1, 32], strides = [1, 1]} : vector<49x32xf32> to vector<1x32xf32>
    %c8_519 = arith.constant 8 : index
    %c256_520 = arith.constant 256 : index
    %359 = vector.load %arg12[%c8_519, %c256_520] : memref<9x288xf32, #tpu.memory_space<vmem>>, vector<1x32xf32>
    tpu.vector_store %arg12[%c8_519, %c256_520], %358 {strides = array<i32>} : memref<9x288xf32, #tpu.memory_space<vmem>>, vector<1x32xf32>,
    %c0_521 = arith.constant 0 : index
    %c0_522 = arith.constant 0 : index
    %360 = vector.load %arg12[%c0_521, %c0_522] : memref<9x288xf32, #tpu.memory_space<vmem>>, vector<9x288xf32>
    %361 = arith.truncf %360 : vector<9x288xf32> to vector<9x288xbf16>
    %c0_523 = arith.constant 0 : index
    %c0_524 = arith.constant 0 : index
    %362 = vector.load %arg4[%c0_523, %c0_524] : memref<288x32xbf16, #tpu.memory_space<vmem>>, vector<288x32xbf16>
    %cst_525 = arith.constant dense<0.000000e+00> : vector<9x32xf32>
    %363 = tpu.matmul %361, %362, %cst_525 {dimension_numbers = #tpu.dot_dimension_numbers<[1], [0], [0], [1], [0, 0, 1, 1], [], []>} : vector<9x288xbf16>, vector<288x32xbf16>, vector<9x32xf32> -> vector<9x32xf32>
    %c0_526 = arith.constant 0 : index
    %c0_527 = arith.constant 0 : index
    %364 = vector.load %arg5[%c0_526, %c0_527] : memref<1x32xf32, #tpu.memory_space<vmem>>, vector<1x32xf32>
    %365 = vector.broadcast %364 : vector<1x32xf32> to vector<9x32xf32>
    %366 = arith.addf %363, %365 : vector<9x32xf32>
    %cst_528 = arith.constant 0.000000e+00 : f32
    %367 = vector.broadcast %cst_528 : f32 to vector<9x32xf32>
    %368 = arith.maximumf %366, %367 : vector<9x32xf32>
    %369 = vector.extract_strided_slice %368 {offsets = [0, 0], sizes = [1, 32], strides = [1, 1]} : vector<9x32xf32> to vector<1x32xf32>
    %c0_529 = arith.constant 0 : index
    %c0_530 = arith.constant 0 : index
    %370 = vector.load %arg13[%c0_529, %c0_530] : memref<1x288xf32, #tpu.memory_space<vmem>>, vector<1x32xf32>
    tpu.vector_store %arg13[%c0_529, %c0_530], %369 {strides = array<i32>} : memref<1x288xf32, #tpu.memory_space<vmem>>, vector<1x32xf32>,
    %371 = vector.extract_strided_slice %368 {offsets = [1, 0], sizes = [1, 32], strides = [1, 1]} : vector<9x32xf32> to vector<1x32xf32>
    %c0_531 = arith.constant 0 : index
    %c32_532 = arith.constant 32 : index
    %372 = vector.load %arg13[%c0_531, %c32_532] : memref<1x288xf32, #tpu.memory_space<vmem>>, vector<1x32xf32>
    tpu.vector_store %arg13[%c0_531, %c32_532], %371 {strides = array<i32>} : memref<1x288xf32, #tpu.memory_space<vmem>>, vector<1x32xf32>,
    %373 = vector.extract_strided_slice %368 {offsets = [2, 0], sizes = [1, 32], strides = [1, 1]} : vector<9x32xf32> to vector<1x32xf32>
    %c0_533 = arith.constant 0 : index
    %c64_534 = arith.constant 64 : index
    %374 = vector.load %arg13[%c0_533, %c64_534] : memref<1x288xf32, #tpu.memory_space<vmem>>, vector<1x32xf32>
    tpu.vector_store %arg13[%c0_533, %c64_534], %373 {strides = array<i32>} : memref<1x288xf32, #tpu.memory_space<vmem>>, vector<1x32xf32>,
    %375 = vector.extract_strided_slice %368 {offsets = [3, 0], sizes = [1, 32], strides = [1, 1]} : vector<9x32xf32> to vector<1x32xf32>
    %c0_535 = arith.constant 0 : index
    %c96_536 = arith.constant 96 : index
    %376 = vector.load %arg13[%c0_535, %c96_536] : memref<1x288xf32, #tpu.memory_space<vmem>>, vector<1x32xf32>
    tpu.vector_store %arg13[%c0_535, %c96_536], %375 {strides = array<i32>} : memref<1x288xf32, #tpu.memory_space<vmem>>, vector<1x32xf32>,
    %377 = vector.extract_strided_slice %368 {offsets = [4, 0], sizes = [1, 32], strides = [1, 1]} : vector<9x32xf32> to vector<1x32xf32>
    %c0_537 = arith.constant 0 : index
    %c128_538 = arith.constant 128 : index
    %378 = vector.load %arg13[%c0_537, %c128_538] : memref<1x288xf32, #tpu.memory_space<vmem>>, vector<1x32xf32>
    tpu.vector_store %arg13[%c0_537, %c128_538], %377 {strides = array<i32>} : memref<1x288xf32, #tpu.memory_space<vmem>>, vector<1x32xf32>,
    %379 = vector.extract_strided_slice %368 {offsets = [5, 0], sizes = [1, 32], strides = [1, 1]} : vector<9x32xf32> to vector<1x32xf32>
    %c0_539 = arith.constant 0 : index
    %c160_540 = arith.constant 160 : index
    %380 = vector.load %arg13[%c0_539, %c160_540] : memref<1x288xf32, #tpu.memory_space<vmem>>, vector<1x32xf32>
    tpu.vector_store %arg13[%c0_539, %c160_540], %379 {strides = array<i32>} : memref<1x288xf32, #tpu.memory_space<vmem>>, vector<1x32xf32>,
    %381 = vector.extract_strided_slice %368 {offsets = [6, 0], sizes = [1, 32], strides = [1, 1]} : vector<9x32xf32> to vector<1x32xf32>
    %c0_541 = arith.constant 0 : index
    %c192_542 = arith.constant 192 : index
    %382 = vector.load %arg13[%c0_541, %c192_542] : memref<1x288xf32, #tpu.memory_space<vmem>>, vector<1x32xf32>
    tpu.vector_store %arg13[%c0_541, %c192_542], %381 {strides = array<i32>} : memref<1x288xf32, #tpu.memory_space<vmem>>, vector<1x32xf32>,
    %383 = vector.extract_strided_slice %368 {offsets = [7, 0], sizes = [1, 32], strides = [1, 1]} : vector<9x32xf32> to vector<1x32xf32>
    %c0_543 = arith.constant 0 : index
    %c224_544 = arith.constant 224 : index
    %384 = vector.load %arg13[%c0_543, %c224_544] : memref<1x288xf32, #tpu.memory_space<vmem>>, vector<1x32xf32>
    tpu.vector_store %arg13[%c0_543, %c224_544], %383 {strides = array<i32>} : memref<1x288xf32, #tpu.memory_space<vmem>>, vector<1x32xf32>,
    %385 = vector.extract_strided_slice %368 {offsets = [8, 0], sizes = [1, 32], strides = [1, 1]} : vector<9x32xf32> to vector<1x32xf32>
    %c0_545 = arith.constant 0 : index
    %c256_546 = arith.constant 256 : index
    %386 = vector.load %arg13[%c0_545, %c256_546] : memref<1x288xf32, #tpu.memory_space<vmem>>, vector<1x32xf32>
    tpu.vector_store %arg13[%c0_545, %c256_546], %385 {strides = array<i32>} : memref<1x288xf32, #tpu.memory_space<vmem>>, vector<1x32xf32>,
    %c0_547 = arith.constant 0 : index
    %c0_548 = arith.constant 0 : index
    %387 = vector.load %arg13[%c0_547, %c0_548] : memref<1x288xf32, #tpu.memory_space<vmem>>, vector<1x288xf32>
    %388 = arith.truncf %387 : vector<1x288xf32> to vector<1x288xbf16>
    %c0_549 = arith.constant 0 : index
    %c0_550 = arith.constant 0 : index
    %389 = vector.load %arg6[%c0_549, %c0_550] : memref<288x32xbf16, #tpu.memory_space<vmem>>, vector<288x32xbf16>
    %cst_551 = arith.constant dense<0.000000e+00> : vector<1x32xf32>
    %390 = tpu.matmul %388, %389, %cst_551 {dimension_numbers = #tpu.dot_dimension_numbers<[1], [0], [0], [1], [0, 0, 1, 1], [], []>} : vector<1x288xbf16>, vector<288x32xbf16>, vector<1x32xf32> -> vector<1x32xf32>
    %c0_552 = arith.constant 0 : index
    %c0_553 = arith.constant 0 : index
    %391 = vector.load %arg7[%c0_552, %c0_553] : memref<1x32xf32, #tpu.memory_space<vmem>>, vector<1x32xf32>
    %392 = arith.addf %390, %391 : vector<1x32xf32>
    %cst_554 = arith.constant dense<0.000000e+00> : vector<1xf32>
    %393 = vector.multi_reduction <add>, %392, %cst_554 [1] : vector<1x32xf32> to vector<1xf32>
    %394 = vector.shape_cast %393 : vector<1xf32> to vector<1x1xf32>
    %cst_555 = arith.constant 3.200000e+01 : f32
    %395 = vector.broadcast %cst_555 : f32 to vector<1x1xf32>
    %396 = arith.divf %394, %395 : vector<1x1xf32>
    %397 = vector.broadcast %396 : vector<1x1xf32> to vector<1x32xf32>
    %398 = arith.subf %392, %397 : vector<1x32xf32>
    %399 = arith.mulf %398, %398 : vector<1x32xf32>
    %cst_556 = arith.constant dense<0.000000e+00> : vector<1xf32>
    %400 = vector.multi_reduction <add>, %399, %cst_556 [1] : vector<1x32xf32> to vector<1xf32>
    %401 = vector.shape_cast %400 : vector<1xf32> to vector<1x1xf32>
    %cst_557 = arith.constant 3.200000e+01 : f32
    %402 = vector.broadcast %cst_557 : f32 to vector<1x1xf32>
    %403 = arith.divf %401, %402 : vector<1x1xf32>
    %404 = vector.broadcast %396 : vector<1x1xf32> to vector<1x32xf32>
    %405 = arith.subf %392, %404 : vector<1x32xf32>
    %cst_558 = arith.constant 9.99999974E-6 : f32
    %406 = vector.broadcast %cst_558 : f32 to vector<1x1xf32>
    %407 = arith.addf %403, %406 : vector<1x1xf32>
    %408 = math.rsqrt %407 : vector<1x1xf32>
    %409 = vector.broadcast %408 : vector<1x1xf32> to vector<1x32xf32>
    %410 = arith.mulf %405, %409 : vector<1x32xf32>
    %c0_559 = arith.constant 0 : index
    %c0_560 = arith.constant 0 : index
    %411 = vector.load %arg8[%c0_559, %c0_560] : memref<1x32xf32, #tpu.memory_space<vmem>>, vector<1x32xf32>
    %412 = arith.mulf %410, %411 : vector<1x32xf32>
    %c0_561 = arith.constant 0 : index
    %c0_562 = arith.constant 0 : index
    %413 = vector.load %arg9[%c0_561, %c0_562] : memref<1x32xf32, #tpu.memory_space<vmem>>, vector<1x32xf32>
    %414 = arith.addf %412, %413 : vector<1x32xf32>
    %415 = math.tanh %414 : vector<1x32xf32>
    %416 = vector.shape_cast %415 : vector<1x32xf32> to vector<1x1x32xf32>
    %c0_563 = arith.constant 0 : index
    %c0_564 = arith.constant 0 : index
    %c0_565 = arith.constant 0 : index
    %417 = vector.load %arg10[%c0_563, %c0_564, %c0_565] : memref<1x1x32xf32, #tpu.memory_space<vmem>>, vector<1x1x32xf32>
    tpu.vector_store %arg10[%c0_563, %c0_564, %c0_565], %416 {strides = array<i32>} : memref<1x1x32xf32, #tpu.memory_space<vmem>>, vector<1x1x32xf32>,
    return
  }
  func.func @transform_0(%arg0: i32) -> (i32, i32, i32, i32) {
    %c0_i32 = arith.constant 0 : i32
    %c0_i32_0 = arith.constant 0 : i32
    %c0_i32_1 = arith.constant 0 : i32
    %c0_i32_2 = arith.constant 0 : i32
    return %arg0, %c0_i32, %c0_i32_0, %c0_i32_1 : i32, i32, i32, i32
  }
  func.func @transform_1(%arg0: i32) -> (i32, i32) {
    %c0_i32 = arith.constant 0 : i32
    %c0_i32_0 = arith.constant 0 : i32
    %c0_i32_1 = arith.constant 0 : i32
    return %c0_i32, %c0_i32_0 : i32, i32
  }
  func.func @transform_2(%arg0: i32) -> (i32, i32) {
    %c0_i32 = arith.constant 0 : i32
    %c0_i32_0 = arith.constant 0 : i32
    %c0_i32_1 = arith.constant 0 : i32
    return %c0_i32, %c0_i32_0 : i32, i32
  }
  func.func @transform_3(%arg0: i32) -> (i32, i32) {
    %c0_i32 = arith.constant 0 : i32
    %c0_i32_0 = arith.constant 0 : i32
    %c0_i32_1 = arith.constant 0 : i32
    return %c0_i32, %c0_i32_0 : i32, i32
  }
  func.func @transform_4(%arg0: i32) -> (i32, i32) {
    %c0_i32 = arith.constant 0 : i32
    %c0_i32_0 = arith.constant 0 : i32
    %c0_i32_1 = arith.constant 0 : i32
    return %c0_i32, %c0_i32_0 : i32, i32
  }
  func.func @transform_5(%arg0: i32) -> (i32, i32) {
    %c0_i32 = arith.constant 0 : i32
    %c0_i32_0 = arith.constant 0 : i32
    %c0_i32_1 = arith.constant 0 : i32
    return %c0_i32, %c0_i32_0 : i32, i32
  }
  func.func @transform_6(%arg0: i32) -> (i32, i32) {
    %c0_i32 = arith.constant 0 : i32
    %c0_i32_0 = arith.constant 0 : i32
    %c0_i32_1 = arith.constant 0 : i32
    return %c0_i32, %c0_i32_0 : i32, i32
  }
  func.func @transform_7(%arg0: i32) -> (i32, i32) {
    %c0_i32 = arith.constant 0 : i32
    %c0_i32_0 = arith.constant 0 : i32
    %c0_i32_1 = arith.constant 0 : i32
    return %c0_i32, %c0_i32_0 : i32, i32
  }
  func.func @transform_8(%arg0: i32) -> (i32, i32) {
    %c0_i32 = arith.constant 0 : i32
    %c0_i32_0 = arith.constant 0 : i32
    %c0_i32_1 = arith.constant 0 : i32
    return %c0_i32, %c0_i32_0 : i32, i32
  }
  func.func @transform_9(%arg0: i32) -> (i32, i32, i32) {
    %c0_i32 = arith.constant 0 : i32
    %c0_i32_0 = arith.constant 0 : i32
    %c0_i32_1 = arith.constant 0 : i32
    return %arg0, %c0_i32, %c0_i32_0 : i32, i32, i32
  }
}

</mosaic_0001>

<bundles_post_ra>
// kernel: pixel_encoder_forward.1
= control target key start
LH: loop header
LB: loop body
LE: loop exit
PB: predicated region body
PF: predicated region fallthrough
CT: control target
= control target key end

     0   :  { %14 = vsyncpa [#allocation6], 0  ;;  %s2860_s0 = inlined_call_operand.vmem [shape: f32[2,8,8,16], index: 0, kind: input, shape index: {}]   ;;  %s2861_s1 = inlined_call_operand.vmem [shape: bf16[36,32], index: 1, kind: input, shape index: {}]   ;;  %s2862_s2 = inlined_call_operand.vmem [shape: f32[1,32], index: 2, kind: input, shape index: {}]   ;;  %s2863_s3 = inlined_call_operand.vmem [shape: bf16[288,32], index: 3, kind: input, shape index: {}]   ;;  %s2864_s4 = inlined_call_operand.vmem [shape: f32[1,32], index: 4, kind: input, shape index: {}]   ;;  %s2865_s5 = inlined_call_operand.vmem [shape: bf16[288,32], index: 5, kind: input, shape index: {}]   ;;  %s2866_s6 = inlined_call_operand.vmem [shape: f32[1,32], index: 6, kind: input, shape index: {}]   ;;  %s2867_s7 = inlined_call_operand.vmem [shape: f32[1,32], index: 7, kind: input, shape index: {}]   ;;  %s2868_s8 = inlined_call_operand.vmem [shape: f32[1,32], index: 8, kind: input, shape index: {}]   ;;  %s2869_s9 = inlined_call_operand.hbm [shape: f32[2,1,32], index: 9, kind: output, shape index: {}]  }
   0x1   :  { %16 = vsyncpa [#allocation6 + $0x1], 0  ;;  %s2188_s30 = smov 0   ;;  %s2190_s10 = smov 0  }
   0x2   :  { %s2192_s11 = smov 0   ;;  %s2194_s12 = smov 0  }
   0x3 LB: > { %s2209_s13 = sadd.s32 4294967295, %s2125_s12   ;;  %s1769_s14 = sadd.s32 4294967294, %s2125_s12   ;;  %s2125_s12 = sphi %s2194_s12, %s2880_s12   ;;  %s2121_s11 = sphi %s2192_s11, %s2879_s11   ;;  %s2117_s10 = sphi %s2190_s10, %s2878_s10   ;;  %s2113_s30 = sphi %s2188_s30, %s2877_s30  }
   0x4   : > { %s2213_s15 = sadd.s32 1, %s2125_s12   ;;  %s223_s16 = sadd.s32 1, %s2121_s11 }
   0x5   : > { %s220_s17 = ssub.s32 %s2125_s12, %s2213_s15  ;;  %p233_p0 = scmp.ne.s32.totalorder %s2121_s11, %s2117_s10 }
   0x6   : > { %p221_p1 = scmp.eq.s32.totalorder %s220_s17, 0  ;;  %p234_p2 = scmp.eq.s32.totalorder %s2209_s13, 1 }
   0x7   : > { %p239_p3 = scmp.ne.s32.totalorder %s2117_s10, %s2113_s30  ;;  %p240_p4 = scmp.eq.s32.totalorder %s1769_s14, 1 }
   0x8   : > { %s2224_s18 = scalar_select %p221_p1, %s2121_s11, %s223_s16  }
   0x9   : > { %p2226_p5 = por %p234_p2, %p233_p0  ;;  %p2230_p6 = por %p240_p4, %p239_p3 }
   0xa   : > { %p1772_p7 = scmp.ge.s32.totalorder %s2125_s12, 1  ;;  %p290_p8 = scmp.lt.s32.totalorder %s2125_s12, 3 }
   0xc   : > { %p291_p9 = pnand %p1772_p7, %p290_p8 }
   0xd   : > { %p325_p10 = scmp.lt.s32.totalorder (!%p291_p9), %s2209_s13, 1  ;;  %s2127_s26 = smov (!%p291_p9), 8   ;;  %vm332_vm0 = vcmask (!%p291_p9), 30720   ;;  %vm335_vm1 = vcmask (!%p291_p9), 63520   ;;  %v2020_v38 = vld [vmem:[%s2861_s1] sm:$0xff] (!%p291_p9)   ;;  %v2021_v43 = vld [vmem:[%s2861_s1 + $0x8] sm:$0xff] (!%p291_p9)  }
   0xe   : > { %294 = sbr.rel (%p291_p9) target bundleno = 1584 (0x630), region = 56  ;;  %s2128_s27 = smov (!%p291_p9), 4   ;;  %1940 = vmatprep.subr.bf16.mxu0 (!%p291_p9), %v2020_v38  ;;  %vm720_vm2 = vcmask (!%p291_p9), 1041408   ;;  %v2022_v48 = vld [vmem:[%s2861_s1 + $0x10] ss:$0 sps:$4 sm:$0x33] (!%p291_p9)  }
   0xf   : > { %s2129_s28 = smov (!%p291_p9), 12   ;;  %s2130_s29 = smov (!%p291_p9), 24   ;;  %1941 = vmatpush3.bf16.msra.mxu0 (!%p291_p9), %v2020_v38  ;;  %v722_v51 = vsel (!%p291_p9), %vm720_vm2, %v2022_v48, 0  ;;  %vm342_vm3 = vcmask (!%p291_p9), 96320   ;;  %vm349_vm4 = vcmask (!%p291_p9), 129120   ;;  %vm356_vm5 = vcmask (!%p291_p9), 161920  }
  0x10   : > { %1942 = vmatprep.subr.bf16.mxu0 (!%p291_p9), %v2021_v43  ;;  %vm363_vm6 = vcmask (!%p291_p9), 194720   ;;  %vm371_vm7 = vcmask (!%p291_p9), 227520   ;;  %vm378_vm8 = vcmask (!%p291_p9), 260320   ;;  %vm385_vm9 = vcmask (!%p291_p9), 293120   ;;  %s323_s16 = sand.u32 (!%p291_p9), 1, %s2117_s10   ;;  %s1879_s17 = sshll.u32 (!%p291_p9), %s2209_s13, 4 }
  0x11   : > { %vm707_vm10 = vcmask (!%p291_p9), 293888   ;;  %vm795_vm11 = vcmask (!%p291_p9), 253952   ;;  %vm802_vm12 = vcmask (!%p291_p9), 516352   ;;  %vm808_vm13 = vcmask (!%p291_p9), 778752  }
  0x12   : > { %vm814_vm14 = vcmask (!%p291_p9), 1041152   ;;  %vm2135_vm15 = vmmov (!%p291_p9), 0  }
  0x13   : > { %1943 = vmatpush3.bf16.msra.mxu0 (!%p291_p9), %v2021_v43 }
  0x14   : > { %1970 = vmatprep.subr.msk.bf16.mxu0 (!%p291_p9), %vm720_vm2, %v2022_v48 }
  0x15   : > { %s326_s21 = scalar_select %p325_p10, %s2209_s13, 1 }
  0x16   : > { %s2137_s13 = smov [#allocation5]  }
  0x17   : > { %s1882_s22 = sshll.u32 %s326_s21, 6  ;;  %1945 = vmatpush3.bf16.msra.mxu0 %v722_v51  ;;  %s324_s21 = scalar_lea.vmem [#allocation5], %s323_s16 }
  0x18   : > { %s2241_s25 = scalar_lea.vmem %s2860_s0, %s1882_s22  ;;  %s2131_s22 = smov 32  }
  0x19   : > { %v1789_v0 = vld [vmem:[%s2241_s25 + $0x11] sm:$0x7f]  ;;  %v337_v1 = vld [vmem:[%s2241_s25 + $0x1] sm:$0x7f]  ;;  %v1780_v3 = vld [vmem:[%s2241_s25 + $0x9] sm:$0x7f] }
  0x1a   : > { %440 = vrot.lane.b32.xlu1 %v1789_v0, %s2127_s26  ;;  %339 = vrot.lane.b32.xlu0 %v337_v1, %s2127_s26  ;;  %v344_v2 = vld [vmem:[%s2241_s25] sm:$0x7f]  ;;  %v1790_v4 = vld [vmem:[%s2241_s25 + $0x10] sm:$0x7f]  ;;  %s1714_s23 = sshll.u32 %s324_s21, 4  ;;  %s2819_s23 = int_to_ptr.vmem [resolvable:$true] %s1714_s23 }
  0x1b   : > { %v1781_v5 = vld [vmem:[%s2241_s25 + $0x8] sm:$0x7f]  ;;  %v1807_v6 = vld [vmem:[%s2241_s25 + $0x21] sm:$0x7f]  ;;  %v1798_v7 = vld [vmem:[%s2241_s25 + $0x19] sm:$0x7f] }
  0x1c   : > { %v1782_v8 = vld [vmem:[%s2241_s25 + $0x8] sm:$0x7f]  ;;  %v351_v9 = vld [vmem:[%s2241_s25] sm:$0x7f]  ;;  %v1799_v10 = vld [vmem:[%s2241_s25 + $0x18] sm:$0x7f] }
  0x1d   : > { %v1791_v11 = vld [vmem:[%s2241_s25 + $0x10] sm:$0x7f]  ;;  %v331_v14 = vld [vmem:[%s2241_s25] sm:$0x7f]  ;;  %v1778_v16 = vld [vmem:[%s2241_s25 + $0x8] sm:$0x7f] }
  0x1e   : > { %346 = vrot.lane.b32.xlu1 %v344_v2, %s2128_s27  ;;  %393 = vrot.lane.b32.xlu0 %v1780_v3, %s2127_s26  ;;  %v1787_v12 = vld [vmem:[%s2241_s25 + $0x10] sm:$0x7f]  ;;  %333 = vst.msk [vmem:[#allocation2] sm:$0x7f] %vm332_vm0, %v331_v14  ;;  %v334_v15 = vld [vmem:[%s2241_s25] sm:$0x7f] }
  0x1f   : > { %v1788_v13 = vld [vmem:[%s2241_s25 + $0x10] sm:$0x7f]  ;;  %435 = vst.msk [vmem:[#allocation2 + $0xe] sm:$0x7f] %vm332_vm0, %v1787_v12  ;;  %v1779_v17 = vld [vmem:[%s2241_s25 + $0x8] sm:$0x7f] }
  0x20   : > { %v358_v18 = vld [vmem:[%s2241_s25 + $0x1] sm:$0x7f]  ;;  %437 = vst.msk [vmem:[#allocation2 + $0xe] sm:$0x7f] %vm335_vm1, %v1788_v13  ;;  %336 = vst.msk [vmem:[#allocation2] sm:$0x7f] %vm335_vm1, %v334_v15 }
  0x21   : > { %v1808_v19 = vld [vmem:[%s2241_s25 + $0x20] sm:$0x7f]  ;;  %388 = vst.msk [vmem:[#allocation2 + $0x7] sm:$0x7f] %vm332_vm0, %v1778_v16  ;;  %v1796_v22 = vld [vmem:[%s2241_s25 + $0x18] sm:$0x7f] }
  0x22   : > { %446 = vrot.lane.b32.xlu1 %v1790_v4, %s2128_s27  ;;  %399 = vrot.lane.b32.xlu0 %v1781_v5, %s2128_s27  ;;  %v1805_v20 = vld [vmem:[%s2241_s25 + $0x20] sm:$0x7f]  ;;  %390 = vst.msk [vmem:[#allocation2 + $0x7] sm:$0x7f] %vm335_vm1, %v1779_v17  ;;  %v1797_v23 = vld [vmem:[%s2241_s25 + $0x18] sm:$0x7f] }
  0x23   : > { %v1806_v21 = vld [vmem:[%s2241_s25 + $0x20] sm:$0x7f]  ;;  %529 = vst.msk [vmem:[#allocation2 + $0x1c] sm:$0x7f] %vm332_vm0, %v1805_v20  ;;  %482 = vst.msk [vmem:[#allocation2 + $0x15] sm:$0x7f] %vm332_vm0, %v1796_v22 }
  0x24   : > { %531 = vst.msk [vmem:[#allocation2 + $0x1c] sm:$0x7f] %vm335_vm1, %v1806_v21  ;;  %484 = vst.msk [vmem:[#allocation2 + $0x15] sm:$0x7f] %vm335_vm1, %v1797_v23  ;;  %v1792_v24 = vld [vmem:[%s2241_s25 + $0x11] sm:$0x7f] }
  0x25   : > { %v1783_v25 = vld [vmem:[%s2241_s25 + $0x9] sm:$0x7f]  ;;  %v1809_v26 = vld [vmem:[%s2241_s25 + $0x20] sm:$0x7f]  ;;  %v1800_v27 = vld [vmem:[%s2241_s25 + $0x18] sm:$0x7f] }
  0x26   : > { %534 = vrot.lane.b32.xlu1 %v1807_v6, %s2127_s26  ;;  %487 = vrot.lane.b32.xlu0 %v1798_v7, %s2127_s26  ;;  %v1784_v28 = vld [vmem:[%s2241_s25 + $0x10] sm:$0x7f]  ;;  %v1775_v29 = vld [vmem:[%s2241_s25 + $0x8] sm:$0x7f] }
  0x27   : > { %v1801_v30 = vld [vmem:[%s2241_s25 + $0x19] sm:$0x7f]  ;;  %v1776_v32 = vld [vmem:[%s2241_s25 + $0x8] sm:$0x7f]  ;;  %v1810_v33 = vld [vmem:[%s2241_s25 + $0x21] sm:$0x7f] }
  0x28   : > { %v1793_v31 = vld [vmem:[%s2241_s25 + $0x18] sm:$0x7f]  ;;  %v1785_v35 = vld [vmem:[%s2241_s25 + $0x10] sm:$0x7f]  ;;  %v1811_v36 = vld [vmem:[%s2241_s25 + $0x28] sm:$0x7f] }
  0x29   : > { %v1794_v34 = vld [vmem:[%s2241_s25 + $0x18] sm:$0x7f]  ;;  %v1802_v37 = vld [vmem:[%s2241_s25 + $0x20] sm:$0x7f]  ;;  %v1814_v39 = vld [vmem:[%s2241_s25 + $0x28] sm:$0x7f] }
  0x2a   : > { %405 = vrot.lane.b32.xlu1 %v1782_v8, %s2128_s27  ;;  %353 = vrot.lane.b32.xlu0 %v351_v9, %s2128_s27  ;;  %v1815_v40 = vld [vmem:[%s2241_s25 + $0x28] sm:$0x7f]  ;;  %576 = vst.msk [vmem:[#allocation2 + $0x23] sm:$0x7f] %vm332_vm0, %v1814_v39  ;;  %v1786_v41 = vld [vmem:[%s2241_s25 + $0x11] sm:$0x7f] }
  0x2b   : > { %v1777_v42 = vld [vmem:[%s2241_s25 + $0x9] sm:$0x7f]  ;;  %578 = vst.msk [vmem:[#allocation2 + $0x23] sm:$0x7f] %vm335_vm1, %v1815_v40  ;;  %v1803_v44 = vld [vmem:[%s2241_s25 + $0x20] sm:$0x7f] }
  0x2c   : > { %v1795_v45 = vld [vmem:[%s2241_s25 + $0x19] sm:$0x7f]  ;;  %v1823_v46 = vld [vmem:[%s2241_s25 + $0x30] sm:$0x7f]  ;;  %v1804_v49 = vld [vmem:[%s2241_s25 + $0x21] sm:$0x7f] }
  0x2d   : > { %v1824_v47 = vld [vmem:[%s2241_s25 + $0x30] sm:$0x7f]  ;;  %623 = vst.msk [vmem:[#allocation2 + $0x2a] sm:$0x7f] %vm332_vm0, %v1823_v46  ;;  %v1812_v50 = vld [vmem:[%s2241_s25 + $0x28] sm:$0x7f] }
  0x2e   : > { %493 = vrot.lane.b32.xlu1 %v1799_v10, %s2128_s27  ;;  %452 = vrot.lane.b32.xlu0 %v1791_v11, %s2128_s27  ;;  %625 = vst.msk [vmem:[#allocation2 + $0x2a] sm:$0x7f] %vm335_vm1, %v1824_v47  ;;  %v1816_v52 = vld [vmem:[%s2241_s25 + $0x29] sm:$0x7f]  ;;  %v1825_v55 = vld [vmem:[%s2241_s25 + $0x31] sm:$0x7f] }
  0x2f   : > { %v1813_v53 = vld [vmem:[%s2241_s25 + $0x29] sm:$0x7f]  ;;  %v1826_v57 = vld [vmem:[%s2241_s25 + $0x30] sm:$0x7f]  ;;  %v1829_v63 = vld [vmem:[%s2241_s25 + $0x38] sm:$0x7f] }
  0x30   : > { %v1817_v54 = vld [vmem:[%s2241_s25 + $0x28] sm:$0x7f]  ;;  %v1827_v59 = vld [vmem:[%s2241_s25 + $0x30] sm:$0x7f]  ;;  %v1830_v1 = vld [vmem:[%s2241_s25 + $0x38] sm:$0x7f] }
  0x31   : > { %v1818_v56 = vld [vmem:[%s2241_s25 + $0x28] sm:$0x7f]  ;;  %v1820_v60 = vld [vmem:[%s2241_s25 + $0x30] sm:$0x7f]  ;;  %v1831_v2 = vld [vmem:[%s2241_s25 + $0x39] sm:$0x7f] }
  0x32   : > { %360 = vrot.lane.b32.xlu1 %v358_v18, %s2129_s28  ;;  %540 = vrot.lane.b32.xlu0 %v1808_v19, %s2128_s27  ;;  %v1819_v58 = vld [vmem:[%s2241_s25 + $0x29] sm:$0x7f]  ;;  %v1828_v61 = vld [vmem:[%s2241_s25 + $0x31] sm:$0x7f]  ;;  %vm1254_vm0 = vcmask 261120  }
  0x33   : > { %v1821_v62 = vld [vmem:[%s2241_s25 + $0x30] sm:$0x7f] }
  0x34   : > { %v1822_v0 = vld [vmem:[%s2241_s25 + $0x31] sm:$0x7f]  ;;  %s1702_s25 = scalar_lea.sflag [#allocation6], %s323_s16 }
  0x36   : > { %458 = vrot.lane.b32.xlu1 %v1792_v24, %s2129_s28  ;;  %411 = vrot.lane.b32.xlu0 %v1783_v25, %s2129_s28 }
  0x3a   : > { %546 = vrot.lane.b32.xlu1 %v1809_v26, %s2128_s27  ;;  %499 = vrot.lane.b32.xlu0 %v1800_v27, %s2128_s27 }
  0x3e   : > { %418 = vrot.lane.b32.xlu1 %v1784_v28, %s2130_s29  ;;  %368 = vrot.lane.b32.xlu0 %v1775_v29, %s2130_s29 }
  0x42   : > { %505 = vrot.lane.b32.xlu1 %v1801_v30, %s2129_s28  ;;  %465 = vrot.lane.b32.xlu0 %v1793_v31, %s2130_s29 }
  0x46   : > { %375 = vrot.lane.b32.xlu1 %v1776_v32, %s2130_s29  ;;  %552 = vrot.lane.b32.xlu0 %v1810_v33, %s2129_s28 }
  0x4a   : > { %471 = vrot.lane.b32.xlu1 %v1794_v34, %s2130_s29  ;;  %424 = vrot.lane.b32.xlu0 %v1785_v35, %s2130_s29 }
  0x4e   : > { %559 = vrot.lane.b32.xlu1 %v1811_v36, %s2130_s29  ;;  %512 = vrot.lane.b32.xlu0 %v1802_v37, %s2130_s29 }
  0x52   : > { %430 = vrot.lane.b32.xlu1 %v1786_v41, %s2131_s22  ;;  %382 = vrot.lane.b32.xlu0 %v1777_v42, %s2131_s22 }
  0x56   : > { %518 = vrot.lane.b32.xlu1 %v1803_v44, %s2130_s29  ;;  %477 = vrot.lane.b32.xlu0 %v1795_v45, %s2131_s22 }
  0x5a   : > { %524 = vrot.lane.b32.xlu1 %v1804_v49, %s2131_s22  ;;  %565 = vrot.lane.b32.xlu0 %v1812_v50, %s2130_s29 }
  0x5e   : > { %581 = vrot.lane.b32.xlu1 %v1816_v52, %s2127_s26  ;;  %571 = vrot.lane.b32.xlu0 %v1813_v53, %s2131_s22 }
  0x62   : > { %587 = vrot.lane.b32.xlu1 %v1817_v54, %s2128_s27  ;;  %628 = vrot.lane.b32.xlu0 %v1825_v55, %s2127_s26  ;;  %s2063_s26 = scalar_lea.vmem %s2819_s23, 16 }
  0x63   : > { %p2064_p11 = scmp.ne.s32.totalorder %s2819_s23, %s2063_s26 }
  0x65   : > { %p2065_p12 = pnand %p2064_p11, %p2226_p5 }
  0x66   : > { %593 = vrot.lane.b32.xlu1 %v1818_v56, %s2128_s27  ;;  %634 = vrot.lane.b32.xlu0 %v1826_v57, %s2128_s27 }
  0x67   : > { %p2066_p13 = pneg %p2065_p12 }
  0x6a   : > { %599 = vrot.lane.b32.xlu1 %v1819_v58, %s2129_s28  ;;  %640 = vrot.lane.b32.xlu0 %v1827_v59, %s2128_s27  ;;  %s2132_s27 = smov 64  }
  0x6e   : > { %606 = vrot.lane.b32.xlu1 %v1820_v60, %s2130_s29  ;;  %646 = vrot.lane.b32.xlu0 %v1828_v61, %s2129_s28  ;;  %s2870_s28 = smov 96  }
  0x72   : > { %612 = vrot.lane.b32.xlu1 %v1821_v62, %s2130_s29  ;;  %653 = vrot.lane.b32.xlu0 %v1829_v63, %s2130_s29  ;;  %v2434_v63 = vld [vmem:[%s2862_s2] ss:$0 sm:$0xff] }
  0x76   : > { %618 = vrot.lane.b32.xlu1 %v1822_v0, %s2131_s22  ;;  %659 = vrot.lane.b32.xlu0 %v1830_v1, %s2130_s29  ;;  %s2067_s29 = sshll.u32 %s2137_s13, 4  ;;  %s2068_s29 = int_to_ptr.vmem [resolvable:$false] %s2067_s29 }
  0x77   : > { %s2069_s14 = scalar_lea.vmem %s2068_s29, 32  ;;  %p2070_p0 = scmp.lt.s32.totalorder %s2819_s23, %s2068_s29 }
  0x78   : > { %p2071_p1 = scmp.lt.s32.totalorder %s2069_s14, %s2063_s26 }
  0x7a   : > { %665 = vrot.lane.b32.xlu0 %v1831_v2, %s2131_s22  ;;  %p2072_p2 = por %p2071_p1, %p2070_p0 }
  0x7c   : > { %p2073_p3 = pnand %p2072_p2, %p2066_p13 }
  0x8c   : > { %v441_v3 = vpop.permute.xlu1 %440  ;;  %v340_v4 = vpop.permute.xlu0 %339 }
  0x8d   : > { %443 = vst.msk [vmem:[#allocation2 + $0xe] sm:$0x7f] %vm342_vm3, %v441_v3  ;;  %343 = vst.msk [vmem:[#allocation2] sm:$0x7f] %vm342_vm3, %v340_v4 }
  0x90   : > { %v347_v5 = vpop.permute.xlu1 %346  ;;  %v394_v6 = vpop.permute.xlu0 %393 }
  0x91   : > { %350 = vst.msk [vmem:[#allocation2] sm:$0x7f] %vm349_vm4, %v347_v5 }
  0x92   : > { %396 = vst.msk [vmem:[#allocation2 + $0x7] sm:$0x7f] %vm342_vm3, %v394_v6 }
  0x94   : > { %v447_v7 = vpop.permute.xlu1 %446  ;;  %v400_v8 = vpop.permute.xlu0 %399 }
  0x95   : > { %449 = vst.msk [vmem:[#allocation2 + $0xe] sm:$0x7f] %vm349_vm4, %v447_v7  ;;  %402 = vst.msk [vmem:[#allocation2 + $0x7] sm:$0x7f] %vm349_vm4, %v400_v8 }
  0x98   : > { %v535_v9 = vpop.permute.xlu1 %534  ;;  %v488_v10 = vpop.permute.xlu0 %487 }
  0x99   : > { %537 = vst.msk [vmem:[#allocation2 + $0x1c] sm:$0x7f] %vm342_vm3, %v535_v9  ;;  %490 = vst.msk [vmem:[#allocation2 + $0x15] sm:$0x7f] %vm342_vm3, %v488_v10 }
  0x9c   : > { %v406_v11 = vpop.permute.xlu1 %405  ;;  %v354_v12 = vpop.permute.xlu0 %353 }
  0x9d   : > { %408 = vst.msk [vmem:[#allocation2 + $0x7] sm:$0x7f] %vm356_vm5, %v406_v11  ;;  %357 = vst.msk [vmem:[#allocation2] sm:$0x7f] %vm356_vm5, %v354_v12 }
  0xa0   : > { %v494_v13 = vpop.permute.xlu1 %493  ;;  %v453_v14 = vpop.permute.xlu0 %452 }
  0xa1   : > { %496 = vst.msk [vmem:[#allocation2 + $0x15] sm:$0x7f] %vm349_vm4, %v494_v13 }
  0xa2   : > { %455 = vst.msk [vmem:[#allocation2 + $0xe] sm:$0x7f] %vm356_vm5, %v453_v14 }
  0xa4   : > { %v361_v15 = vpop.permute.xlu1 %360  ;;  %v541_v16 = vpop.permute.xlu0 %540 }
  0xa5   : > { %364 = vst.msk [vmem:[#allocation2] sm:$0x7f] %vm363_vm6, %v361_v15 }
  0xa6   : > { %543 = vst.msk [vmem:[#allocation2 + $0x1c] sm:$0x7f] %vm349_vm4, %v541_v16 }
  0xa8   : > { %v459_v17 = vpop.permute.xlu1 %458  ;;  %v412_v18 = vpop.permute.xlu0 %411 }
  0xa9   : > { %461 = vst.msk [vmem:[#allocation2 + $0xe] sm:$0x7f] %vm363_vm6, %v459_v17  ;;  %414 = vst.msk [vmem:[#allocation2 + $0x7] sm:$0x7f] %vm363_vm6, %v412_v18 }
  0xac   : > { %v547_v19 = vpop.permute.xlu1 %546  ;;  %v500_v20 = vpop.permute.xlu0 %499 }
  0xad   : > { %549 = vst.msk [vmem:[#allocation2 + $0x1c] sm:$0x7f] %vm356_vm5, %v547_v19  ;;  %502 = vst.msk [vmem:[#allocation2 + $0x15] sm:$0x7f] %vm356_vm5, %v500_v20 }
  0xb0   : > { %v419_v21 = vpop.permute.xlu1 %418  ;;  %v369_v22 = vpop.permute.xlu0 %368 }
  0xb1   : > { %421 = vst.msk [vmem:[#allocation2 + $0x7] sm:$0x7f] %vm371_vm7, %v419_v21  ;;  %372 = vst.msk [vmem:[#allocation2] sm:$0x7f] %vm371_vm7, %v369_v22 }
  0xb4   : > { %v506_v23 = vpop.permute.xlu1 %505  ;;  %v466_v24 = vpop.permute.xlu0 %465 }
  0xb5   : > { %508 = vst.msk [vmem:[#allocation2 + $0x15] sm:$0x7f] %vm363_vm6, %v506_v23 }
  0xb6   : > { %468 = vst.msk [vmem:[#allocation2 + $0xe] sm:$0x7f] %vm371_vm7, %v466_v24 }
  0xb8   : > { %v376_v25 = vpop.permute.xlu1 %375  ;;  %v553_v26 = vpop.permute.xlu0 %552 }
  0xb9   : > { %379 = vst.msk [vmem:[#allocation2] sm:$0x7f] %vm378_vm8, %v376_v25 }
  0xba   : > { %555 = vst.msk [vmem:[#allocation2 + $0x1c] sm:$0x7f] %vm363_vm6, %v553_v26 }
  0xbc   : > { %v472_v27 = vpop.permute.xlu1 %471  ;;  %v425_v28 = vpop.permute.xlu0 %424 }
  0xbd   : > { %474 = vst.msk [vmem:[#allocation2 + $0xe] sm:$0x7f] %vm378_vm8, %v472_v27  ;;  %427 = vst.msk [vmem:[#allocation2 + $0x7] sm:$0x7f] %vm378_vm8, %v425_v28 }
  0xc0   : > { %v560_v29 = vpop.permute.xlu1 %559  ;;  %v513_v30 = vpop.permute.xlu0 %512 }
  0xc1   : > { %562 = vst.msk [vmem:[#allocation2 + $0x1c] sm:$0x7f] %vm371_vm7, %v560_v29  ;;  %515 = vst.msk [vmem:[#allocation2 + $0x15] sm:$0x7f] %vm371_vm7, %v513_v30 }
  0xc4   : > { %v431_v31 = vpop.permute.xlu1 %430  ;;  %v383_v32 = vpop.permute.xlu0 %382 }
  0xc5   : > { %433 = vst.msk [vmem:[#allocation2 + $0x7] sm:$0x7f] %vm385_vm9, %v431_v31  ;;  %386 = vst.msk [vmem:[#allocation2] sm:$0x7f] %vm385_vm9, %v383_v32 }
  0xc8   : > { %v519_v33 = vpop.permute.xlu1 %518  ;;  %v478_v34 = vpop.permute.xlu0 %477 }
  0xc9   : > { %521 = vst.msk [vmem:[#allocation2 + $0x15] sm:$0x7f] %vm378_vm8, %v519_v33 }
  0xca   : > { %480 = vst.msk [vmem:[#allocation2 + $0xe] sm:$0x7f] %vm385_vm9, %v478_v34 }
  0xcc   : > { %v525_v35 = vpop.permute.xlu1 %524  ;;  %v566_v36 = vpop.permute.xlu0 %565  ;;  %v669_v39 = vld [vmem:[#allocation2] sm:$0xff] }
  0xcd   : > { %527 = vst.msk [vmem:[#allocation2 + $0x15] sm:$0x7f] %vm385_vm9, %v525_v35 }
  0xce   : > { %568 = vst.msk [vmem:[#allocation2 + $0x1c] sm:$0x7f] %vm378_vm8, %v566_v36 }
  0xd0   : > { %v582_v37 = vpop.permute.xlu1 %581  ;;  %v572_v38 = vpop.permute.xlu0 %571 }
  0xd1   : > { %v670_v40 = vld [vmem:[#allocation2 + $0x8] sm:$0xff]  ;;  %584 = vst.msk [vmem:[#allocation2 + $0x23] sm:$0x7f] %vm342_vm3, %v582_v37 }
  0xd2   : > { %574 = vst.msk [vmem:[#allocation2 + $0x1c] sm:$0x7f] %vm385_vm9, %v572_v38  ;;  %v676_v41 = vpack.c.bf16 %v670_v40, %v669_v39 }
  0xd4   : > { %1946 = vmatprep.mubr.msk.bf16.mxu0 %vm707_vm10, %v676_v41  ;;  %v588_v42 = vpop.permute.xlu1 %587  ;;  %v629_v43 = vpop.permute.xlu0 %628  ;;  %v671_v46 = vld [vmem:[#allocation2 + $0x10] sm:$0xff] }
  0xd5   : > { %590 = vst.msk [vmem:[#allocation2 + $0x23] sm:$0x7f] %vm349_vm4, %v588_v42 }
  0xd6   : > { %631 = vst.msk [vmem:[#allocation2 + $0x2a] sm:$0x7f] %vm342_vm3, %v629_v43 }
  0xd8   : > { %v594_v44 = vpop.permute.xlu1 %593  ;;  %v635_v45 = vpop.permute.xlu0 %634 }
  0xd9   : > { %v672_v47 = vld [vmem:[#allocation2 + $0x18] sm:$0xff]  ;;  %596 = vst.msk [vmem:[#allocation2 + $0x23] sm:$0x7f] %vm356_vm5, %v594_v44 }
  0xda   : > { %637 = vst.msk [vmem:[#allocation2 + $0x2a] sm:$0x7f] %vm349_vm4, %v635_v45  ;;  %v677_v48 = vpack.c.bf16 %v672_v47, %v671_v46 }
  0xdc   : > { %1947 = vmatmul.mubr.msk.bf16.vlgmr.msra.gmra.mrb[0].mxu0 %vm707_vm10, %v677_v48  ;;  %v600_v49 = vpop.permute.xlu1 %599  ;;  %v641_v50 = vpop.permute.xlu0 %640 }
  0xdd   : > { %602 = vst.msk [vmem:[#allocation2 + $0x23] sm:$0x7f] %vm363_vm6, %v600_v49 }
  0xde   : > { %643 = vst.msk [vmem:[#allocation2 + $0x2a] sm:$0x7f] %vm356_vm5, %v641_v50 }
  0xe0   : > { %v607_v51 = vpop.permute.xlu1 %606  ;;  %v647_v52 = vpop.permute.xlu0 %646 }
  0xe1   : > { %609 = vst.msk [vmem:[#allocation2 + $0x23] sm:$0x7f] %vm371_vm7, %v607_v51 }
  0xe2   : > { %649 = vst.msk [vmem:[#allocation2 + $0x2a] sm:$0x7f] %vm363_vm6, %v647_v52 }
  0xe4   : > { %v613_v53 = vpop.permute.xlu1 %612  ;;  %v654_v54 = vpop.permute.xlu0 %653 }
  0xe5   : > { %615 = vst.msk [vmem:[#allocation2 + $0x23] sm:$0x7f] %vm378_vm8, %v613_v53 }
  0xe6   : > { %656 = vst.msk [vmem:[#allocation2 + $0x2a] sm:$0x7f] %vm371_vm7, %v654_v54  ;;  %v2023_v54 = vld [vmem:[%s2863_s3 + $0x40] sm:$0xff]  }
  0xe7   : > { %1890 = vmatprep.subr.bf16.mxu1 %v2023_v54 }
  0xe8   : > { %v619_v55 = vpop.permute.xlu1 %618  ;;  %v660_v56 = vpop.permute.xlu0 %659 }
  0xe9   : > { %621 = vst.msk [vmem:[#allocation2 + $0x23] sm:$0x7f] %vm385_vm9, %v619_v55 }
  0xea   : > { %662 = vst.msk [vmem:[#allocation2 + $0x2a] sm:$0x7f] %vm378_vm8, %v660_v56  ;;  %v2024_v56 = vld [vmem:[%s2863_s3] sm:$0xff]  }
  0xeb   : > { %1891 = vmatpush3.bf16.msra.mxu1 %v2024_v56 }
  0xec   : > { %v666_v57 = vpop.permute.xlu0 %665 }
  0xed   : > { %668 = vst.msk [vmem:[#allocation2 + $0x2a] sm:$0x7f] %vm385_vm9, %v666_v57 }
  0xf0   : > { %v673_v58 = vld [vmem:[#allocation2 + $0x20] sm:$0xff] }
  0xf4   : > { %v674_v59 = vld [vmem:[#allocation2 + $0x28] sm:$0xff]  ;;  %v675_v60 = vld [vmem:[#allocation2 + $0x30] sm:$0x1] }
  0xf5   : > { %v678_v61 = vpack.c.bf16 %v674_v59, %v673_v58  ;;  %v679_v62 = vpack.c.bf16 %v675_v60, %v675_v60  ;;  %v2025_v58 = vld [vmem:[%s2863_s3 + $0x48] sm:$0xff]  }
  0xf6   : > { %1892 = vmatprep.subr.bf16.mxu1 %v2025_v58  ;;  %v2026_v60 = vld [vmem:[%s2863_s3 + $0x8] sm:$0xff]  }
  0xf7   : > { %1950 = vmatprep.mubr.msk.bf16.mxu0 %vm707_vm10, %v678_v61  ;;  %1893 = vmatpush3.bf16.msra.mxu1 %v2026_v60  ;;  %v2027_v61 = vld [vmem:[%s2863_s3 + $0x50] sm:$0xff]  }
  0xf8   : > { %1951 = vmatmul.mubr.msk.bf16.gmra.mrb[4].mxu0 %vm707_vm10, %v679_v62  ;;  %1894 = vmatprep.subr.bf16.mxu1 %v2027_v61 }
 0x1af   : > { %v1948_v0 = vpop.f32.mrb[0].mxu0 }
 0x1b0   : > { %v767_v1 = vadd.f32 %v1948_v0, %v2434_v63  ;;  %v758_v2 = vpop.f32.mrb[1].mxu0  ;;  %v2029_v0 = vld [vmem:[%s2863_s3 + $0x58] sm:$0xff]  }
 0x1b1   : > { %v759_v3 = vadd.f32 %v2434_v63, %v758_v2  ;;  %v1949_v4 = vpop.f32.mrb[2].mxu0  ;;  %v2030_v2 = vld [vmem:[%s2863_s3 + $0x18] sm:$0xff]  }
 0x1b2   : > { %v790_v5 = vmax.f32 %v767_v1, 0.0  ;;  %v770_v6 = vadd.f32 %v1949_v4, %v2434_v63  ;;  %v761_v7 = vpop.f32.mrb[3].mxu0  ;;  %v2031_v4 = vld [vmem:[%s2863_s3 + $0x60] sm:$0xff]  }
 0x1b3   : > { %v2439_v8 = vmax.f32 %v759_v3, 0.0  ;;  %v762_v9 = vadd.f32 %v2434_v63, %v761_v7  ;;  %v2034_v7 = vld [vmem:[%s2863_s3 + $0x28] sm:$0xff]  }
 0x1b4   : > { %v2442_v10 = vmax.f32 %v770_v6, 0.0  ;;  %859 = vrot.lane.b32.xlu1 %v790_v5, %s2132_s27  ;;  %v922_v11 = vrot.slane %v790_v5, 7  ;;  %v868_v12 = vrot.slane %v790_v5, 2  ;;  %833 = vst.msk [vmem:[#allocation3 + $0x10] sm:$0x1] %vm795_vm11, %v790_v5  ;;  %v904_v14 = vrot.slane %v790_v5, 4 }
 0x1b5   : > { %941 = vst.msk [vmem:[#allocation3 + $0x4] sm:$0x1] %vm795_vm11, %v790_v5  ;;  %v2447_v13 = vmax.f32 %v762_v9, 0.0  ;;  %796 = vst.msk [vmem:[#allocation3] sm:$0x1] %vm795_vm11, %v2439_v8  ;;  %v804_v17 = vrot.slane %v2439_v8, 2 }
 0x1b6   : > { %923 = vrot.lane.b32.xlu0 %v922_v11, %s2131_s22  ;;  %870 = vst.msk [vmem:[#allocation3 + $0x11] sm:$0x1] %vm795_vm11, %v868_v12  ;;  %951 = vst.msk [vmem:[#allocation3 + $0xc] sm:$0x1] %vm795_vm11, %v2442_v10  ;;  %v928_v15 = vrot.slane %v2442_v10, 4  ;;  %v938_v16 = vrot.slane %v2442_v10, 6 }
 0x1b7   : > { %967 = vst.msk [vmem:[#allocation3 + $0x5] sm:$0x1] %vm795_vm11, %v868_v12  ;;  %816 = vst.msk [vmem:[#allocation3 + $0x8] sm:$0x1] %vm795_vm11, %v2447_v13  ;;  %v863_v18 = vrot.slane %v790_v5, 1  ;;  %v841_v19 = vrot.slane %v2439_v8, 4 }
 0x1b8   : > { %906 = vst.msk [vmem:[#allocation3 + $0x12] sm:$0x1] %vm795_vm11, %v904_v14  ;;  %895 = vrot.lane.b32.xlu1 %v868_v12, %s2132_s27  ;;  %1002 = vst.msk [vmem:[#allocation3 + $0x6] sm:$0x1] %vm795_vm11, %v928_v15  ;;  %v823_v20 = vrot.slane %v2447_v13, 6  ;;  %v919_v21 = vrot.slane %v790_v5, 6 }
 0x1b9   : > { %940 = vst.msk [vmem:[#allocation3 + $0x13] sm:$0x1] %vm795_vm11, %v938_v16  ;;  %1035 = vst.msk [vmem:[#allocation3 + $0x7] sm:$0x1] %vm795_vm11, %v938_v16  ;;  %v887_v22 = vrot.slane %v2447_v13, 4  ;;  %v980_v23 = vrot.slane %v2442_v10, 2 }
 0x1ba   : > { %835 = vst.msk [vmem:[#allocation3 + $0x1] sm:$0x1] %vm795_vm11, %v804_v17  ;;  %942 = vrot.lane.b32.xlu0 %v863_v18, %s2131_s22  ;;  %872 = vst.msk [vmem:[#allocation3 + $0x2] sm:$0x1] %vm795_vm11, %v841_v19  ;;  %v850_v24 = vrot.slane %v2447_v13, 2  ;;  %v899_v25 = vrot.slane %v790_v5, 3 }
 0x1bb   : > { %908 = vst.msk [vmem:[#allocation3 + $0x3] sm:$0x1] %vm795_vm11, %v823_v20  ;;  %921 = vst.msk [vmem:[#allocation3 + $0xb] sm:$0x1] %vm795_vm11, %v919_v21  ;;  %v914_v26 = vrot.slane %v790_v5, 5  ;;  %v952_v27 = vrot.slane %v2442_v10, 1 }
 0x1bc   : > { %864 = vrot.lane.b32.xlu1 %v863_v18, %s2870_s28  ;;  %889 = vst.msk [vmem:[#allocation3 + $0xa] sm:$0x1] %vm795_vm11, %v887_v22  ;;  %982 = vst.msk [vmem:[#allocation3 + $0xd] sm:$0x1] %vm795_vm11, %v980_v23  ;;  %v798_v28 = vrot.slane %v2439_v8, 1  ;;  %v836_v30 = vrot.slane %v2439_v8, 3 }
 0x1bd   : > { %852 = vst.msk [vmem:[#allocation3 + $0x9] sm:$0x1] %vm795_vm11, %v850_v24  ;;  %v873_v39 = vrot.slane %v2439_v8, 5  ;;  %v961_v41 = vrot.slane %v2442_v10, 7  ;;  %v818_v47 = vrot.slane %v2447_v13, 1  ;;  %v878_v48 = vrot.slane %v2439_v8, 6 }
 0x1be   : > { %968 = vrot.lane.b32.xlu0 %v899_v25, %s2131_s22  ;;  %v890_v49 = vrot.slane %v2447_v13, 5  ;;  %v810_v50 = vrot.slane %v2439_v8, 7  ;;  %v983_v51 = vrot.slane %v2442_v10, 3  ;;  %v828_v52 = vrot.slane %v2447_v13, 7  ;;  %v2032_v5 = vld [vmem:[%s2863_s3 + $0x20] sm:$0xff]   ;;  %v2033_v6 = vld [vmem:[%s2863_s3 + $0x68] sm:$0xff]  }
 0x1bf   : > { %v933_v53 = vrot.slane %v2442_v10, 5  ;;  %v853_v57 = vrot.slane %v2447_v13, 3  ;;  %v2035_v8 = vld [vmem:[%s2863_s3 + $0x70] sm:$0xff]   ;;  %v2038_v13 = vld [vmem:[%s2863_s3 + $0x38] sm:$0xff]  }
 0x1c0   : > { %900 = vrot.lane.b32.xlu1 %v899_v25, %s2870_s28  ;;  %v2036_v9 = vld [vmem:[%s2863_s3 + $0x30] sm:$0xff]  }
 0x1c2   : > { %972 = vrot.lane.b32.xlu0 %v904_v14, %s2132_s27 }
 0x1c4   : > { %915 = vrot.lane.b32.xlu1 %v914_v26, %s2870_s28 }
 0x1c6   : > { %947 = vrot.lane.b32.xlu0 %v922_v11, %s2870_s28  ;;  %v2037_v11 = vld [vmem:[%s2863_s3 + $0x78] sm:$0xff]  }
 0x1c8   : > { %953 = vrot.lane.b32.xlu1 %v952_v27, %s2131_s22 }
 0x1ca   : > { %799 = vrot.lane.b32.xlu0 %v798_v28, %s2131_s22 }
 0x1cb   : > { %v1952_v29 = vpop.f32.mrb[4].mxu0 }
 0x1cc   : > { %929 = vrot.lane.b32.xlu1 %v928_v15, %s2132_s27  ;;  %v783_v31 = vadd.f32 %v1952_v29, %v2434_v63  ;;  %v774_v32 = vpop.f32.mrb[5].mxu0 }
 0x1cd   : > { %v775_v33 = vadd.f32 %v2434_v63, %v774_v32  ;;  %v1953_v34 = vpop.f32.mrb[6].mxu0 }
 0x1ce   : > { %837 = vrot.lane.b32.xlu0 %v836_v30, %s2131_s22  ;;  %v794_v35 = vmax.f32 %v783_v31, 0.0  ;;  %v777_v36 = vpop.f32.mrb[7].mxu0 }
 0x1cf   : > { %v2498_v37 = vmax.f32 %v775_v33, 0.0  ;;  %v778_v38 = vadd.f32 %v2434_v63, %v777_v36  ;;  %v2028_v63 = vld [vmem:[%s2863_s3 + $0x10] sm:$0xff]  }
 0x1d0   : > { %957 = vrot.lane.b32.xlu1 %v938_v16, %s2132_s27  ;;  %1093 = vst.msk [vmem:[#allocation3 + $0x28] sm:$0x1] %vm795_vm11, %v794_v35  ;;  %1895 = vmatpush3.bf16.msra.mxu1 %v2028_v63  ;;  %v2134_v16 = vmov 0.0  }
 0x1d1   : > { %966 = vst.msk [vmem:[#allocation3 + $0x14] sm:$0x1] %vm795_vm11, %v2498_v37  ;;  %1065 = vst.msk [vmem:[#allocation3 + $0x18] sm:$0x1] %vm795_vm11, %v2498_v37  ;;  %v2508_v40 = vmax.f32 %v778_v38, 0.0  ;;  %v998_v42 = vrot.slane %v2498_v37, 2  ;;  %1896 = vmatprep.subr.bf16.mxu1 %v2029_v0 }
 0x1d2   : > { %874 = vrot.lane.b32.xlu0 %v873_v39, %s2131_s22  ;;  %v1013_v43 = vrot.slane %v2498_v37, 4  ;;  %v1045_v44 = vrot.slane %v2498_v37, 6  ;;  %v1016_v55 = vrot.slane %v2498_v37, 5  ;;  %v993_v59 = vrot.slane %v2498_v37, 1 }
 0x1d3   : > { %1078 = vst.msk [vmem:[#allocation3 + $0x20] sm:$0x1] %vm795_vm11, %v2508_v40  ;;  %v1032_v45 = vrot.slane %v2508_v40, 4  ;;  %v1062_v46 = vrot.slane %v2508_v40, 6  ;;  %1000 = vst.msk [vmem:[#allocation3 + $0x15] sm:$0x1] %vm795_vm11, %v998_v42 }
 0x1d4   : > { %962 = vrot.lane.b32.xlu1 %v961_v41, %s2870_s28  ;;  %1015 = vst.msk [vmem:[#allocation3 + $0xe] sm:$0x1] %vm795_vm11, %v1013_v43  ;;  %1047 = vst.msk [vmem:[#allocation3 + $0xf] sm:$0x1] %vm795_vm11, %v1045_v44  ;;  %v1079_v62 = vrot.slane %v2508_v40, 1  ;;  %v1022_v1 = vrot.slane %v2508_v40, 2  ;;  %1897 = vmatpush3.bf16.msra.mxu1 %v2030_v2 }
 0x1d5   : > { %1034 = vst.msk [vmem:[#allocation3 + $0x16] sm:$0x1] %vm795_vm11, %v1032_v45  ;;  %1064 = vst.msk [vmem:[#allocation3 + $0x17] sm:$0x1] %vm795_vm11, %v1062_v46  ;;  %v1048_v3 = vrot.slane %v2498_v37, 7  ;;  %1898 = vmatprep.subr.bf16.mxu1 %v2031_v4  ;;  %v1057_v10 = vrot.slane %v2508_v40, 5 }
 0x1d6   : > { %805 = vrot.lane.b32.xlu0 %v804_v17, %s2132_s27  ;;  %v1008_v12 = vrot.slane %v2498_v37, 3  ;;  %v1088_v14 = vrot.slane %v2508_v40, 7  ;;  %v1027_v15 = vrot.slane %v2508_v40, 3 }
 0x1d8   : > { %976 = vrot.lane.b32.xlu1 %v952_v27, %s2870_s28  ;;  %1899 = vmatpush3.bf16.msra.mxu1 %v2032_v5 }
 0x1d9   : > { %1900 = vmatprep.subr.bf16.mxu1 %v2033_v6 }
 0x1da   : > { %842 = vrot.lane.b32.xlu0 %v841_v19, %s2132_s27 }
 0x1dc   : > { %819 = vrot.lane.b32.xlu1 %v818_v47, %s2131_s22  ;;  %1901 = vmatpush3.bf16.msra.mxu1 %v2034_v7 }
 0x1dd   : > { %1902 = vmatprep.subr.bf16.mxu1 %v2035_v8  ;;  %v2039_v8 = vld [vmem:[%s2863_s3 + $0x80] sm:$0xff]  }
 0x1de   : > { %879 = vrot.lane.b32.xlu0 %v878_v48, %s2132_s27 }
 0x1e0   : > { %891 = vrot.lane.b32.xlu1 %v890_v49, %s2131_s22  ;;  %1903 = vmatpush3.bf16.msra.mxu1 %v2036_v9 }
 0x1e1   : > { %1904 = vmatprep.subr.bf16.mxu1 %v2037_v11  ;;  %v1096_v11 = vld [vmem:[#allocation3 + $0x10] sm:$0xff] }
 0x1e2   : > { %811 = vrot.lane.b32.xlu0 %v810_v50, %s2870_s28 }
 0x1e4   : > { %824 = vrot.lane.b32.xlu1 %v823_v20, %s2132_s27  ;;  %1905 = vmatpush3.bf16.msra.mxu1 %v2038_v13 }
 0x1e5   : > { %1954 = vmatprep.subr.bf16.mxu1 %v2134_v16 }
 0x1e6   : > { %984 = vrot.lane.b32.xlu0 %v983_v51, %s2131_s22 }
 0x1e8   : > { %829 = vrot.lane.b32.xlu1 %v828_v52, %s2870_s28 }
 0x1ea   : > { %1003 = vrot.lane.b32.xlu0 %v933_v53, %s2131_s22 }
 0x1ec   : > { %846 = vrot.lane.b32.xlu1 %v818_v47, %s2870_s28 }
 0x1ee   : > { %1036 = vrot.lane.b32.xlu0 %v961_v41, %s2131_s22 }
 0x1f0   : > { %989 = vrot.lane.b32.xlu1 %v2498_v37, %s2132_s27 }
 0x1f2   : > { %934 = vrot.lane.b32.xlu0 %v933_v53, %s2870_s28 }
 0x1f4   : > { %1017 = vrot.lane.b32.xlu1 %v1016_v55, %s2131_s22 }
 0x1f6   : > { %854 = vrot.lane.b32.xlu0 %v853_v57, %s2131_s22 }
 0x1f8   : > { %994 = vrot.lane.b32.xlu1 %v993_v59, %s2870_s28 }
 0x1fa   : > { %909 = vrot.lane.b32.xlu0 %v828_v52, %s2131_s22 }
 0x1fc   : > { %1080 = vrot.lane.b32.xlu1 %v1079_v62, %s2131_s22 }
 0x1fe   : > { %883 = vrot.lane.b32.xlu0 %v853_v57, %s2870_s28 }
 0x200   : > { %1023 = vrot.lane.b32.xlu1 %v1022_v1, %s2132_s27 }
 0x202   : > { %1049 = vrot.lane.b32.xlu0 %v1048_v3, %s2131_s22 }
 0x204   : > { %1053 = vrot.lane.b32.xlu1 %v1032_v45, %s2132_s27 }
 0x206   : > { %1066 = vrot.lane.b32.xlu0 %v993_v59, %s2131_s22 }
 0x208   : > { %1084 = vrot.lane.b32.xlu1 %v1062_v46, %s2132_s27 }
 0x20a   : > { %1070 = vrot.lane.b32.xlu0 %v998_v42, %s2132_s27 }
 0x20c   : > { %1058 = vrot.lane.b32.xlu1 %v1057_v10, %s2870_s28  ;;  %v2040_v10 = vld [vmem:[%s2863_s3 + $0x88] sm:$0xff]  }
 0x20e   : > { %1009 = vrot.lane.b32.xlu0 %v1008_v12, %s2870_s28  ;;  %v1099_v12 = vld [vmem:[#allocation3 + $0x28] sm:$0x1] }
 0x20f   : > { %v1102_v13 = vpack.c.bf16 %v1099_v12, %v1096_v11 }
 0x210   : > { %1089 = vrot.lane.b32.xlu1 %v1088_v14, %s2870_s28  ;;  %v2041_v14 = vld [vmem:[%s2865_s5 + $0x40] sm:$0xff]  }
 0x211   : > { %1915 = vmatprep.subr.bf16.mxu0 %v2041_v14 }
 0x212   : > { %1028 = vrot.lane.b32.xlu0 %v1027_v15, %s2870_s28  ;;  %v2042_v15 = vld [vmem:[%s2865_s5] sm:$0xff]  }
 0x213   : > { %1916 = vmatpush3.bf16.msra.mxu0 %v2042_v15 }
 0x214   : > { %1041 = vrot.lane.b32.xlu1 %v1016_v55, %s2870_s28 }
 0x216   : > { %1074 = vrot.lane.b32.xlu0 %v1048_v3, %s2870_s28 }
 0x226   : > { %v2637_v17 = vpop.permute.xlu1 %859 }
 0x228   : > { %v924_v18 = vpop.permute.xlu0 %923 }
 0x229   : > { %926 = vst.msk [vmem:[#allocation3 + $0xb] sm:$0x1] %vm802_vm12, %v924_v18  ;;  %v2044_v18 = vld [vmem:[%s2865_s5 + $0x8] sm:$0xff]  }
 0x22a   : > { %v896_v19 = vpop.permute.xlu1 %895 }
 0x22c   : > { %v943_v20 = vpop.permute.xlu0 %942 }
 0x22d   : > { %945 = vst.msk [vmem:[#allocation3 + $0x4] sm:$0x1] %vm802_vm12, %v943_v20 }
 0x22e   : > { %v2641_v21 = vpop.permute.xlu1 %864  ;;  %946 = vst.msk [vmem:[#allocation3 + $0x4] sm:$0x1] %vm808_vm13, %v896_v19 }
 0x230   : > { %v969_v22 = vpop.permute.xlu0 %968 }
 0x231   : > { %971 = vst.msk [vmem:[#allocation3 + $0x5] sm:$0x1] %vm802_vm12, %v969_v22  ;;  %v1342_v22 = vlaneseq }
 0x232   : > { %v901_v23 = vpop.permute.xlu1 %900 }
 0x233   : > { %vm2741_vm1 = vcmp.lt.s32.totalorder %v1342_v22, 32  ;;  %vm1373_vm2 = vcmp.ge.s32.totalorder %v1342_v22, 32  ;;  %vm1374_vm3 = vcmp.lt.s32.totalorder %v1342_v22, 64  ;;  %vm1381_vm5 = vcmp.ge.s32.totalorder %v1342_v22, 64 }
 0x234   : > { %v973_v24 = vpop.permute.xlu0 %972  ;;  %vm1375_vm4 = vmand %vm1373_vm2, %vm1374_vm3  ;;  %vm1382_vm6 = vcmp.lt.s32.totalorder %v1342_v22, 96  ;;  %vm1389_vm8 = vcmp.ge.s32.totalorder %v1342_v22, 96  ;;  %vm1390_vm9 = vcmp.lt.s32.totalorder %v1342_v22, 128 }
 0x235   : > { %975 = vst.msk [vmem:[#allocation3 + $0x5] sm:$0x1] %vm808_vm13, %v973_v24  ;;  %vm1383_vm7 = vmand %vm1381_vm5, %vm1382_vm6 }
 0x236   : > { %v2646_v25 = vpop.permute.xlu1 %915  ;;  %vm1391_vm10 = vmand %vm1389_vm8, %vm1390_vm9 }
 0x238   : > { %v948_v26 = vpop.permute.xlu0 %947 }
 0x239   : > { %950 = vst.msk [vmem:[#allocation3 + $0x4] sm:$0x1] %vm814_vm14, %v948_v26 }
 0x23a   : > { %v954_v27 = vpop.permute.xlu1 %953 }
 0x23b   : > { %956 = vst.msk [vmem:[#allocation3 + $0xc] sm:$0x1] %vm802_vm12, %v954_v27 }
 0x23c   : > { %v800_v28 = vpop.permute.xlu0 %799 }
 0x23d   : > { %803 = vst.msk [vmem:[#allocation3] sm:$0x1] %vm802_vm12, %v800_v28 }
 0x23e   : > { %v930_v29 = vpop.permute.xlu1 %929 }
 0x23f   : > { %932 = vst.msk [vmem:[#allocation3 + $0xb] sm:$0x1] %vm808_vm13, %v930_v29  ;;  %v1840_v29 = vld [vmem:[%s2864_s4] ss:$0 sm:$0xff] }
 0x240   : > { %v838_v30 = vpop.permute.xlu0 %837 }
 0x241   : > { %840 = vst.msk [vmem:[#allocation3 + $0x1] sm:$0x1] %vm802_vm12, %v838_v30 }
 0x242   : > { %v958_v31 = vpop.permute.xlu1 %957 }
 0x243   : > { %960 = vst.msk [vmem:[#allocation3 + $0xc] sm:$0x1] %vm808_vm13, %v958_v31 }
 0x244   : > { %v875_v32 = vpop.permute.xlu0 %874 }
 0x245   : > { %877 = vst.msk [vmem:[#allocation3 + $0x2] sm:$0x1] %vm802_vm12, %v875_v32  ;;  %v2046_v32 = vld [vmem:[%s2865_s5 + $0x10] sm:$0xff]  }
 0x246   : > { %v963_v33 = vpop.permute.xlu1 %962 }
 0x247   : > { %965 = vst.msk [vmem:[#allocation3 + $0xc] sm:$0x1] %vm814_vm14, %v963_v33 }
 0x248   : > { %v806_v34 = vpop.permute.xlu0 %805 }
 0x249   : > { %809 = vst.msk [vmem:[#allocation3] sm:$0x1] %vm808_vm13, %v806_v34 }
 0x24a   : > { %v977_v35 = vpop.permute.xlu1 %976 }
 0x24b   : > { %979 = vst.msk [vmem:[#allocation3 + $0x5] sm:$0x1] %vm814_vm14, %v977_v35  ;;  %v2047_v35 = vld [vmem:[%s2865_s5 + $0x58] sm:$0xff]  }
 0x24c   : > { %v843_v36 = vpop.permute.xlu0 %842 }
 0x24d   : > { %845 = vst.msk [vmem:[#allocation3 + $0x1] sm:$0x1] %vm808_vm13, %v843_v36 }
 0x24e   : > { %v820_v37 = vpop.permute.xlu1 %819 }
 0x24f   : > { %822 = vst.msk [vmem:[#allocation3 + $0x8] sm:$0x1] %vm802_vm12, %v820_v37 }
 0x250   : > { %v880_v38 = vpop.permute.xlu0 %879 }
 0x251   : > { %882 = vst.msk [vmem:[#allocation3 + $0x2] sm:$0x1] %vm808_vm13, %v880_v38 }
 0x252   : > { %v892_v39 = vpop.permute.xlu1 %891 }
 0x253   : > { %894 = vst.msk [vmem:[#allocation3 + $0xa] sm:$0x1] %vm802_vm12, %v892_v39 }
 0x254   : > { %898 = vst.msk [vmem:[#allocation3 + $0xa] sm:$0x1] %vm808_vm13, %v896_v19  ;;  %v812_v40 = vpop.permute.xlu0 %811  ;;  %v2045_v19 = vld [vmem:[%s2865_s5 + $0x50] sm:$0xff]  }
 0x255   : > { %903 = vst.msk [vmem:[#allocation3 + $0xa] sm:$0x1] %vm814_vm14, %v901_v23  ;;  %815 = vst.msk [vmem:[#allocation3] sm:$0x1] %vm814_vm14, %v812_v40  ;;  %v2136_v23 = vmov 1966171168  }
 0x256   : > { %v825_v41 = vpop.permute.xlu1 %824  ;;  %v1349_v24 = vunpack.c.l.s4 %v2136_v23 }
 0x257   : > { %827 = vst.msk [vmem:[#allocation3 + $0x8] sm:$0x1] %vm808_vm13, %v825_v41 }
 0x258   : > { %v985_v42 = vpop.permute.xlu0 %984  ;;  %v1350_v30 = vunpack.c.0.s8 %v1349_v24 }
 0x259   : > { %987 = vst.msk [vmem:[#allocation3 + $0xd] sm:$0x1] %vm802_vm12, %v985_v42  ;;  %v2048_v42 = vld [vmem:[%s2865_s5 + $0x18] sm:$0xff]  }
 0x25a   : > { %v830_v43 = vpop.permute.xlu1 %829 }
 0x25b   : > { %832 = vst.msk [vmem:[#allocation3 + $0x8] sm:$0x1] %vm814_vm14, %v830_v43 }
 0x25c   : > { %v1004_v44 = vpop.permute.xlu0 %1003 }
 0x25d   : > { %1006 = vst.msk [vmem:[#allocation3 + $0x6] sm:$0x1] %vm802_vm12, %v1004_v44 }
 0x25e   : > { %1007 = vst.msk [vmem:[#allocation3 + $0x6] sm:$0x1] %vm808_vm13, %v958_v31  ;;  %v847_v45 = vpop.permute.xlu1 %846  ;;  %v2731_v31 = vshrl.u32 %v1342_v22, 7 }
 0x25f   : > { %849 = vst.msk [vmem:[#allocation3 + $0x1] sm:$0x1] %vm814_vm14, %v847_v45 }
 0x260   : > { %v1037_v46 = vpop.permute.xlu0 %1036  ;;  %v1353_v37 = vsub.s32 %v1350_v30, %v2731_v31  ;;  %v1437_v11 = vsub.s32 0, %v2731_v31  ;;  %v1441_v12 = vsub.s32 1, %v2731_v31 }
 0x261   : > { %1039 = vst.msk [vmem:[#allocation3 + $0x7] sm:$0x1] %vm802_vm12, %v1037_v46  ;;  %v2049_v46 = vld [vmem:[%s2865_s5 + $0x60] sm:$0xff]  }
 0x262   : > { %v990_v47 = vpop.permute.xlu1 %989 }
 0x263   : > { %992 = vst.msk [vmem:[#allocation3 + $0xd] sm:$0x1] %vm808_vm13, %v990_v47  ;;  %1040 = vst.msk [vmem:[#allocation3 + $0x7] sm:$0x1] %vm808_vm13, %v990_v47 }
 0x264   : > { %v935_v48 = vpop.permute.xlu0 %934 }
 0x265   : > { %937 = vst.msk [vmem:[#allocation3 + $0xb] sm:$0x1] %vm814_vm14, %v935_v48 }
 0x266   : > { %v1018_v49 = vpop.permute.xlu1 %1017 }
 0x267   : > { %1020 = vst.msk [vmem:[#allocation3 + $0xe] sm:$0x1] %vm802_vm12, %v1018_v49 }
 0x268   : > { %v855_v50 = vpop.permute.xlu0 %854 }
 0x269   : > { %857 = vst.msk [vmem:[#allocation3 + $0x9] sm:$0x1] %vm802_vm12, %v855_v50  ;;  %v2050_v50 = vld [vmem:[%s2865_s5 + $0x20] sm:$0xff]  }
 0x26a   : > { %862 = vst.msk [vmem:[#allocation3 + $0x9] sm:$0x1] %vm808_vm13, %v2637_v17  ;;  %v995_v51 = vpop.permute.xlu1 %994 }
 0x26b   : > { %867 = vst.msk [vmem:[#allocation3 + $0x9] sm:$0x1] %vm814_vm14, %v2641_v21  ;;  %997 = vst.msk [vmem:[#allocation3 + $0xd] sm:$0x1] %vm814_vm14, %v995_v51 }
 0x26c   : > { %v910_v52 = vpop.permute.xlu0 %909 }
 0x26d   : > { %912 = vst.msk [vmem:[#allocation3 + $0x3] sm:$0x1] %vm802_vm12, %v910_v52 }
 0x26e   : > { %913 = vst.msk [vmem:[#allocation3 + $0x3] sm:$0x1] %vm808_vm13, %v2637_v17  ;;  %v1081_v53 = vpop.permute.xlu1 %1080  ;;  %v2043_v17 = vld [vmem:[%s2865_s5 + $0x48] sm:$0xff]  }
 0x26f   : > { %918 = vst.msk [vmem:[#allocation3 + $0x3] sm:$0x1] %vm814_vm14, %v2646_v25  ;;  %1917 = vmatprep.subr.bf16.mxu0 %v2043_v17 }
 0x270   : > { %1083 = vst.msk [vmem:[#allocation3 + $0x20] sm:$0x1] %vm802_vm12, %v1081_v53  ;;  %v884_v54 = vpop.permute.xlu0 %883  ;;  %1918 = vmatpush3.bf16.msra.mxu0 %v2044_v18  ;;  %v2051_v53 = vld [vmem:[%s2865_s5 + $0x68] sm:$0xff]  }
 0x271   : > { %886 = vst.msk [vmem:[#allocation3 + $0x2] sm:$0x1] %vm814_vm14, %v884_v54  ;;  %1919 = vmatprep.subr.bf16.mxu0 %v2045_v19  ;;  %v2052_v54 = vld [vmem:[%s2865_s5 + $0x28] sm:$0xff]  }
 0x272   : > { %v1024_v55 = vpop.permute.xlu1 %1023 }
 0x273   : > { %1026 = vst.msk [vmem:[#allocation3 + $0xe] sm:$0x1] %vm808_vm13, %v1024_v55 }
 0x274   : > { %v1050_v56 = vpop.permute.xlu0 %1049  ;;  %1920 = vmatpush3.bf16.msra.mxu0 %v2046_v32 }
 0x275   : > { %1052 = vst.msk [vmem:[#allocation3 + $0xf] sm:$0x1] %vm802_vm12, %v1050_v56  ;;  %1921 = vmatprep.subr.bf16.mxu0 %v2047_v35 }
 0x276   : > { %v1054_v57 = vpop.permute.xlu1 %1053 }
 0x277   : > { %1056 = vst.msk [vmem:[#allocation3 + $0xf] sm:$0x1] %vm808_vm13, %v1054_v57 }
 0x278   : > { %v1067_v58 = vpop.permute.xlu0 %1066  ;;  %1922 = vmatpush3.bf16.msra.mxu0 %v2048_v42 }
 0x279   : > { %1069 = vst.msk [vmem:[#allocation3 + $0x18] sm:$0x1] %vm802_vm12, %v1067_v58  ;;  %1923 = vmatprep.subr.bf16.mxu0 %v2049_v46  ;;  %v1697_v46 = vld [vmem:[%s2868_s8] sm:$0x1] }
 0x27a   : > { %v1085_v59 = vpop.permute.xlu1 %1084 }
 0x27b   : > { %1087 = vst.msk [vmem:[#allocation3 + $0x20] sm:$0x1] %vm808_vm13, %v1085_v59  ;;  %v2053_v59 = vld [vmem:[%s2865_s5 + $0x70] sm:$0xff]  }
 0x27c   : > { %v1071_v60 = vpop.permute.xlu0 %1070  ;;  %1924 = vmatpush3.bf16.msra.mxu0 %v2050_v50 }
 0x27d   : > { %1073 = vst.msk [vmem:[#allocation3 + $0x18] sm:$0x1] %vm808_vm13, %v1071_v60  ;;  %v2054_v60 = vld [vmem:[%s2865_s5 + $0x80] sm:$0xff]   ;;  %1925 = vmatprep.subr.bf16.mxu0 %v2051_v53 }
 0x27e   : > { %v1059_v61 = vpop.permute.xlu1 %1058 }
 0x27f   : > { %1061 = vst.msk [vmem:[#allocation3 + $0xf] sm:$0x1] %vm814_vm14, %v1059_v61 }
 0x280   : > { %v1010_v62 = vpop.permute.xlu0 %1009  ;;  %1926 = vmatpush3.bf16.msra.mxu0 %v2052_v54 }
 0x281   : > { %1012 = vst.msk [vmem:[#allocation3 + $0x6] sm:$0x1] %vm814_vm14, %v1010_v62  ;;  %v2057_v62 = vld [vmem:[%s2865_s5 + $0x88] sm:$0xff]   ;;  %1927 = vmatprep.subr.bf16.mxu0 %v2053_v59 }
 0x282   : > { %v1090_v63 = vpop.permute.xlu1 %1089 }
 0x283   : > { %1092 = vst.msk [vmem:[#allocation3 + $0x20] sm:$0x1] %vm814_vm14, %v1090_v63  ;;  %v2055_v63 = vld [vmem:[%s2865_s5 + $0x30] sm:$0xff]  }
 0x284   : > { %v1029_v0 = vpop.permute.xlu0 %1028  ;;  %1928 = vmatpush3.bf16.msra.mxu0 %v2055_v63 }
 0x285   : > { %1031 = vst.msk [vmem:[#allocation3 + $0xe] sm:$0x1] %vm814_vm14, %v1029_v0 }
 0x286   : > { %v1042_v1 = vpop.permute.xlu1 %1041 }
 0x287   : > { %1044 = vst.msk [vmem:[#allocation3 + $0x7] sm:$0x1] %vm814_vm14, %v1042_v1  ;;  %v2056_v1 = vld [vmem:[%s2865_s5 + $0x78] sm:$0xff]  }
 0x288   : > { %v1075_v2 = vpop.permute.xlu0 %1074  ;;  %1929 = vmatprep.subr.bf16.mxu0 %v2056_v1 }
 0x289   : > { %1077 = vst.msk [vmem:[#allocation3 + $0x18] sm:$0x1] %vm814_vm14, %v1075_v2 }
 0x28a   : > { %v1098_v4 = vld [vmem:[#allocation3 + $0x20] sm:$0x1] }
 0x28c   : > { %v1095_v3 = vld [vmem:[#allocation3 + $0x8] sm:$0xff] }
 0x28d   : > { %v1101_v5 = vpack.c.bf16 %v1098_v4, %v1095_v3  ;;  %v2058_v3 = vld [vmem:[%s2865_s5 + $0x38] sm:$0xff]  }
 0x28e   : > { %v1094_v6 = vld [vmem:[#allocation3] sm:$0xff]  ;;  %1930 = vmatpush3.bf16.msra.mxu0 %v2058_v3 }
 0x28f   : > { %1290 = vmatprep.mubr.bf16.mxu1 %v1101_v5 }
 0x290   : > { %v1097_v7 = vld [vmem:[#allocation3 + $0x18] sm:$0x1] }
 0x291   : > { %v1100_v9 = vpack.c.bf16 %v1097_v7, %v1094_v6 }
 0x293   : > { %1291 = vmatmul.mubr.bf16.vlgmr.msra.gmra.mrb[0].mxu1 %v1100_v9 }
 0x294   : > { %1955 = vmatpush3.bf16.msra.mxu1 %v2039_v8  ;;  %1958 = vmatprep.mubr.msk.bf16.mxu1 %vm2135_vm15, %v2134_v16 }
 0x295   : > { %1956 = vmatprep.subr.bf16.mxu1 %v2134_v16 }
 0x298   : > { %1957 = vmatpush3.bf16.msra.mxu1 %v2040_v10 }
 0x299   : > { %1962 = vmatprep.subr.bf16.mxu1 %v2134_v16 }
 0x29b   : > { %1959 = vmatmul.mubr.msk.bf16.vlgmr.msra.gmra.mrb[4].mxu1 %vm1254_vm0, %v1102_v13  ;;  %v1445_v13 = vsub.s32 2, %v2731_v31 }
 0x29c   : > { %1966 = vmatprep.mubr.msk.bf16.mxu1 %vm2135_vm15, %v2134_v16  ;;  %1963 = vmatpush3.bf16.msra.mxu1 %v2054_v60 }
 0x29d   : > { %1964 = vmatprep.subr.bf16.mxu1 %v2134_v16 }
 0x2a0   : > { %1965 = vmatpush3.bf16.msra.mxu1 %v2057_v62 }
 0x366   : > { %v1906_v20 = vpop.f32.mrb[0].mxu1 }
 0x367   : > { %v1907_v21 = vpop.f32.mrb[1].mxu1 }
 0x368   : > { %v1908_v25 = vadd.f32 %v1907_v21, %v1906_v20  ;;  %v1909_v26 = vpop.f32.mrb[2].mxu1 }
 0x369   : > { %v1910_v27 = vpop.f32.mrb[3].mxu1 }
 0x36a   : > { %v1911_v28 = vadd.f32 %v1910_v27, %v1909_v26  ;;  %v1293_v33 = vadd.f32 %v1908_v25, %v1840_v29  ;;  %v1489_v25 = vld [vmem:[%s2866_s6] sm:$0x1] }
 0x36c   : > { %v1296_v39 = vadd.f32 %v1911_v28, %v1840_v29 }
 0x36e   : > { %v1333_v34 = vpop.f32.mrb[4].mxu1 }
 0x36f   : > { %v1334_v36 = vadd.f32 %v1333_v34, %v1293_v33  ;;  %v1960_v38 = vpop.f32.mrb[5].mxu1 }
 0x370   : > { %v1336_v40 = vpop.f32.mrb[6].mxu1 }
 0x371   : > { %v1340_v43 = vmax.f32 %v1334_v36, 0.0  ;;  %v1337_v44 = vadd.f32 %v1336_v40, %v1296_v39  ;;  %v1961_v45 = vpop.f32.mrb[7].mxu1 }
 0x373   : > { %v1354_v47 = vrot.slane %v1340_v43, %v1353_v37  ;;  %v1393_v48 = vcombine.high %v1340_v43, %v1340_v43  ;;  %v1341_v49 = vmax.f32 %v1337_v44, 0.0  ;;  %1346 = vst.msk [vmem:[#allocation4] sm:$0x1] %vm2741_vm1, %v1340_v43  ;;  %v1695_v44 = vld [vmem:[%s2867_s7] sm:$0x1] }
 0x375   : > { %v1355_v51 = vcombine.high %v1354_v47, %v1354_v47  ;;  %v1400_v52 = vrot.slane %v1393_v48, %v1353_v37  ;;  %1432 = vst.msk [vmem:[#allocation4 + $0x2] sm:$0x1] %vm2741_vm1, %v1341_v49  ;;  %v1362_v55 = vrot.slane %v1354_v47, %v1353_v37 }
 0x377   : > { %v1369_v56 = vrot.slane %v1355_v51, %v1353_v37  ;;  %v1410_v57 = vcombine.high %v1400_v52, %v1400_v52  ;;  %v1407_v58 = vrot.slane %v1400_v52, %v1353_v37  ;;  %v1377_v0 = vcombine.high %v1362_v55, %v1362_v55 }
 0x379   : > { %1370 = vrot.lane.b32.xlu1 %v1369_v56, %s2131_s22  ;;  %v1417_v61 = vrot.slane %v1410_v57, %v1353_v37  ;;  %1409 = vst.msk [vmem:[#allocation4 + $0x1] sm:$0x1] %vm2741_vm1, %v1407_v58  ;;  %v1422_v2 = vcombine.high %v1407_v58, %v1407_v58  ;;  %v1385_v16 = vcombine.high %v1369_v56, %v1369_v56 }
 0x37b   : > { %1418 = vrot.lane.b32.xlu0 %v1417_v61, %s2131_s22  ;;  %s2876_s22 = smov 96   ;;  %v1427_v4 = vcombine.high %v1417_v61, %v1417_v61 }
 0x37d   : > { %1378 = vrot.lane.b32.xlu1 %v1377_v0, %s2132_s27 }
 0x37f   : > { %1423 = vrot.lane.b32.xlu0 %v1422_v2, %s2132_s27  ;;  %s2817_s27 = scalar_lea.hbm %s2869_s9, %s1879_s17 }
 0x381   : > { %1386 = vrot.lane.b32.xlu1 %v1385_v16, %s2876_s22 }
 0x383   : > { %1428 = vrot.lane.b32.xlu0 %v1427_v4, %s2876_s22 }
 0x3eb   : > { %v1371_v5 = vpop.permute.xlu1 %1370 }
 0x3ec   : > { %1376 = vst.msk [vmem:[#allocation4] sm:$0x1] %vm1375_vm4, %v1371_v5 }
 0x3ed   : > { %v1419_v6 = vpop.permute.xlu0 %1418 }
 0x3ee   : > { %1421 = vst.msk [vmem:[#allocation4 + $0x1] sm:$0x1] %vm1375_vm4, %v1419_v6 }
 0x3ef   : > { %v1379_v7 = vpop.permute.xlu1 %1378 }
 0x3f0   : > { %1384 = vst.msk [vmem:[#allocation4] sm:$0x1] %vm1383_vm7, %v1379_v7 }
 0x3f1   : > { %v1424_v8 = vpop.permute.xlu0 %1423 }
 0x3f2   : > { %1426 = vst.msk [vmem:[#allocation4 + $0x1] sm:$0x1] %vm1383_vm7, %v1424_v8 }
 0x3f3   : > { %v1387_v9 = vpop.permute.xlu1 %1386 }
 0x3f4   : > { %1392 = vst.msk [vmem:[#allocation4] sm:$0x1] %vm1391_vm10, %v1387_v9 }
 0x3f5   : > { %v1429_v10 = vpop.permute.xlu0 %1428 }
 0x3f6   : > { %1431 = vst.msk [vmem:[#allocation4 + $0x1] sm:$0x1] %vm1391_vm10, %v1429_v10 }
 0x3fd   : > { %v1433_v14 = vld [vmem:[#allocation4] sm:$0x7] }
 0x3fe   : > { %v1438_v15 = vrot.slane %v1433_v14, %v1437_v11  ;;  %v1442_v17 = vrot.slane %v1433_v14, %v1441_v12  ;;  %v1446_v18 = vrot.slane %v1433_v14, %v1445_v13 }
 0x400   : > { %v1450_v19 = vpack.c.bf16 %v1438_v15, %v1438_v15  ;;  %v1451_v20 = vpack.c.bf16 %v1442_v17, %v1442_v17  ;;  %v1452_v21 = vpack.c.bf16 %v1446_v18, %v1446_v18 }
 0x402   : > { %1633 = vmatprep.mubr.bf16.mxu0 %v1451_v20  ;;  %1967 = vmatmul.mubr.msk.bf16.vlgmr.msra.gmra.mrb[8].mxu1 %vm1254_vm0, %v1452_v21 }
 0x403   : > { %1634 = vmatmul.mubr.bf16.vlgmr.msra.gmra.mrb[8].mxu0 %v1450_v19 }
 0x4d5   : > { %v1675_v22 = vpop.f32.mrb[8].mxu1 }
 0x4d6   : > { %v1931_v23 = vpop.f32.mrb[8].mxu0  ;;  %v1968_v24 = vpop.f32.mrb[9].mxu1 }
 0x4d7   : > { %v1932_v26 = vpop.f32.mrb[9].mxu0  ;;  %v1678_v27 = vpop.f32.mrb[10].mxu1 }
 0x4d8   : > { %v1933_v28 = vadd.f32 %v1932_v26, %v1931_v23  ;;  %v1934_v29 = vpop.f32.mrb[10].mxu0  ;;  %v1969_v30 = vpop.f32.mrb[11].mxu1 }
 0x4d9   : > { %v1935_v31 = vpop.f32.mrb[11].mxu0 }
 0x4da   : > { %v1636_v32 = vadd.f32 %v1933_v28, %v1489_v25 }
 0x4dc   : > { %v1676_v33 = vadd.f32 %v1675_v22, %v1636_v32 }
 0x4de   : > { %v1681_v34 = vsel %vm795_vm11, %v1676_v33, 0.0 }
 0x4df   : > { %1682 = vadd.xlane.f32.xlu1 %v1681_v34 }
 0x56c   : > { %v1683_v35 = vpop.xlane.xlu1 %1682 }
 0x56d   : > { %v1685_v36 = vmul.f32 0.03125, %v1683_v35 }
 0x56f   : > { %v1686_v37 = vsub.f32 %v1676_v33, %v1685_v36 }
 0x571   : > { %v1687_v38 = vmul.f32 %v1686_v37, %v1686_v37 }
 0x573   : > { %v1688_v39 = vsel %vm795_vm11, %v1687_v38, 0.0 }
 0x574   : > { %1689 = vadd.xlane.f32.xlu0 %v1688_v39 }
 0x601   : > { %v1690_v40 = vpop.xlane.xlu0 %1689 }
 0x602   : > { %v1691_v41 = vmul.f32 0.03125, %v1690_v40 }
 0x604   : > { %v1692_v42 = vadd.f32 1e-05, %v1691_v41 }
 0x606   : > { %2059 = vrsqrt.f32 %v1692_v42 }
 0x610   : > { %v2060_v43 = vpop.eup %2059 }
 0x611   : > { %v1694_v45 = vmul.f32 %v2060_v43, %v1686_v37 }
 0x613   : > { %v1696_v47 = vmul.f32 %v1695_v44, %v1694_v45 }
 0x615   : > { %v1698_v48 = vadd.f32 %v1697_v46, %v1696_v47 }
 0x617   : > { %2061 = vtanh.f32 %v1698_v48 }
 0x621   : > { %v2062_v49 = vpop.eup %2061 }
 0x622   : > { %1700 = vst.msk [vmem:[%s324_s21] sm:$0x1] %vm795_vm11, %v2062_v49 }
 0x623   : > { %2076 = shalt.err (!%p2073_p3)
}
 0x624   : > { %s2077_s28 = scalar_lea.hbm %s2817_s27, 16  ;;  %s2081_s21 = scalar_lea.hbm %s2869_s9, 32 }
 0x625   : > { %p2078_p4 = scmp.ne.s32.totalorder %s2817_s27, %s2077_s28  ;;  %p2082_p9 = scmp.lt.u32.totalorder %s2817_s27, %s2869_s9 }
 0x626   : > { %p2083_p10 = scmp.lt.u32.totalorder %s2081_s21, %s2077_s28  ;;  %p2085_p12 = scmp.lt.u32.totalorder %s2077_s28, %s2817_s27 }
 0x627   : > { %p2079_p7 = pnand %p2078_p4, %p2226_p5 }
 0x628   : > { %p2084_p11 = por %p2083_p10, %p2082_p9 }
 0x629   : > { %p2080_p8 = pneg %p2079_p7 }
 0x62a   : > { %p2086_p13 = por %p2085_p12, %p2084_p11 }
 0x62c   : > { %p2087_p0 = pnand %p2086_p13, %p2080_p8 }
 0x62e   : > { %2090 = shalt.err (!%p2087_p0)
}
 0x62f   : > { %1971 = dma.vmem_to_hbm [thread:$0]  (%p2226_p5), %s2819_s23, 16, %s2817_s27, %s1702_s25  }
 0x630 PF: > { %p1977_p1 = scmp.ge.s32.totalorder %s2125_s12, 2  ;;  %s1726_s26 = sand.u32 1, %s2113_s30  }
 0x631   : > { %s1727_s13 = scalar_lea.sflag [#allocation6], %s1726_s26 }
 0x632   : > { %p1974_p2 = pnand %p1977_p1, %p2230_p6 }
 0x634   : > { %2108 = dma.done.wait (!%p1974_p2), %s1727_s13, 16  }
 0x635   : > { %2110 = vsyncadd (!%p1974_p2), %s1727_s13, 4294967280  ;;  %p19_p3 = scmp.ge.s32.totalorder %s2213_s15, 4   ;;  %s2877_s30 = smov %s2117_s10 }
 0x636   : > { %s2878_s10 = smov %s2121_s11  ;;  %s2879_s11 = smov %s2224_s18 }
 0x637   : > { %s2880_s12 = smov %s2213_s15  ;;  %21 = sbr.rel (!%p19_p3) target bundleno = 3 (0x3), region = 98 }
 0x63e   :  { %1731 = vsyncpa [#allocation6], 1 }
 0x63f   :  { %1733 = vsyncpa [#allocation6 + $0x1], 1 }

</bundles_post_ra>
